<compile_context>
chip_gen: v6e
topology: v6e:2x2x1
jax: 0.10.0
libtpu: 0.0.40
codegen_flags: <defaults>
</compile_context>

<pallas_src>
import functools

import jax
import jax.numpy as jnp
from jax.experimental import pallas as pl
from jax.experimental.pallas import tpu as pltpu

EPS = 1e-5          # BatchNorm eps (PyTorch default)
NEG_SLOPE = 0.2     # F.leaky_relu negative slope
K = 16              # Conv2d kernel (1, 16)
POOL = 5            # MaxPool2d window (1, 5)
WPAD = 512          # per-sample lane-padded width (multiple of 128, >= 500)
NWIN_PAD = 128      # lane-dense padded number of pool windows (>= 91)
ZPAD = 128          # lane-dense padded latent width (>= z_size)


# ----------------------------------------------------------------------------
# Single fused kernel: conv/bn/lrelu x3 -> maxpool(+indices) -> linear -> bn1d
# ----------------------------------------------------------------------------
def _encoder_kernel(xcol1_ref, w1_ref, b1_ref, w2_ref, b2_ref, w3_ref, b3_ref,
                    ssel_ref, sw_ref, mselt_ref, bsel_ref, hm_ref, bl_ref,
                    y_ref, idx_ref, *, n, w_in):
    f32 = jnp.float32
    L = n * WPAD
    # per-sample local lane index (0..WPAD-1) for the whole lane-batched carry
    local = jnp.bitwise_and(
        jax.lax.broadcasted_iota(jnp.int32, (1, L), 1), WPAD - 1)

    def shift_left(x, k):
        # out[:, p] = x[:, (p + k) % L] — XLU lane rotation; lanes that wrap in
        # from the next sample only land at per-sample positions >= WPAD - k,
        # which are always masked / never selected (w_in <= WPAD).
        if k == 0:
            return x
        return pltpu.roll(x, shift=L - k, axis=1)

    def bn_lrelu(y, wv):
        # BatchNorm2d (train-mode batch stats over n samples x wv valid lanes)
        # + LeakyReLU(0.2); invalid lanes are forced to exactly 0.
        mask = local < wv
        cnt = float(n * wv)
        mean = jnp.sum(jnp.where(mask, y, 0.0), axis=1, keepdims=True) / cnt
        yc = jnp.where(mask, y - mean, 0.0)
        var = jnp.sum(yc * yc, axis=1, keepdims=True) / cnt
        yn = yc * jax.lax.rsqrt(var + EPS)
        return jnp.where(yn >= 0.0, yn, NEG_SLOPE * yn)

    def conv(h, w_ref, b_ref):
        # im2col via XLU rolls, ONE contraction-(K*c_in) matmul for the batch
        xcol = jnp.concatenate([shift_left(h, k) for k in range(K)], axis=0)
        return jnp.dot(w_ref[...], xcol, preferred_element_type=f32) + b_ref[...]

    w1v = w_in - (K - 1)
    w2v = w1v - (K - 1)
    w3v = w2v - (K - 1)

    # layer 1: im2col precomputed in the wrapper (pure function of the input)
    h = jnp.dot(w1_ref[...], xcol1_ref[...], preferred_element_type=f32) + b1_ref[...]
    h = bn_lrelu(h, w1v)
    h = bn_lrelu(conv(h, w2_ref, b2_ref), w2v)
    h = bn_lrelu(conv(h, w3_ref, b3_ref), w3v)

    # MaxPool2d((1,5)) + indices: running max / first-argmax over 5 offsets,
    # lane-batched over the whole batch (shifted reads via XLU rolls).
    mwin = h
    aoff = jnp.zeros_like(h)
    for o in range(1, POOL):
        sh = shift_left(h, o)
        take = sh > mwin
        mwin = jnp.where(take, sh, mwin)
        aoff = jnp.where(take, float(o), aoff)

    # restack (d, n*WPAD) -> (n*d, WPAD); 512-aligned lane slices, no relayout
    mwin_s = jnp.concatenate(
        [mwin[:, i * WPAD:(i + 1) * WPAD] for i in range(n)], axis=0)
    aoff_s = jnp.concatenate(
        [aoff[:, i * WPAD:(i + 1) * WPAD] for i in range(n)], axis=0)

    # pool indices: one batched matmul + one lane-dense (n*d, NWIN_PAD) store
    offs = jnp.dot(aoff_s, ssel_ref[...], preferred_element_type=f32)
    jcol = jax.lax.broadcasted_iota(jnp.int32, offs.shape, 1)
    idx_ref[...] = POOL * jcol + offs.astype(jnp.int32)

    # pooled values + Flatten + Linear, fully batched:
    #   r[i*d+c, c'*z+zo] = sum_j pooled[i,c,j] * wl[zo, c'*n_win+j]
    #   mselt keeps only c == c'; block-diagonal bsel sums over c per sample.
    r = jnp.dot(mwin_s, sw_ref[...], preferred_element_type=f32) * mselt_ref[...]
    t = jnp.dot(bsel_ref[...], r, preferred_element_type=f32)              # (n, d*z)
    y = jnp.dot(t, hm_ref[...], preferred_element_type=f32) + bl_ref[...]  # (n, ZPAD)

    # BatchNorm1d over the batch (train-mode stats, gamma=1, beta=0)
    mu = jnp.mean(y, axis=0, keepdims=True)
    var = jnp.mean((y - mu) ** 2, axis=0, keepdims=True)
    y_ref[...] = (y - mu) * jax.lax.rsqrt(var + EPS)


# ----------------------------------------------------------------------------
# Wrapper: one-time layout prep / weight packing, then a single pallas_call.
# ----------------------------------------------------------------------------
def _pack_conv(w, b):
    # Conv2d weight (c_out, c_in, K) (H already squeezed) -> (c_out, K*c_in),
    # column index = k*c_in + ci (matches the kernel's im2col row ordering).
    c_out, c_in, k = w.shape
    wp = jnp.transpose(w.astype(jnp.float32), (0, 2, 1)).reshape(c_out, k * c_in)
    return wp, b.astype(jnp.float32).reshape(c_out, 1)


def encoder_forward(params, x, *, d, z_size):
    """x: (N, channels, 1, W) NCHW with H == 1.  Returns (y, indices)."""
    n, ch, one, w_in = x.shape
    assert one == 1
    # roll-based im2col/pool invariant: every in-window read stays inside its
    # sample's WPAD-lane block, so wrapped-in cross-sample lanes are always masked.
    assert w_in <= WPAD, (w_in, WPAD)
    w3v = w_in - 3 * (K - 1)
    n_win = w3v // POOL
    assert n_win <= NWIN_PAD and z_size <= ZPAD
    assert params["wl"].shape == (z_size, n_win * d)

    xf = x[:, :, 0, :].astype(jnp.float32)                              # (n, ch, w_in)
    # layer-1 im2col precomputed: row k*ch + ci, lane i*WPAD + p -> x[i, ci, p+k]
    cols = []
    for k in range(K):
        cols.append(jnp.pad(xf[:, :, k:],
                            ((0, 0), (0, 0), (0, WPAD - (w_in - k)))))
    xcol1 = jnp.transpose(jnp.stack(cols, 0), (0, 2, 1, 3)).reshape(K * ch, n * WPAD)

    w1, b1 = _pack_conv(params["w1"], params["b1"])
    w2, b2 = _pack_conv(params["w2"], params["b2"])
    w3, b3 = _pack_conv(params["w3"], params["b3"])

    # window-start selector (lane-dense padded): ssel[w, j] = 1 iff w == 5j, j < n_win
    jj = jnp.arange(NWIN_PAD)
    ssel = ((jnp.arange(WPAD)[:, None] == POOL * jj[None, :]) &
            (jj[None, :] < n_win)).astype(jnp.float32)
    # Linear weight (flatten order c*n_win + j) repacked and fused with the selector
    wl = params["wl"].astype(jnp.float32)                               # (z, d*n_win)
    wl_big = jnp.transpose(wl.reshape(z_size, d, n_win),
                           (2, 1, 0)).reshape(n_win, d * z_size)        # (n_win, d*z)
    ssel_v = (jnp.arange(WPAD)[:, None] ==
              POOL * jnp.arange(n_win)[None, :]).astype(jnp.float32)    # (WPAD, n_win)
    sw = ssel_v @ wl_big                                                # (WPAD, d*z)
    # keep-only-(c == c') mask, tiled over samples
    msel = (jnp.arange(d)[:, None] ==
            (jnp.arange(d * z_size) // z_size)[None, :]).astype(jnp.float32)
    mselt = jnp.tile(msel, (n, 1))                                      # (n*d, d*z)
    # block-diagonal per-sample row-sum selector
    bsel = (jnp.arange(n)[:, None] ==
            (jnp.arange(n * d) // d)[None, :]).astype(jnp.float32)      # (n, n*d)
    # fold the d per-channel partials into the z outputs (lane-dense padded)
    hm = ((jnp.arange(d * z_size) % z_size)[:, None] ==
          jnp.arange(ZPAD)[None, :]).astype(jnp.float32)                # (d*z, ZPAD)
    bl = jnp.pad(params["bl"].astype(jnp.float32).reshape(1, z_size),
                 ((0, 0), (0, ZPAD - z_size)))

    kern = functools.partial(_encoder_kernel, n=n, w_in=w_in)
    vmem = pl.BlockSpec(memory_space=pltpu.MemorySpace.VMEM)
    y, idx = pl.pallas_call(
        kern,
        out_shape=(jax.ShapeDtypeStruct((n, ZPAD), jnp.float32),
                   jax.ShapeDtypeStruct((n * d, NWIN_PAD), jnp.int32)),
        in_specs=[vmem] * 13,
        out_specs=(vmem, vmem),
    )(xcol1, w1, b1, w2, b2, w3, b3, ssel, sw, mselt, bsel, hm, bl)

    y = y[:, :z_size].reshape(n, z_size, 1, 1)
    idx = idx.reshape(n, d, NWIN_PAD)[:, :, :n_win].reshape(n, d, 1, n_win)
    return y, idx


# ----------------------------------------------------------------------------
# Pure-JAX reference (for validation)
# ----------------------------------------------------------------------------
def encoder_reference(params, x, *, d, z_size):
    n, _, _, _ = x.shape
    h = x[:, :, 0, :].astype(jnp.float32)

    def conv(h, w, b):
        k = w.shape[2]
        wout = h.shape[2] - k + 1
        cols = jnp.stack([h[:, :, kk:kk + wout] for kk in range(k)], axis=-1)
        return jnp.einsum('nctk,ock->not', cols, w) + b[None, :, None]

    def bn_lrelu(h):
        mu = jnp.mean(h, axis=(0, 2), keepdims=True)
        var = jnp.mean((h - mu) ** 2, axis=(0, 2), keepdims=True)
        hn = (h - mu) * jax.lax.rsqrt(var + EPS)
        return jnp.where(hn >= 0, hn, NEG_SLOPE * hn)

    h = bn_lrelu(conv(h, params["w1"], params["b1"]))
    h = bn_lrelu(conv(h, params["w2"], params["b2"]))
    h = bn_lrelu(conv(h, params["w3"], params["b3"]))

    n_win = h.shape[2] // POOL
    hw = h[:, :, :n_win * POOL].reshape(n, d, n_win, POOL)
    pooled = jnp.max(hw, axis=3)
    am = jnp.argmax(hw, axis=3).astype(jnp.int32)
    indices = POOL * jnp.arange(n_win, dtype=jnp.int32)[None, None, :] + am

    y = pooled.reshape(n, d * n_win) @ params["wl"].T + params["bl"][None, :]
    mu = jnp.mean(y, axis=0, keepdims=True)
    var = jnp.mean((y - mu) ** 2, axis=0, keepdims=True)
    y = (y - mu) * jax.lax.rsqrt(var + EPS)
    return y.reshape(n, z_size, 1, 1), indices[:, :, None, :]


if __name__ == "__main__":
    key = jax.random.PRNGKey(0)
    # W=500 is forced by the module's hard-coded Linear(91*d, z); the rest is small.
    N, channels, d, z_size, W = 4, 1, 8, 16, 500
    n_win = (W - 3 * (K - 1)) // POOL                     # 91

    k1, k2, k3, k4, kx = jax.random.split(key, 5)
    std = 0.02                                            # weight_init(mean=0, std=0.02); biases zeroed
    params = {
        "w1": jax.random.normal(k1, (d, channels, K), jnp.float32) * std,
        "b1": jnp.zeros((d,), jnp.float32),
        "w2": jax.random.normal(k2, (d, d, K), jnp.float32) * std,
        "b2": jnp.zeros((d,), jnp.float32),
        "w3": jax.random.normal(k3, (d, d, K), jnp.float32) * std,
        "b3": jnp.zeros((d,), jnp.float32),
        "wl": jax.random.normal(k4, (z_size, n_win * d), jnp.float32) * std,
        "bl": jnp.zeros((z_size,), jnp.float32),
    }
    x = jax.random.normal(kx, (N, channels, 1, W), jnp.float32)

    fwd = jax.jit(functools.partial(encoder_forward, d=d, z_size=z_size))
    y, idx = fwd(params, x)
    y, idx = jax.block_until_ready((y, idx))

    y_ref, idx_ref = encoder_reference(params, x, d=d, z_size=z_size)

    assert y.shape == (N, z_size, 1, 1), y.shape
    assert idx.shape == (N, d, 1, n_win), idx.shape
    assert bool(jnp.all(jnp.isfinite(y)))
    assert bool(jnp.allclose(y, y_ref, atol=2e-3, rtol=2e-2)), \
        float(jnp.max(jnp.abs(y - y_ref)))
    base = POOL * jnp.arange(n_win, dtype=jnp.int32)[None, None, None, :]
    assert bool(jnp.all((idx >= base) & (idx < base + POOL)))
    match = float(jnp.mean((idx == idx_ref).astype(jnp.float32)))
    assert match > 0.99, match                            # tolerate rare f32 near-tie argmax flips
    print("KERNEL_OK")
</pallas_src>

<mosaic_0001>
module attributes {stable_mosaic.version = 11 : i64} {
  func.func @_encoder_kernel(%arg0: memref<16x2048xf32, #tpu.memory_space<vmem>>, %arg1: memref<8x16xf32, #tpu.memory_space<vmem>>, %arg2: memref<8x1xf32, #tpu.memory_space<vmem>>, %arg3: memref<8x128xf32, #tpu.memory_space<vmem>>, %arg4: memref<8x1xf32, #tpu.memory_space<vmem>>, %arg5: memref<8x128xf32, #tpu.memory_space<vmem>>, %arg6: memref<8x1xf32, #tpu.memory_space<vmem>>, %arg7: memref<512x128xf32, #tpu.memory_space<vmem>>, %arg8: memref<512x128xf32, #tpu.memory_space<vmem>>, %arg9: memref<32x128xf32, #tpu.memory_space<vmem>>, %arg10: memref<4x32xf32, #tpu.memory_space<vmem>>, %arg11: memref<128x128xf32, #tpu.memory_space<vmem>>, %arg12: memref<1x128xf32, #tpu.memory_space<vmem>>, %arg13: memref<4x128xf32, #tpu.memory_space<vmem>>, %arg14: memref<32x128xi32, #tpu.memory_space<vmem>>) attributes {dimension_semantics = [], scalar_prefetch = 0 : i64, scratch_operands = 0 : i64, tpu.core_type = #tpu.core_type<tc>} {
    %0 = tpu.iota {dimensions = array<i32: 1>} : vector<1x2048xi32>
    %c511_i32 = arith.constant 511 : i32
    %1 = vector.broadcast %c511_i32 : i32 to vector<1x2048xi32>
    %2 = arith.andi %0, %1 : vector<1x2048xi32>
    %c0 = arith.constant 0 : index
    %c0_0 = arith.constant 0 : index
    %3 = vector.load %arg1[%c0, %c0_0] : memref<8x16xf32, #tpu.memory_space<vmem>>, vector<8x16xf32>
    %c0_1 = arith.constant 0 : index
    %c0_2 = arith.constant 0 : index
    %4 = vector.load %arg0[%c0_1, %c0_2] : memref<16x2048xf32, #tpu.memory_space<vmem>>, vector<16x2048xf32>
    %cst = arith.constant dense<0.000000e+00> : vector<8x2048xf32>
    %5 = tpu.matmul %3, %4, %cst {dimension_numbers = #tpu.dot_dimension_numbers<[1], [0], [0], [1], [0, 0, 1, 1], [], []>} : vector<8x16xf32>, vector<16x2048xf32>, vector<8x2048xf32> -> vector<8x2048xf32>
    %c0_3 = arith.constant 0 : index
    %c0_4 = arith.constant 0 : index
    %6 = vector.load %arg2[%c0_3, %c0_4] : memref<8x1xf32, #tpu.memory_space<vmem>>, vector<8x1xf32>
    %7 = vector.broadcast %6 : vector<8x1xf32> to vector<8x2048xf32>
    %8 = arith.addf %5, %7 : vector<8x2048xf32>
    %c485_i32 = arith.constant 485 : i32
    %9 = vector.broadcast %c485_i32 : i32 to vector<1x2048xi32>
    %10 = arith.cmpi slt, %2, %9 : vector<1x2048xi32>
    %cst_5 = arith.constant 0.000000e+00 : f32
    %11 = vector.shape_cast %10 : vector<1x2048xi1> to vector<1x2048xi1>
    %12 = vector.broadcast %11 : vector<1x2048xi1> to vector<8x2048xi1>
    %13 = vector.broadcast %cst_5 : f32 to vector<8x2048xf32>
    %14 = arith.select %12, %8, %13 : vector<8x2048xi1>, vector<8x2048xf32>
    %cst_6 = arith.constant dense<0.000000e+00> : vector<8xf32>
    %15 = vector.multi_reduction <add>, %14, %cst_6 [1] : vector<8x2048xf32> to vector<8xf32>
    %16 = vector.shape_cast %15 : vector<8xf32> to vector<8x1xf32>
    %cst_7 = arith.constant 1.940000e+03 : f32
    %17 = vector.broadcast %cst_7 : f32 to vector<8x1xf32>
    %18 = arith.divf %16, %17 : vector<8x1xf32>
    %19 = vector.broadcast %18 : vector<8x1xf32> to vector<8x2048xf32>
    %20 = arith.subf %8, %19 : vector<8x2048xf32>
    %cst_8 = arith.constant 0.000000e+00 : f32
    %21 = vector.shape_cast %10 : vector<1x2048xi1> to vector<1x2048xi1>
    %22 = vector.broadcast %21 : vector<1x2048xi1> to vector<8x2048xi1>
    %23 = vector.broadcast %cst_8 : f32 to vector<8x2048xf32>
    %24 = arith.select %22, %20, %23 : vector<8x2048xi1>, vector<8x2048xf32>
    %25 = arith.mulf %24, %24 : vector<8x2048xf32>
    %cst_9 = arith.constant dense<0.000000e+00> : vector<8xf32>
    %26 = vector.multi_reduction <add>, %25, %cst_9 [1] : vector<8x2048xf32> to vector<8xf32>
    %27 = vector.shape_cast %26 : vector<8xf32> to vector<8x1xf32>
    %cst_10 = arith.constant 1.940000e+03 : f32
    %28 = vector.broadcast %cst_10 : f32 to vector<8x1xf32>
    %29 = arith.divf %27, %28 : vector<8x1xf32>
    %cst_11 = arith.constant 9.99999974E-6 : f32
    %30 = vector.broadcast %cst_11 : f32 to vector<8x1xf32>
    %31 = arith.addf %29, %30 : vector<8x1xf32>
    %32 = math.rsqrt %31 : vector<8x1xf32>
    %33 = vector.broadcast %32 : vector<8x1xf32> to vector<8x2048xf32>
    %34 = arith.mulf %24, %33 : vector<8x2048xf32>
    %cst_12 = arith.constant 0.000000e+00 : f32
    %35 = vector.broadcast %cst_12 : f32 to vector<8x2048xf32>
    %36 = arith.cmpf oge, %34, %35 : vector<8x2048xf32>
    %cst_13 = arith.constant 2.000000e-01 : f32
    %37 = vector.broadcast %cst_13 : f32 to vector<8x2048xf32>
    %38 = arith.mulf %37, %34 : vector<8x2048xf32>
    %39 = arith.select %36, %34, %38 : vector<8x2048xi1>, vector<8x2048xf32>
    %c2047_i32 = arith.constant 2047 : i32
    %40 = tpu.dynamic_rotate %39 by %c2047_i32 dim 1 : vector<8x2048xf32>, i32 -> vector<8x2048xf32>
    %c2046_i32 = arith.constant 2046 : i32
    %41 = tpu.dynamic_rotate %39 by %c2046_i32 dim 1 : vector<8x2048xf32>, i32 -> vector<8x2048xf32>
    %c2045_i32 = arith.constant 2045 : i32
    %42 = tpu.dynamic_rotate %39 by %c2045_i32 dim 1 : vector<8x2048xf32>, i32 -> vector<8x2048xf32>
    %c2044_i32 = arith.constant 2044 : i32
    %43 = tpu.dynamic_rotate %39 by %c2044_i32 dim 1 : vector<8x2048xf32>, i32 -> vector<8x2048xf32>
    %c2043_i32 = arith.constant 2043 : i32
    %44 = tpu.dynamic_rotate %39 by %c2043_i32 dim 1 : vector<8x2048xf32>, i32 -> vector<8x2048xf32>
    %c2042_i32 = arith.constant 2042 : i32
    %45 = tpu.dynamic_rotate %39 by %c2042_i32 dim 1 : vector<8x2048xf32>, i32 -> vector<8x2048xf32>
    %c2041_i32 = arith.constant 2041 : i32
    %46 = tpu.dynamic_rotate %39 by %c2041_i32 dim 1 : vector<8x2048xf32>, i32 -> vector<8x2048xf32>
    %c2040_i32 = arith.constant 2040 : i32
    %47 = tpu.dynamic_rotate %39 by %c2040_i32 dim 1 : vector<8x2048xf32>, i32 -> vector<8x2048xf32>
    %c2039_i32 = arith.constant 2039 : i32
    %48 = tpu.dynamic_rotate %39 by %c2039_i32 dim 1 : vector<8x2048xf32>, i32 -> vector<8x2048xf32>
    %c2038_i32 = arith.constant 2038 : i32
    %49 = tpu.dynamic_rotate %39 by %c2038_i32 dim 1 : vector<8x2048xf32>, i32 -> vector<8x2048xf32>
    %c2037_i32 = arith.constant 2037 : i32
    %50 = tpu.dynamic_rotate %39 by %c2037_i32 dim 1 : vector<8x2048xf32>, i32 -> vector<8x2048xf32>
    %c2036_i32 = arith.constant 2036 : i32
    %51 = tpu.dynamic_rotate %39 by %c2036_i32 dim 1 : vector<8x2048xf32>, i32 -> vector<8x2048xf32>
    %c2035_i32 = arith.constant 2035 : i32
    %52 = tpu.dynamic_rotate %39 by %c2035_i32 dim 1 : vector<8x2048xf32>, i32 -> vector<8x2048xf32>
    %c2034_i32 = arith.constant 2034 : i32
    %53 = tpu.dynamic_rotate %39 by %c2034_i32 dim 1 : vector<8x2048xf32>, i32 -> vector<8x2048xf32>
    %c2033_i32 = arith.constant 2033 : i32
    %54 = tpu.dynamic_rotate %39 by %c2033_i32 dim 1 : vector<8x2048xf32>, i32 -> vector<8x2048xf32>
    %55 = tpu.concatenate %39, %40, %41, %42, %43, %44, %45, %46, %47, %48, %49, %50, %51, %52, %53, %54 in 0 : vector<8x2048xf32>, vector<8x2048xf32>, vector<8x2048xf32>, vector<8x2048xf32>, vector<8x2048xf32>, vector<8x2048xf32>, vector<8x2048xf32>, vector<8x2048xf32>, vector<8x2048xf32>, vector<8x2048xf32>, vector<8x2048xf32>, vector<8x2048xf32>, vector<8x2048xf32>, vector<8x2048xf32>, vector<8x2048xf32>, vector<8x2048xf32> -> vector<128x2048xf32>
    %c0_14 = arith.constant 0 : index
    %c0_15 = arith.constant 0 : index
    %56 = vector.load %arg3[%c0_14, %c0_15] : memref<8x128xf32, #tpu.memory_space<vmem>>, vector<8x128xf32>
    %cst_16 = arith.constant dense<0.000000e+00> : vector<8x2048xf32>
    %57 = tpu.matmul %56, %55, %cst_16 {dimension_numbers = #tpu.dot_dimension_numbers<[1], [0], [0], [1], [0, 0, 1, 1], [], []>} : vector<8x128xf32>, vector<128x2048xf32>, vector<8x2048xf32> -> vector<8x2048xf32>
    %c0_17 = arith.constant 0 : index
    %c0_18 = arith.constant 0 : index
    %58 = vector.load %arg4[%c0_17, %c0_18] : memref<8x1xf32, #tpu.memory_space<vmem>>, vector<8x1xf32>
    %59 = vector.broadcast %58 : vector<8x1xf32> to vector<8x2048xf32>
    %60 = arith.addf %57, %59 : vector<8x2048xf32>
    %c470_i32 = arith.constant 470 : i32
    %61 = vector.broadcast %c470_i32 : i32 to vector<1x2048xi32>
    %62 = arith.cmpi slt, %2, %61 : vector<1x2048xi32>
    %cst_19 = arith.constant 0.000000e+00 : f32
    %63 = vector.shape_cast %62 : vector<1x2048xi1> to vector<1x2048xi1>
    %64 = vector.broadcast %63 : vector<1x2048xi1> to vector<8x2048xi1>
    %65 = vector.broadcast %cst_19 : f32 to vector<8x2048xf32>
    %66 = arith.select %64, %60, %65 : vector<8x2048xi1>, vector<8x2048xf32>
    %cst_20 = arith.constant dense<0.000000e+00> : vector<8xf32>
    %67 = vector.multi_reduction <add>, %66, %cst_20 [1] : vector<8x2048xf32> to vector<8xf32>
    %68 = vector.shape_cast %67 : vector<8xf32> to vector<8x1xf32>
    %cst_21 = arith.constant 1.880000e+03 : f32
    %69 = vector.broadcast %cst_21 : f32 to vector<8x1xf32>
    %70 = arith.divf %68, %69 : vector<8x1xf32>
    %71 = vector.broadcast %70 : vector<8x1xf32> to vector<8x2048xf32>
    %72 = arith.subf %60, %71 : vector<8x2048xf32>
    %cst_22 = arith.constant 0.000000e+00 : f32
    %73 = vector.shape_cast %62 : vector<1x2048xi1> to vector<1x2048xi1>
    %74 = vector.broadcast %73 : vector<1x2048xi1> to vector<8x2048xi1>
    %75 = vector.broadcast %cst_22 : f32 to vector<8x2048xf32>
    %76 = arith.select %74, %72, %75 : vector<8x2048xi1>, vector<8x2048xf32>
    %77 = arith.mulf %76, %76 : vector<8x2048xf32>
    %cst_23 = arith.constant dense<0.000000e+00> : vector<8xf32>
    %78 = vector.multi_reduction <add>, %77, %cst_23 [1] : vector<8x2048xf32> to vector<8xf32>
    %79 = vector.shape_cast %78 : vector<8xf32> to vector<8x1xf32>
    %cst_24 = arith.constant 1.880000e+03 : f32
    %80 = vector.broadcast %cst_24 : f32 to vector<8x1xf32>
    %81 = arith.divf %79, %80 : vector<8x1xf32>
    %cst_25 = arith.constant 9.99999974E-6 : f32
    %82 = vector.broadcast %cst_25 : f32 to vector<8x1xf32>
    %83 = arith.addf %81, %82 : vector<8x1xf32>
    %84 = math.rsqrt %83 : vector<8x1xf32>
    %85 = vector.broadcast %84 : vector<8x1xf32> to vector<8x2048xf32>
    %86 = arith.mulf %76, %85 : vector<8x2048xf32>
    %cst_26 = arith.constant 0.000000e+00 : f32
    %87 = vector.broadcast %cst_26 : f32 to vector<8x2048xf32>
    %88 = arith.cmpf oge, %86, %87 : vector<8x2048xf32>
    %cst_27 = arith.constant 2.000000e-01 : f32
    %89 = vector.broadcast %cst_27 : f32 to vector<8x2048xf32>
    %90 = arith.mulf %89, %86 : vector<8x2048xf32>
    %91 = arith.select %88, %86, %90 : vector<8x2048xi1>, vector<8x2048xf32>
    %c2047_i32_28 = arith.constant 2047 : i32
    %92 = tpu.dynamic_rotate %91 by %c2047_i32_28 dim 1 : vector<8x2048xf32>, i32 -> vector<8x2048xf32>
    %c2046_i32_29 = arith.constant 2046 : i32
    %93 = tpu.dynamic_rotate %91 by %c2046_i32_29 dim 1 : vector<8x2048xf32>, i32 -> vector<8x2048xf32>
    %c2045_i32_30 = arith.constant 2045 : i32
    %94 = tpu.dynamic_rotate %91 by %c2045_i32_30 dim 1 : vector<8x2048xf32>, i32 -> vector<8x2048xf32>
    %c2044_i32_31 = arith.constant 2044 : i32
    %95 = tpu.dynamic_rotate %91 by %c2044_i32_31 dim 1 : vector<8x2048xf32>, i32 -> vector<8x2048xf32>
    %c2043_i32_32 = arith.constant 2043 : i32
    %96 = tpu.dynamic_rotate %91 by %c2043_i32_32 dim 1 : vector<8x2048xf32>, i32 -> vector<8x2048xf32>
    %c2042_i32_33 = arith.constant 2042 : i32
    %97 = tpu.dynamic_rotate %91 by %c2042_i32_33 dim 1 : vector<8x2048xf32>, i32 -> vector<8x2048xf32>
    %c2041_i32_34 = arith.constant 2041 : i32
    %98 = tpu.dynamic_rotate %91 by %c2041_i32_34 dim 1 : vector<8x2048xf32>, i32 -> vector<8x2048xf32>
    %c2040_i32_35 = arith.constant 2040 : i32
    %99 = tpu.dynamic_rotate %91 by %c2040_i32_35 dim 1 : vector<8x2048xf32>, i32 -> vector<8x2048xf32>
    %c2039_i32_36 = arith.constant 2039 : i32
    %100 = tpu.dynamic_rotate %91 by %c2039_i32_36 dim 1 : vector<8x2048xf32>, i32 -> vector<8x2048xf32>
    %c2038_i32_37 = arith.constant 2038 : i32
    %101 = tpu.dynamic_rotate %91 by %c2038_i32_37 dim 1 : vector<8x2048xf32>, i32 -> vector<8x2048xf32>
    %c2037_i32_38 = arith.constant 2037 : i32
    %102 = tpu.dynamic_rotate %91 by %c2037_i32_38 dim 1 : vector<8x2048xf32>, i32 -> vector<8x2048xf32>
    %c2036_i32_39 = arith.constant 2036 : i32
    %103 = tpu.dynamic_rotate %91 by %c2036_i32_39 dim 1 : vector<8x2048xf32>, i32 -> vector<8x2048xf32>
    %c2035_i32_40 = arith.constant 2035 : i32
    %104 = tpu.dynamic_rotate %91 by %c2035_i32_40 dim 1 : vector<8x2048xf32>, i32 -> vector<8x2048xf32>
    %c2034_i32_41 = arith.constant 2034 : i32
    %105 = tpu.dynamic_rotate %91 by %c2034_i32_41 dim 1 : vector<8x2048xf32>, i32 -> vector<8x2048xf32>
    %c2033_i32_42 = arith.constant 2033 : i32
    %106 = tpu.dynamic_rotate %91 by %c2033_i32_42 dim 1 : vector<8x2048xf32>, i32 -> vector<8x2048xf32>
    %107 = tpu.concatenate %91, %92, %93, %94, %95, %96, %97, %98, %99, %100, %101, %102, %103, %104, %105, %106 in 0 : vector<8x2048xf32>, vector<8x2048xf32>, vector<8x2048xf32>, vector<8x2048xf32>, vector<8x2048xf32>, vector<8x2048xf32>, vector<8x2048xf32>, vector<8x2048xf32>, vector<8x2048xf32>, vector<8x2048xf32>, vector<8x2048xf32>, vector<8x2048xf32>, vector<8x2048xf32>, vector<8x2048xf32>, vector<8x2048xf32>, vector<8x2048xf32> -> vector<128x2048xf32>
    %c0_43 = arith.constant 0 : index
    %c0_44 = arith.constant 0 : index
    %108 = vector.load %arg5[%c0_43, %c0_44] : memref<8x128xf32, #tpu.memory_space<vmem>>, vector<8x128xf32>
    %cst_45 = arith.constant dense<0.000000e+00> : vector<8x2048xf32>
    %109 = tpu.matmul %108, %107, %cst_45 {dimension_numbers = #tpu.dot_dimension_numbers<[1], [0], [0], [1], [0, 0, 1, 1], [], []>} : vector<8x128xf32>, vector<128x2048xf32>, vector<8x2048xf32> -> vector<8x2048xf32>
    %c0_46 = arith.constant 0 : index
    %c0_47 = arith.constant 0 : index
    %110 = vector.load %arg6[%c0_46, %c0_47] : memref<8x1xf32, #tpu.memory_space<vmem>>, vector<8x1xf32>
    %111 = vector.broadcast %110 : vector<8x1xf32> to vector<8x2048xf32>
    %112 = arith.addf %109, %111 : vector<8x2048xf32>
    %c455_i32 = arith.constant 455 : i32
    %113 = vector.broadcast %c455_i32 : i32 to vector<1x2048xi32>
    %114 = arith.cmpi slt, %2, %113 : vector<1x2048xi32>
    %cst_48 = arith.constant 0.000000e+00 : f32
    %115 = vector.shape_cast %114 : vector<1x2048xi1> to vector<1x2048xi1>
    %116 = vector.broadcast %115 : vector<1x2048xi1> to vector<8x2048xi1>
    %117 = vector.broadcast %cst_48 : f32 to vector<8x2048xf32>
    %118 = arith.select %116, %112, %117 : vector<8x2048xi1>, vector<8x2048xf32>
    %cst_49 = arith.constant dense<0.000000e+00> : vector<8xf32>
    %119 = vector.multi_reduction <add>, %118, %cst_49 [1] : vector<8x2048xf32> to vector<8xf32>
    %120 = vector.shape_cast %119 : vector<8xf32> to vector<8x1xf32>
    %cst_50 = arith.constant 1.820000e+03 : f32
    %121 = vector.broadcast %cst_50 : f32 to vector<8x1xf32>
    %122 = arith.divf %120, %121 : vector<8x1xf32>
    %123 = vector.broadcast %122 : vector<8x1xf32> to vector<8x2048xf32>
    %124 = arith.subf %112, %123 : vector<8x2048xf32>
    %cst_51 = arith.constant 0.000000e+00 : f32
    %125 = vector.shape_cast %114 : vector<1x2048xi1> to vector<1x2048xi1>
    %126 = vector.broadcast %125 : vector<1x2048xi1> to vector<8x2048xi1>
    %127 = vector.broadcast %cst_51 : f32 to vector<8x2048xf32>
    %128 = arith.select %126, %124, %127 : vector<8x2048xi1>, vector<8x2048xf32>
    %129 = arith.mulf %128, %128 : vector<8x2048xf32>
    %cst_52 = arith.constant dense<0.000000e+00> : vector<8xf32>
    %130 = vector.multi_reduction <add>, %129, %cst_52 [1] : vector<8x2048xf32> to vector<8xf32>
    %131 = vector.shape_cast %130 : vector<8xf32> to vector<8x1xf32>
    %cst_53 = arith.constant 1.820000e+03 : f32
    %132 = vector.broadcast %cst_53 : f32 to vector<8x1xf32>
    %133 = arith.divf %131, %132 : vector<8x1xf32>
    %cst_54 = arith.constant 9.99999974E-6 : f32
    %134 = vector.broadcast %cst_54 : f32 to vector<8x1xf32>
    %135 = arith.addf %133, %134 : vector<8x1xf32>
    %136 = math.rsqrt %135 : vector<8x1xf32>
    %137 = vector.broadcast %136 : vector<8x1xf32> to vector<8x2048xf32>
    %138 = arith.mulf %128, %137 : vector<8x2048xf32>
    %cst_55 = arith.constant 0.000000e+00 : f32
    %139 = vector.broadcast %cst_55 : f32 to vector<8x2048xf32>
    %140 = arith.cmpf oge, %138, %139 : vector<8x2048xf32>
    %cst_56 = arith.constant 2.000000e-01 : f32
    %141 = vector.broadcast %cst_56 : f32 to vector<8x2048xf32>
    %142 = arith.mulf %141, %138 : vector<8x2048xf32>
    %143 = arith.select %140, %138, %142 : vector<8x2048xi1>, vector<8x2048xf32>
    %cst_57 = arith.constant 0.000000e+00 : f32
    %144 = vector.broadcast %cst_57 : f32 to vector<8x2048xf32>
    %c2047_i32_58 = arith.constant 2047 : i32
    %145 = tpu.dynamic_rotate %143 by %c2047_i32_58 dim 1 : vector<8x2048xf32>, i32 -> vector<8x2048xf32>
    %146 = arith.cmpf ogt, %145, %143 : vector<8x2048xf32>
    %147 = arith.select %146, %145, %143 : vector<8x2048xi1>, vector<8x2048xf32>
    %cst_59 = arith.constant 1.000000e+00 : f32
    %148 = vector.broadcast %cst_59 : f32 to vector<8x2048xf32>
    %149 = arith.select %146, %148, %144 : vector<8x2048xi1>, vector<8x2048xf32>
    %c2046_i32_60 = arith.constant 2046 : i32
    %150 = tpu.dynamic_rotate %143 by %c2046_i32_60 dim 1 : vector<8x2048xf32>, i32 -> vector<8x2048xf32>
    %151 = arith.cmpf ogt, %150, %147 : vector<8x2048xf32>
    %152 = arith.select %151, %150, %147 : vector<8x2048xi1>, vector<8x2048xf32>
    %cst_61 = arith.constant 2.000000e+00 : f32
    %153 = vector.broadcast %cst_61 : f32 to vector<8x2048xf32>
    %154 = arith.select %151, %153, %149 : vector<8x2048xi1>, vector<8x2048xf32>
    %c2045_i32_62 = arith.constant 2045 : i32
    %155 = tpu.dynamic_rotate %143 by %c2045_i32_62 dim 1 : vector<8x2048xf32>, i32 -> vector<8x2048xf32>
    %156 = arith.cmpf ogt, %155, %152 : vector<8x2048xf32>
    %157 = arith.select %156, %155, %152 : vector<8x2048xi1>, vector<8x2048xf32>
    %cst_63 = arith.constant 3.000000e+00 : f32
    %158 = vector.broadcast %cst_63 : f32 to vector<8x2048xf32>
    %159 = arith.select %156, %158, %154 : vector<8x2048xi1>, vector<8x2048xf32>
    %c2044_i32_64 = arith.constant 2044 : i32
    %160 = tpu.dynamic_rotate %143 by %c2044_i32_64 dim 1 : vector<8x2048xf32>, i32 -> vector<8x2048xf32>
    %161 = arith.cmpf ogt, %160, %157 : vector<8x2048xf32>
    %162 = arith.select %161, %160, %157 : vector<8x2048xi1>, vector<8x2048xf32>
    %cst_65 = arith.constant 4.000000e+00 : f32
    %163 = vector.broadcast %cst_65 : f32 to vector<8x2048xf32>
    %164 = arith.select %161, %163, %159 : vector<8x2048xi1>, vector<8x2048xf32>
    %165 = vector.extract_strided_slice %162 {offsets = [0, 0], sizes = [8, 512], strides = [1, 1]} : vector<8x2048xf32> to vector<8x512xf32>
    %166 = vector.extract_strided_slice %162 {offsets = [0, 512], sizes = [8, 512], strides = [1, 1]} : vector<8x2048xf32> to vector<8x512xf32>
    %167 = vector.extract_strided_slice %162 {offsets = [0, 1024], sizes = [8, 512], strides = [1, 1]} : vector<8x2048xf32> to vector<8x512xf32>
    %168 = vector.extract_strided_slice %162 {offsets = [0, 1536], sizes = [8, 512], strides = [1, 1]} : vector<8x2048xf32> to vector<8x512xf32>
    %169 = tpu.concatenate %165, %166, %167, %168 in 0 : vector<8x512xf32>, vector<8x512xf32>, vector<8x512xf32>, vector<8x512xf32> -> vector<32x512xf32>
    %170 = vector.extract_strided_slice %164 {offsets = [0, 0], sizes = [8, 512], strides = [1, 1]} : vector<8x2048xf32> to vector<8x512xf32>
    %171 = vector.extract_strided_slice %164 {offsets = [0, 512], sizes = [8, 512], strides = [1, 1]} : vector<8x2048xf32> to vector<8x512xf32>
    %172 = vector.extract_strided_slice %164 {offsets = [0, 1024], sizes = [8, 512], strides = [1, 1]} : vector<8x2048xf32> to vector<8x512xf32>
    %173 = vector.extract_strided_slice %164 {offsets = [0, 1536], sizes = [8, 512], strides = [1, 1]} : vector<8x2048xf32> to vector<8x512xf32>
    %174 = tpu.concatenate %170, %171, %172, %173 in 0 : vector<8x512xf32>, vector<8x512xf32>, vector<8x512xf32>, vector<8x512xf32> -> vector<32x512xf32>
    %c0_66 = arith.constant 0 : index
    %c0_67 = arith.constant 0 : index
    %175 = vector.load %arg7[%c0_66, %c0_67] : memref<512x128xf32, #tpu.memory_space<vmem>>, vector<512x128xf32>
    %cst_68 = arith.constant dense<0.000000e+00> : vector<32x128xf32>
    %176 = tpu.matmul %174, %175, %cst_68 {dimension_numbers = #tpu.dot_dimension_numbers<[1], [0], [0], [1], [0, 0, 1, 1], [], []>} : vector<32x512xf32>, vector<512x128xf32>, vector<32x128xf32> -> vector<32x128xf32>
    %177 = tpu.iota {dimensions = array<i32: 1>} : vector<32x128xi32>
    %c5_i32 = arith.constant 5 : i32
    %178 = vector.broadcast %c5_i32 : i32 to vector<32x128xi32>
    %179 = arith.muli %178, %177 : vector<32x128xi32>
    %180 = arith.fptosi %176 : vector<32x128xf32> to vector<32x128xi32>
    %181 = arith.addi %179, %180 : vector<32x128xi32>
    %c0_69 = arith.constant 0 : index
    %c0_70 = arith.constant 0 : index
    %182 = vector.load %arg14[%c0_69, %c0_70] : memref<32x128xi32, #tpu.memory_space<vmem>>, vector<32x128xi32>
    tpu.vector_store %arg14[%c0_69, %c0_70], %181 {strides = array<i32>} : memref<32x128xi32, #tpu.memory_space<vmem>>, vector<32x128xi32>,
    %c0_71 = arith.constant 0 : index
    %c0_72 = arith.constant 0 : index
    %183 = vector.load %arg8[%c0_71, %c0_72] : memref<512x128xf32, #tpu.memory_space<vmem>>, vector<512x128xf32>
    %cst_73 = arith.constant dense<0.000000e+00> : vector<32x128xf32>
    %184 = tpu.matmul %169, %183, %cst_73 {dimension_numbers = #tpu.dot_dimension_numbers<[1], [0], [0], [1], [0, 0, 1, 1], [], []>} : vector<32x512xf32>, vector<512x128xf32>, vector<32x128xf32> -> vector<32x128xf32>
    %c0_74 = arith.constant 0 : index
    %c0_75 = arith.constant 0 : index
    %185 = vector.load %arg9[%c0_74, %c0_75] : memref<32x128xf32, #tpu.memory_space<vmem>>, vector<32x128xf32>
    %186 = arith.mulf %184, %185 : vector<32x128xf32>
    %c0_76 = arith.constant 0 : index
    %c0_77 = arith.constant 0 : index
    %187 = vector.load %arg10[%c0_76, %c0_77] : memref<4x32xf32, #tpu.memory_space<vmem>>, vector<4x32xf32>
    %cst_78 = arith.constant dense<0.000000e+00> : vector<4x128xf32>
    %188 = tpu.matmul %187, %186, %cst_78 {dimension_numbers = #tpu.dot_dimension_numbers<[1], [0], [0], [1], [0, 0, 1, 1], [], []>} : vector<4x32xf32>, vector<32x128xf32>, vector<4x128xf32> -> vector<4x128xf32>
    %c0_79 = arith.constant 0 : index
    %c0_80 = arith.constant 0 : index
    %189 = vector.load %arg11[%c0_79, %c0_80] : memref<128x128xf32, #tpu.memory_space<vmem>>, vector<128x128xf32>
    %cst_81 = arith.constant dense<0.000000e+00> : vector<4x128xf32>
    %190 = tpu.matmul %188, %189, %cst_81 {dimension_numbers = #tpu.dot_dimension_numbers<[1], [0], [0], [1], [0, 0, 1, 1], [], []>} : vector<4x128xf32>, vector<128x128xf32>, vector<4x128xf32> -> vector<4x128xf32>
    %c0_82 = arith.constant 0 : index
    %c0_83 = arith.constant 0 : index
    %191 = vector.load %arg12[%c0_82, %c0_83] : memref<1x128xf32, #tpu.memory_space<vmem>>, vector<1x128xf32>
    %192 = vector.broadcast %191 : vector<1x128xf32> to vector<4x128xf32>
    %193 = arith.addf %190, %192 : vector<4x128xf32>
    %cst_84 = arith.constant dense<0.000000e+00> : vector<128xf32>
    %194 = vector.multi_reduction <add>, %193, %cst_84 [0] : vector<4x128xf32> to vector<128xf32>
    %195 = vector.shape_cast %194 : vector<128xf32> to vector<1x128xf32>
    %cst_85 = arith.constant 4.000000e+00 : f32
    %196 = vector.broadcast %cst_85 : f32 to vector<1x128xf32>
    %197 = arith.divf %195, %196 : vector<1x128xf32>
    %198 = vector.broadcast %197 : vector<1x128xf32> to vector<4x128xf32>
    %199 = arith.subf %193, %198 : vector<4x128xf32>
    %200 = arith.mulf %199, %199 : vector<4x128xf32>
    %cst_86 = arith.constant dense<0.000000e+00> : vector<128xf32>
    %201 = vector.multi_reduction <add>, %200, %cst_86 [0] : vector<4x128xf32> to vector<128xf32>
    %202 = vector.shape_cast %201 : vector<128xf32> to vector<1x128xf32>
    %cst_87 = arith.constant 4.000000e+00 : f32
    %203 = vector.broadcast %cst_87 : f32 to vector<1x128xf32>
    %204 = arith.divf %202, %203 : vector<1x128xf32>
    %205 = vector.broadcast %197 : vector<1x128xf32> to vector<4x128xf32>
    %206 = arith.subf %193, %205 : vector<4x128xf32>
    %cst_88 = arith.constant 9.99999974E-6 : f32
    %207 = vector.broadcast %cst_88 : f32 to vector<1x128xf32>
    %208 = arith.addf %204, %207 : vector<1x128xf32>
    %209 = math.rsqrt %208 : vector<1x128xf32>
    %210 = vector.broadcast %209 : vector<1x128xf32> to vector<4x128xf32>
    %211 = arith.mulf %206, %210 : vector<4x128xf32>
    %c0_89 = arith.constant 0 : index
    %c0_90 = arith.constant 0 : index
    %212 = vector.load %arg13[%c0_89, %c0_90] : memref<4x128xf32, #tpu.memory_space<vmem>>, vector<4x128xf32>
    tpu.vector_store %arg13[%c0_89, %c0_90], %211 {strides = array<i32>} : memref<4x128xf32, #tpu.memory_space<vmem>>, vector<4x128xf32>,
    return
  }
}

</mosaic_0001>

<bundles_post_ra>
// kernel: encoder_forward.1
= control target key start
LH: loop header
LB: loop body
LE: loop exit
PB: predicated region body
PF: predicated region fallthrough
CT: control target
= control target key end

     0   :  { %20 = vsyncpa [#allocation3], 0  ;;  %vm120_vm0 = vcmask 130048   ;;  %v10046_v10 = vmov 0.0   ;;  %s10031_s0 = inlined_call_operand.vmem [shape: f32[16,2048], index: 0, kind: input, shape index: {}]   ;;  %s10032_s1 = inlined_call_operand.vmem [shape: f32[8,16], index: 1, kind: input, shape index: {}]   ;;  %s10033_s2 = inlined_call_operand.vmem [shape: f32[8,1], index: 2, kind: input, shape index: {}]   ;;  %s10034_s3 = inlined_call_operand.vmem [shape: f32[8,128], index: 3, kind: input, shape index: {}]   ;;  %s10035_s4 = inlined_call_operand.vmem [shape: f32[8,1], index: 4, kind: input, shape index: {}]   ;;  %s10036_s5 = inlined_call_operand.vmem [shape: f32[8,128], index: 5, kind: input, shape index: {}]   ;;  %s10037_s6 = inlined_call_operand.vmem [shape: f32[8,1], index: 6, kind: input, shape index: {}]   ;;  %s10038_s7 = inlined_call_operand.vmem [shape: f32[512,128], index: 7, kind: input, shape index: {}]   ;;  %s10039_s8 = inlined_call_operand.vmem [shape: f32[512,128], index: 8, kind: input, shape index: {}]   ;;  %s10040_s9 = inlined_call_operand.vmem [shape: f32[32,128], index: 9, kind: input, shape index: {}]   ;;  %s10041_s10 = inlined_call_operand.vmem [shape: f32[4,32], index: 10, kind: input, shape index: {}]   ;;  %s10042_s11 = inlined_call_operand.vmem [shape: f32[128,128], index: 11, kind: input, shape index: {}]   ;;  %s10043_s12 = inlined_call_operand.vmem [shape: f32[1,128], index: 12, kind: input, shape index: {}]   ;;  %s10044_s13 = inlined_call_operand.hbm [shape: f32[4,128], index: 13, kind: output, shape index: {0}]   ;;  %s10045_s14 = inlined_call_operand.hbm [shape: s32[32,128], index: 14, kind: output, shape index: {1}]  }
   0x1   :  { %v99_v0 = vld [vmem:[%s10031_s0 + $0x88] sm:$0xff]  ;;  %v109_v1 = vld [vmem:[%s10031_s0 + $0xd8] sm:$0xff]  ;;  %v98_v2 = vld [vmem:[%s10031_s0 + $0x80] sm:$0xff]  ;;  %188 = vmatprep.mubr.f32.mxu0 %v10046_v10  ;;  %543 = vmatprep.mubr.f32.mxu1 %v10046_v10 }
   0x2   :  { %152 = vmatprep.subr.mxu0 %v99_v0  ;;  %507 = vmatprep.subr.mxu1 %v109_v1  ;;  %v108_v3 = vld [vmem:[%s10031_s0 + $0xd0] sm:$0xff]  ;;  %v83_v4 = vld [vmem:[%s10031_s0 + $0x8] sm:$0xff]  ;;  %v93_v5 = vld [vmem:[%s10031_s0 + $0x58] sm:$0xff] }
   0x3   :  { %153 = vmatpush1.msra.mxu0 %v98_v2  ;;  %508 = vmatpush1.msra.mxu1 %v108_v3  ;;  %v82_v6 = vld [vmem:[%s10031_s0] sm:$0xff]  ;;  %v92_v7 = vld [vmem:[%s10031_s0 + $0x50] sm:$0xff]  ;;  %v101_v9 = vld [vmem:[%s10031_s0 + $0x98] sm:$0xff] }
   0x4   :  { %154 = vmatprep.subr.mxu0 %v83_v4  ;;  %509 = vmatprep.subr.mxu1 %v93_v5  ;;  %v5501_v8 = vld [vmem:[%s10032_s1] sm:$0xff]  ;;  %v113_v11 = vld [vmem:[%s10031_s0 + $0xf8] sm:$0xff]  ;;  %v100_v12 = vld [vmem:[%s10031_s0 + $0x90] sm:$0xff] }
   0x5   :  { %155 = vmatpush1.msra.mxu0 %v82_v6  ;;  %510 = vmatpush1.msra.mxu1 %v92_v7  ;;  %v112_v13 = vld [vmem:[%s10031_s0 + $0xf0] sm:$0xff]  ;;  %v85_v14 = vld [vmem:[%s10031_s0 + $0x18] sm:$0xff]  ;;  %v103_v18 = vld [vmem:[%s10031_s0 + $0xa8] sm:$0xff] }
   0x6   :  { %5037 = vmatmul.mubr.msk.f32.vlgmr.msra.gmra.mxu0 %vm120_vm0, %v5501_v8  ;;  %223 = vmatprep.subr.mxu0 %v101_v9  ;;  %v97_v15 = vld [vmem:[%s10031_s0 + $0x78] sm:$0xff]  ;;  %v84_v16 = vld [vmem:[%s10031_s0 + $0x10] sm:$0xff]  ;;  %v102_v19 = vld [vmem:[%s10031_s0 + $0xa0] sm:$0xff] }
   0x7   :  { %5042 = vmatmul.mubr.msk.f32.vlgmr.msra.gmra.mxu1 %vm120_vm0, %v5501_v8  ;;  %649 = vmatprep.subr.mxu1 %v113_v11  ;;  %v96_v17 = vld [vmem:[%s10031_s0 + $0x70] sm:$0xff]  ;;  %v87_v20 = vld [vmem:[%s10031_s0 + $0x28] sm:$0xff] }
   0x8   :  { %224 = vmatpush1.msra.mxu0 %v100_v12  ;;  %650 = vmatpush1.msra.mxu1 %v112_v13 }
   0x9   :  { %225 = vmatprep.subr.mxu0 %v85_v14  ;;  %651 = vmatprep.subr.mxu1 %v97_v15 }
   0xa   :  { %226 = vmatpush1.msra.mxu0 %v84_v16  ;;  %259 = vmatprep.mubr.f32.mxu0 %v10046_v10 }
   0xb   :  { %652 = vmatpush1.msra.mxu1 %v96_v17  ;;  %685 = vmatprep.mubr.f32.mxu1 %v10046_v10 }
   0xc   :  { %21 = vsyncpa [#allocation5], 0  ;;  %5038 = vmatmul.mubr.msk.f32.vlgmr.msra.gmra.mxu0 %vm120_vm0, %v5501_v8  ;;  %294 = vmatprep.subr.mxu0 %v103_v18  ;;  %v86_v21 = vld [vmem:[%s10031_s0 + $0x20] sm:$0xff]  ;;  %v105_v22 = vld [vmem:[%s10031_s0 + $0xb8] sm:$0xff]  ;;  %v5378_v25 = vmov 0   ;;  %v48_v36 = vlaneseq  ;;  %s5380_s29 = smov 114  }
   0xd   :  { %5044 = vmatmul.mubr.msk.f32.vlgmr.msra.gmra.mxu1 %vm120_vm0, %v5501_v8  ;;  %295 = vmatpush1.msra.mxu0 %v102_v19  ;;  %v104_v23 = vld [vmem:[%s10031_s0 + $0xb0] sm:$0xff]  ;;  %v89_v24 = vld [vmem:[%s10031_s0 + $0x38] sm:$0xff]  ;;  %v114_v26 = vld [vmem:[%s10033_s2] sm:$0xff]  ;;  %s5381_s30 = smov 116   ;;  %s5382_s15 = smov 115  }
   0xe   :  { %296 = vmatprep.subr.mxu0 %v87_v20  ;;  %330 = vmatprep.mubr.f32.mxu0 %v10046_v10  ;;  %v88_v27 = vld [vmem:[%s10031_s0 + $0x30] sm:$0xff]  ;;  %v107_v28 = vld [vmem:[%s10031_s0 + $0xc8] sm:$0xff]  ;;  %v106_v29 = vld [vmem:[%s10031_s0 + $0xc0] sm:$0xff]  ;;  %v5604_v37 = vand.u32 127, %v48_v36  ;;  %s5383_s16 = smov 117   ;;  %s5384_s17 = smov 118  }
   0xf   :  { %297 = vmatpush1.msra.mxu0 %v86_v21  ;;  %5321 = vset.pattern.permute.xlu0 %v5378_v25  ;;  %v91_v30 = vld [vmem:[%s10031_s0 + $0x48] sm:$0xff]  ;;  %v90_v31 = vld [vmem:[%s10031_s0 + $0x40] sm:$0xff]  ;;  %s5385_s18 = smov 119   ;;  %s5386_s2 = smov 120  }
  0x10   :  { %5039 = vmatmul.mubr.msk.f32.vlgmr.msra.gmra.mxu0 %vm120_vm0, %v5501_v8  ;;  %365 = vmatprep.subr.mxu0 %v105_v22  ;;  %v111_v32 = vld [vmem:[%s10031_s0 + $0xe8] sm:$0xff]  ;;  %v110_v33 = vld [vmem:[%s10031_s0 + $0xe0] sm:$0xff]  ;;  %v52_v40 = vadd.s32 384, %v5604_v37  ;;  %v56_v49 = vadd.s32 896, %v5604_v37  ;;  %v60_v63 = vadd.s32 1408, %v5604_v37  ;;  %v64_v19 = vadd.s32 1920, %v5604_v37 }
  0x11   :  { %366 = vmatpush1.msra.mxu0 %v104_v23  ;;  %401 = vmatprep.mubr.f32.mxu0 %v10046_v10  ;;  %v95_v34 = vld [vmem:[%s10031_s0 + $0x68] sm:$0xff]  ;;  %v94_v35 = vld [vmem:[%s10031_s0 + $0x60] sm:$0xff]  ;;  %s5379_s0 = smov 113   ;;  %s5387_s19 = smov 121   ;;  %vm1625_vm10 = vcmp.lt.s32.totalorder %v5604_v37, 113  ;;  %vm1576_vm12 = vcmp.lt.s32.totalorder %v5604_v37, 114 }
  0x12   :  { %367 = vmatprep.subr.mxu0 %v89_v24  ;;  %117 = vperm.xlu0 %5321, %v114_v26   ;;  %v5611_v44 = vand.u32 511, %v52_v40  ;;  %v5619_v57 = vand.u32 511, %v56_v49  ;;  %v5625_v7 = vand.u32 511, %v60_v63  ;;  %v5631_v26 = vand.u32 511, %v64_v19  ;;  %s5388_s20 = smov 122   ;;  %s5389_s1 = smov 123  }
  0x13   :  { %368 = vmatpush1.msra.mxu0 %v88_v27  ;;  %1784 = vmatprep.mubr.f32.mxu1 %v10046_v10  ;;  %s5390_s21 = smov 124   ;;  %s5391_s22 = smov 125   ;;  %vm1527_vm14 = vcmp.lt.s32.totalorder %v5604_v37, 115  ;;  %vm1478_vm15 = vcmp.lt.s32.totalorder %v5604_v37, 116 }
  0x14   :  { %5040 = vmatmul.mubr.msk.f32.vlgmr.msra.gmra.mxu0 %vm120_vm0, %v5501_v8  ;;  %436 = vmatprep.subr.mxu0 %v107_v28  ;;  %10062 = vst [vmem:[#allocation8_spill] sm:$0xff] %v5611_v44  ;;  %vm695_vm1 = vcmp.lt.s32.totalorder %v5611_v44, 485  ;;  %10063 = vst [vmem:[#allocation9_spill] sm:$0xff] %v5619_v57  ;;  %vm699_vm2 = vcmp.lt.s32.totalorder %v5619_v57, 485  ;;  %vm703_vm3 = vcmp.lt.s32.totalorder %v5625_v7, 485  ;;  %vm707_vm4 = vcmp.lt.s32.totalorder %v5631_v26, 485 }
  0x15   :  { %437 = vmatpush1.msra.mxu0 %v106_v29  ;;  %472 = vmatprep.mubr.f32.mxu0 %v10046_v10  ;;  %10064 = vst [vmem:[#allocation10_spill] sm:$0xff] %v5625_v7  ;;  %10065 = vst [vmem:[#allocation11_spill] sm:$0xff] %v5631_v26  ;;  %s5392_s23 = smov 126   ;;  %s5393_s24 = smov 127  }
  0x16   :  { %438 = vmatprep.subr.mxu0 %v91_v30  ;;  %5322 = vset.pattern.permute.xlu1 %v5378_v25 }
  0x17   :  { %439 = vmatpush1.msra.mxu0 %v90_v31 }
  0x18   :  { %5041 = vmatmul.mubr.msk.f32.vlgmr.msra.gmra.mxu0 %vm120_vm0, %v5501_v8  ;;  %578 = vmatprep.subr.mxu0 %v111_v32 }
  0x19   :  { %579 = vmatpush1.msra.mxu0 %v110_v33  ;;  %614 = vmatprep.mubr.f32.mxu0 %v10046_v10 }
  0x1a   :  { %580 = vmatprep.subr.mxu0 %v95_v34 }
  0x1b   :  { %581 = vmatpush1.msra.mxu0 %v94_v35 }
  0x1c   :  { %5043 = vmatmul.mubr.msk.f32.vlgmr.msra.gmra.mxu0 %vm120_vm0, %v5501_v8  ;;  %vm1429_vm0 = vcmp.lt.s32.totalorder %v5604_v37, 117 }
  0x1d   :  { %1713 = vmatprep.mubr.f32.mxu0 %v10046_v10 }
  0x8d   :  { %v118_v38 = vpop.permute.xlu0 %117 }
  0xc6   :  { %v190_v39 = vpop.f32.mrf.mxu0 }
  0xc7   :  { %v5607_v42 = vadd.f32 %v190_v39, %v118_v38  ;;  %v545_v62 = vpop.f32.mrf.mxu1 }
  0xc8   :  { %v192_v41 = vpop.f32.mrf.mxu0  ;;  %v546_v16 = vadd.f32 %v545_v62, %v118_v38 }
  0xc9   :  { %v5609_v43 = vadd.f32 %v192_v41, %v118_v38  ;;  %v547_v8 = vpop.f32.mrf.mxu1 }
  0xca   :  { %v548_v14 = vadd.f32 %v547_v8, %v118_v38 }
  0xcb   :  { %v756_v45 = vadd.f32 %v5609_v43, %v5607_v42 }
  0xcc   :  { %v261_v46 = vpop.f32.mrf.mxu0  ;;  %v751_v21 = vsel %vm703_vm3, %v548_v14, 0.0 }
  0xcd   :  { %v262_v47 = vadd.f32 %v261_v46, %v118_v38  ;;  %v687_v17 = vpop.f32.mrf.mxu1 }
  0xce   :  { %v263_v48 = vpop.f32.mrf.mxu0  ;;  %v688_v30 = vadd.f32 %v687_v17, %v118_v38 }
  0xcf   :  { %v757_v50 = vadd.f32 %v756_v45, %v262_v47  ;;  %v264_v51 = vadd.f32 %v263_v48, %v118_v38  ;;  %v689_v23 = vpop.f32.mrf.mxu1 }
  0xd0   :  { %v332_v52 = vpop.f32.mrf.mxu0  ;;  %v690_v29 = vadd.f32 %v689_v23, %v118_v38 }
  0xd1   :  { %v743_v53 = vsel %vm695_vm1, %v264_v51, 0.0  ;;  %v333_v54 = vadd.f32 %v332_v52, %v118_v38 }
  0xd2   :  { %v758_v55 = vadd.f32 %v757_v50, %v743_v53  ;;  %v334_v56 = vpop.f32.mrf.mxu0  ;;  %v755_v33 = vsel %vm707_vm4, %v690_v29, 0.0 }
  0xd3   :  { %v335_v58 = vadd.f32 %v334_v56, %v118_v38 }
  0xd4   :  { %v759_v59 = vadd.f32 %v758_v55, %v333_v54  ;;  %v403_v60 = vpop.f32.mrf.mxu0 }
  0xd5   :  { %v404_v61 = vadd.f32 %v403_v60, %v118_v38 }
  0xd6   :  { %v760_v0 = vadd.f32 %v759_v59, %v335_v58  ;;  %v405_v1 = vpop.f32.mrf.mxu0 }
  0xd7   :  { %v406_v2 = vadd.f32 %v405_v1, %v118_v38 }
  0xd8   :  { %v761_v3 = vadd.f32 %v760_v0, %v404_v61  ;;  %v474_v4 = vpop.f32.mrf.mxu0 }
  0xd9   :  { %v747_v5 = vsel %vm699_vm2, %v406_v2, 0.0  ;;  %v475_v6 = vadd.f32 %v474_v4, %v118_v38 }
  0xda   :  { %v762_v9 = vadd.f32 %v761_v3, %v747_v5  ;;  %v476_v11 = vpop.f32.mrf.mxu0 }
  0xdb   :  { %v477_v12 = vadd.f32 %v476_v11, %v118_v38 }
  0xdc   :  { %v763_v13 = vadd.f32 %v762_v9, %v475_v6  ;;  %v616_v15 = vpop.f32.mrf.mxu0 }
  0xdd   :  { %v617_v24 = vadd.f32 %v616_v15, %v118_v38 }
  0xde   :  { %v764_v18 = vadd.f32 %v763_v13, %v477_v12  ;;  %v618_v22 = vpop.f32.mrf.mxu0 }
  0xdf   :  { %v619_v28 = vadd.f32 %v618_v22, %v118_v38 }
  0xe0   :  { %v765_v20 = vadd.f32 %v764_v18, %v546_v16 }
  0xe2   :  { %v766_v25 = vadd.f32 %v765_v20, %v751_v21 }
  0xe4   :  { %v767_v27 = vadd.f32 %v766_v25, %v617_v24 }
  0xe6   :  { %v768_v31 = vadd.f32 %v767_v27, %v619_v28 }
  0xe8   :  { %v769_v32 = vadd.f32 %v768_v31, %v688_v30 }
  0xea   :  { %v770_v34 = vadd.f32 %v769_v32, %v755_v33 }
  0xec   :  { %771 = vadd.xlane.f32.xlu0 %v770_v34 }
 0x175   :  { %v772_v35 = vpop.xlane.xlu0 %771 }
 0x176   :  { %v774_v36 = vmul.f32 0.00051546394, %v772_v35 }
 0x178   :  { %v775_v39 = vsub.f32 %v5607_v42, %v774_v36  ;;  %v776_v40 = vsub.f32 %v5609_v43, %v774_v36  ;;  %v778_v41 = vsub.f32 %v264_v51, %v774_v36  ;;  %v777_v45 = vsub.f32 %v262_v47, %v774_v36 }
 0x179   :  { %v5640_v49 = vsub.f32 %v333_v54, %v774_v36  ;;  %v5642_v53 = vsub.f32 %v335_v58, %v774_v36  ;;  %v782_v59 = vsub.f32 %v406_v2, %v774_v36  ;;  %v5644_v60 = vsub.f32 %v404_v61, %v774_v36 }
 0x17a   :  { %v807_v46 = vmul.f32 %v775_v39, %v775_v39  ;;  %v808_v48 = vmul.f32 %v776_v40, %v776_v40  ;;  %v794_v38 = vsel %vm695_vm1, %v778_v41, 0.0  ;;  %v809_v50 = vmul.f32 %v777_v45, %v777_v45 }
 0x17b   :  { %v810_v55 = vmul.f32 %v794_v38, %v794_v38  ;;  %v811_v42 = vmul.f32 %v5640_v49, %v5640_v49  ;;  %v812_v47 = vmul.f32 %v5642_v53, %v5642_v53  ;;  %v5652_v54 = vsel %vm699_vm2, %v782_v59, 0.0 }
 0x17c   :  { %v823_v52 = vadd.f32 %v808_v48, %v807_v46  ;;  %v5654_v62 = vsub.f32 %v475_v6, %v774_v36  ;;  %v813_v58 = vmul.f32 %v5644_v60, %v5644_v60  ;;  %v5658_v61 = vsub.f32 %v477_v12, %v774_v36 }
 0x17d   :  { %v814_v0 = vmul.f32 %v5652_v54, %v5652_v54  ;;  %v786_v2 = vsub.f32 %v548_v14, %v774_v36  ;;  %v5662_v3 = vsub.f32 %v546_v16, %v774_v36  ;;  %v5672_v11 = vsub.f32 %v617_v24, %v774_v36 }
 0x17e   :  { %v824_v56 = vadd.f32 %v823_v52, %v809_v50  ;;  %v815_v4 = vmul.f32 %v5654_v62, %v5654_v62  ;;  %v816_v6 = vmul.f32 %v5658_v61, %v5658_v61  ;;  %v5676_v14 = vsub.f32 %v619_v28, %v774_v36 }
 0x17f   :  { %v5670_v9 = vsel %vm703_vm3, %v786_v2, 0.0  ;;  %v817_v12 = vmul.f32 %v5662_v3, %v5662_v3  ;;  %v790_v17 = vsub.f32 %v690_v29, %v774_v36  ;;  %v5680_v18 = vsub.f32 %v688_v30, %v774_v36 }
 0x180   :  { %v825_v43 = vadd.f32 %v824_v56, %v810_v55  ;;  %v818_v15 = vmul.f32 %v5670_v9, %v5670_v9  ;;  %v819_v19 = vmul.f32 %v5672_v11, %v5672_v11  ;;  %v820_v21 = vmul.f32 %v5676_v14, %v5676_v14 }
 0x181   :  { %v5688_v23 = vsel %vm707_vm4, %v790_v17, 0.0  ;;  %v821_v24 = vmul.f32 %v5680_v18, %v5680_v18  ;;  %vm1380_vm3 = vcmp.lt.s32.totalorder %v5604_v37, 118  ;;  %vm1331_vm4 = vcmp.lt.s32.totalorder %v5604_v37, 119 }
 0x182   :  { %v826_v51 = vadd.f32 %v825_v43, %v811_v42  ;;  %v822_v27 = vmul.f32 %v5688_v23, %v5688_v23 }
 0x184   :  { %v827_v63 = vadd.f32 %v826_v51, %v812_v47 }
 0x186   :  { %v828_v1 = vadd.f32 %v827_v63, %v813_v58 }
 0x188   :  { %v829_v5 = vadd.f32 %v828_v1, %v814_v0 }
 0x18a   :  { %v830_v8 = vadd.f32 %v829_v5, %v815_v4 }
 0x18c   :  { %v831_v13 = vadd.f32 %v830_v8, %v816_v6 }
 0x18e   :  { %v832_v16 = vadd.f32 %v831_v13, %v817_v12 }
 0x190   :  { %v833_v20 = vadd.f32 %v832_v16, %v818_v15 }
 0x192   :  { %v834_v22 = vadd.f32 %v833_v20, %v819_v19 }
 0x194   :  { %v835_v25 = vadd.f32 %v834_v22, %v820_v21 }
 0x196   :  { %v836_v28 = vadd.f32 %v835_v25, %v821_v24 }
 0x198   :  { %v837_v29 = vadd.f32 %v836_v28, %v822_v27 }
 0x19a   :  { %838 = vadd.xlane.f32.xlu1 %v837_v29 }
 0x223   :  { %v839_v30 = vpop.xlane.xlu1 %838 }
 0x224   :  { %v840_v31 = vmul.f32 0.00051546394, %v839_v30 }
 0x226   :  { %v841_v32 = vadd.f32 1e-05, %v840_v31 }
 0x228   :  { %5323 = vrsqrt.f32 %v841_v32 }
 0x235   :  { %v5694_v33 = vpop.eup %5323 }
 0x236   :  { %v844_v34 = vmul.f32 %v5694_v33, %v776_v40  ;;  %v843_v35 = vmul.f32 %v5694_v33, %v775_v39  ;;  %v845_v36 = vmul.f32 %v5694_v33, %v777_v45  ;;  %v846_v41 = vmul.f32 %v5694_v33, %v794_v38 }
 0x237   :  { %v847_v45 = vmul.f32 %v5694_v33, %v5640_v49  ;;  %v848_v1 = vmul.f32 %v5694_v33, %v5642_v53  ;;  %v850_v13 = vmul.f32 %v5694_v33, %v5652_v54 }
 0x238   :  { %vm860_vm5 = vcmp.ge.f32.partialorder %v844_v34, 0.0  ;;  %v876_v46 = vmul.f32 0.2, %v844_v34  ;;  %vm859_vm6 = vcmp.ge.f32.partialorder %v843_v35, 0.0  ;;  %v875_v48 = vmul.f32 0.2, %v843_v35 }
 0x239   :  { %v877_v55 = vmul.f32 0.2, %v845_v36  ;;  %v878_v56 = vmul.f32 0.2, %v846_v41  ;;  %vm861_vm7 = vcmp.ge.f32.partialorder %v845_v36, 0.0  ;;  %vm862_vm8 = vcmp.ge.f32.partialorder %v846_v41, 0.0 }
 0x23a   :  { %v5700_v50 = vsel %vm860_vm5, %v844_v34, %v876_v46  ;;  %v5702_v52 = vsel %vm859_vm6, %v843_v35, %v875_v48  ;;  %v879_v38 = vmul.f32 0.2, %v847_v45  ;;  %vm863_vm9 = vcmp.ge.f32.partialorder %v847_v45, 0.0 }
 0x23b   :  { %1595 = vrot.lane.b32.xlu1 %v5700_v50, %s5379_s0  ;;  %1544 = vrot.lane.b32.xlu0 %v5702_v52, %s5380_s29  ;;  %v5708_v39 = vsel %vm861_vm7, %v845_v36, %v877_v55  ;;  %v5710_v40 = vsel %vm862_vm8, %v846_v41, %v878_v56  ;;  %v880_v5 = vmul.f32 0.2, %v848_v1  ;;  %vm864_vm11 = vcmp.ge.f32.partialorder %v848_v1, 0.0 }
 0x23c   :  { %v5726_v59 = vsel %vm863_vm9, %v847_v45, %v879_v38  ;;  %v882_v19 = vmul.f32 0.2, %v850_v13  ;;  %vm866_vm13 = vcmp.ge.f32.partialorder %v850_v13, 0.0  ;;  %v849_v38 = vmul.f32 %v5694_v33, %v5644_v60 }
 0x23d   :  { %v5865_v8 = vsel %vm864_vm11, %v848_v1, %v880_v5  ;;  %v851_v5 = vmul.f32 %v5694_v33, %v5654_v62  ;;  %vm1282_vm5 = vcmp.lt.s32.totalorder %v5604_v37, 120  ;;  %vm1233_vm6 = vcmp.lt.s32.totalorder %v5604_v37, 121 }
 0x23e   :  { %v5888_v21 = vsel %vm866_vm13, %v850_v13, %v882_v19  ;;  %vm865_vm1 = vcmp.ge.f32.partialorder %v849_v38, 0.0  ;;  %vm1184_vm7 = vcmp.lt.s32.totalorder %v5604_v37, 122  ;;  %vm10056_vm8 = vcmp.lt.s32.totalorder %v5604_v37, 123 }
 0x23f   :  { %1597 = vrot.lane.b32.xlu1 %v5708_v39, %s5379_s0  ;;  %1550 = vrot.lane.b32.xlu0 %v5710_v40, %s5380_s29  ;;  %vm867_vm2 = vcmp.ge.f32.partialorder %v851_v5, 0.0  ;;  %vm1086_vm9 = vcmp.lt.s32.totalorder %v5604_v37, 124  ;;  %vm1037_vm11 = vcmp.lt.s32.totalorder %v5604_v37, 125 }
 0x243   :  { %1448 = vrot.lane.b32.xlu0 %v5700_v50, %s5381_s30  ;;  %1593 = vrot.lane.b32.xlu1 %v5702_v52, %s5379_s0 }
 0x247   :  { %1446 = vrot.lane.b32.xlu0 %v5702_v52, %s5381_s30  ;;  %1546 = vrot.lane.b32.xlu1 %v5700_v50, %s5380_s29 }
 0x24b   :  { %1503 = vrot.lane.b32.xlu0 %v5726_v59, %s5382_s15  ;;  %1548 = vrot.lane.b32.xlu1 %v5708_v39, %s5380_s29 }
 0x24f   :  { %1401 = vrot.lane.b32.xlu0 %v5708_v39, %s5383_s16  ;;  %1599 = vrot.lane.b32.xlu1 %v5710_v40, %s5379_s0 }
 0x253   :  { %1452 = vrot.lane.b32.xlu0 %v5710_v40, %s5381_s30  ;;  %1601 = vrot.lane.b32.xlu1 %v5726_v59, %s5379_s0 }
 0x257   :  { %1350 = vrot.lane.b32.xlu0 %v5700_v50, %s5384_s17  ;;  %1497 = vrot.lane.b32.xlu1 %v5700_v50, %s5382_s15 }
 0x25b   :  { %1348 = vrot.lane.b32.xlu0 %v5702_v52, %s5384_s17  ;;  %1499 = vrot.lane.b32.xlu1 %v5708_v39, %s5382_s15 }
 0x25f   :  { %1405 = vrot.lane.b32.xlu0 %v5726_v59, %s5383_s16  ;;  %1495 = vrot.lane.b32.xlu1 %v5702_v52, %s5382_s15 }
 0x263   :  { %1303 = vrot.lane.b32.xlu0 %v5708_v39, %s5385_s18  ;;  %1552 = vrot.lane.b32.xlu1 %v5726_v59, %s5380_s29 }
 0x267   :  { %1354 = vrot.lane.b32.xlu0 %v5710_v40, %s5384_s17  ;;  %1450 = vrot.lane.b32.xlu1 %v5708_v39, %s5381_s30 }
 0x26b   :  { %1252 = vrot.lane.b32.xlu0 %v5700_v50, %s5386_s2  ;;  %1501 = vrot.lane.b32.xlu1 %v5710_v40, %s5382_s15 }
 0x26f   :  { %1250 = vrot.lane.b32.xlu0 %v5702_v52, %s5386_s2  ;;  %1399 = vrot.lane.b32.xlu1 %v5700_v50, %s5383_s16 }
 0x273   :  { %1307 = vrot.lane.b32.xlu0 %v5726_v59, %s5385_s18  ;;  %1397 = vrot.lane.b32.xlu1 %v5702_v52, %s5383_s16 }
 0x277   :  { %1205 = vrot.lane.b32.xlu0 %v5708_v39, %s5387_s19  ;;  %1454 = vrot.lane.b32.xlu1 %v5726_v59, %s5381_s30 }
 0x27b   :  { %1256 = vrot.lane.b32.xlu0 %v5710_v40, %s5386_s2  ;;  %1352 = vrot.lane.b32.xlu1 %v5708_v39, %s5384_s17 }
 0x27f   :  { %1154 = vrot.lane.b32.xlu0 %v5700_v50, %s5388_s20  ;;  %1403 = vrot.lane.b32.xlu1 %v5710_v40, %s5383_s16 }
 0x283   :  { %1152 = vrot.lane.b32.xlu0 %v5702_v52, %s5388_s20  ;;  %1301 = vrot.lane.b32.xlu1 %v5700_v50, %s5385_s18 }
 0x287   :  { %1209 = vrot.lane.b32.xlu0 %v5726_v59, %s5387_s19  ;;  %1299 = vrot.lane.b32.xlu1 %v5702_v52, %s5385_s18 }
 0x28b   :  { %1107 = vrot.lane.b32.xlu0 %v5708_v39, %s5389_s1  ;;  %1356 = vrot.lane.b32.xlu1 %v5726_v59, %s5384_s17 }
 0x28f   :  { %1158 = vrot.lane.b32.xlu0 %v5710_v40, %s5388_s20  ;;  %1254 = vrot.lane.b32.xlu1 %v5708_v39, %s5386_s2 }
 0x293   :  { %1056 = vrot.lane.b32.xlu0 %v5700_v50, %s5390_s21  ;;  %1305 = vrot.lane.b32.xlu1 %v5710_v40, %s5385_s18 }
 0x297   :  { %1054 = vrot.lane.b32.xlu0 %v5702_v52, %s5390_s21  ;;  %1203 = vrot.lane.b32.xlu1 %v5700_v50, %s5387_s19 }
 0x29b   :  { %1111 = vrot.lane.b32.xlu0 %v5726_v59, %s5389_s1  ;;  %1201 = vrot.lane.b32.xlu1 %v5702_v52, %s5387_s19 }
 0x29f   :  { %1009 = vrot.lane.b32.xlu0 %v5708_v39, %s5391_s22  ;;  %1258 = vrot.lane.b32.xlu1 %v5726_v59, %s5386_s2 }
 0x2a3   :  { %1060 = vrot.lane.b32.xlu0 %v5710_v40, %s5390_s21  ;;  %1156 = vrot.lane.b32.xlu1 %v5708_v39, %s5388_s20 }
 0x2a7   :  { %958 = vrot.lane.b32.xlu0 %v5700_v50, %s5392_s23  ;;  %1207 = vrot.lane.b32.xlu1 %v5710_v40, %s5387_s19 }
 0x2ab   :  { %956 = vrot.lane.b32.xlu0 %v5702_v52, %s5392_s23  ;;  %1105 = vrot.lane.b32.xlu1 %v5700_v50, %s5389_s1 }
 0x2ad   :  { %v1596_v49 = vpop.permute.xlu1 %1595  ;;  %v5828_v42 = vpop.permute.xlu0 %1544 }
 0x2af   :  { %1013 = vrot.lane.b32.xlu0 %v5726_v59, %s5391_s22  ;;  %1103 = vrot.lane.b32.xlu1 %v5702_v52, %s5389_s1 }
 0x2b1   :  { %v1598_v43 = vpop.permute.xlu1 %1597  ;;  %v5835_v47 = vpop.permute.xlu0 %1550 }
 0x2b2   :  { %v1639_v51 = vsel %vm1625_vm10, %v1596_v49, %v1598_v43 }
 0x2b3   :  { %1649 = vmatprep.subr.mxu0 %v1639_v51  ;;  %911 = vrot.lane.b32.xlu0 %v5708_v39, %s5393_s24 }
 0x2b4   :  { %1160 = vrot.lane.b32.xlu1 %v5726_v59, %s5388_s20 }
 0x2b5   :  { %v5843_v58 = vpop.permute.xlu0 %1448  ;;  %v5845_v63 = vpop.permute.xlu1 %1593 }
 0x2b6   :  { %v1640_v0 = vsel %vm1625_vm10, %v5845_v63, %v1596_v49 }
 0x2b7   :  { %962 = vrot.lane.b32.xlu0 %v5710_v40, %s5392_s23  ;;  %1650 = vmatpush1.msra.mxu0 %v1640_v0 }
 0x2b8   :  { %1058 = vrot.lane.b32.xlu1 %v5708_v39, %s5390_s21 }
 0x2b9   :  { %v5856_v2 = vpop.permute.xlu0 %1446  ;;  %v1547_v4 = vpop.permute.xlu1 %1546 }
 0x2ba   :  { %v1591_v15 = vsel %vm1576_vm12, %v5828_v42, %v1547_v4  ;;  %v1493_v45 = vsel %vm1478_vm15, %v5856_v2, %v5843_v58 }
 0x2bb   :  { %913 = vrot.lane.b32.xlu0 %v5710_v40, %s5393_s24 }
 0x2bc   :  { %1109 = vrot.lane.b32.xlu1 %v5710_v40, %s5389_s1 }
 0x2bd   :  { %v5863_v53 = vpop.permute.xlu0 %1503  ;;  %v1549_v6 = vpop.permute.xlu1 %1548 }
 0x2be   :  { %v1590_v12 = vsel %vm1576_vm12, %v1547_v4, %v1549_v6  ;;  %v1589_v46 = vsel %vm1576_vm12, %v1549_v6, %v5835_v47 }
 0x2bf   :  { %1603 = vrot.lane.b32.xlu0 %v5865_v8, %s5379_s0  ;;  %1651 = vmatprep.subr.mxu0 %v1590_v12 }
 0x2c0   :  { %1007 = vrot.lane.b32.xlu1 %v5700_v50, %s5391_s22  ;;  %1652 = vmatpush1.msra.mxu0 %v1591_v15  ;;  %v883_v15 = vmul.f32 0.2, %v851_v5 }
 0x2c1   :  { %v5878_v16 = vpop.permute.xlu0 %1401  ;;  %v1600_v17 = vpop.permute.xlu1 %1599 }
 0x2c2   :  { %v1638_v24 = vsel %vm1625_vm10, %v1598_v43, %v1600_v17 }
 0x2c3   :  { %1554 = vrot.lane.b32.xlu0 %v5865_v8, %s5380_s29 }
 0x2c4   :  { %1005 = vrot.lane.b32.xlu1 %v5702_v52, %s5391_s22 }
 0x2c5   :  { %v5884_v54 = vpop.permute.xlu0 %1452  ;;  %v5886_v20 = vpop.permute.xlu1 %1601 }
 0x2c6   :  { %v1637_v22 = vsel %vm1625_vm10, %v1600_v17, %v5886_v20 }
 0x2c7   :  { %1607 = vrot.lane.b32.xlu0 %v5888_v21, %s5379_s0  ;;  %1720 = vmatprep.subr.mxu1 %v1637_v22  ;;  %v6002_v22 = vsel %vm867_vm2, %v851_v5, %v883_v15  ;;  %vm10058_vm2 = vcmp.lt.s32.totalorder %v5604_v37, 126 }
 0x2c8   :  { %1062 = vrot.lane.b32.xlu1 %v5726_v59, %s5390_s21  ;;  %1721 = vmatpush1.msra.mxu1 %v1638_v24 }
 0x2c9   :  { %v5899_v25 = vpop.permute.xlu0 %1350  ;;  %v1498_v27 = vpop.permute.xlu1 %1497 }
 0x2cb   :  { %1505 = vrot.lane.b32.xlu0 %v5865_v8, %s5382_s15 }
 0x2cc   :  { %960 = vrot.lane.b32.xlu1 %v5708_v39, %s5392_s23 }
 0x2cd   :  { %v5906_v28 = vpop.permute.xlu0 %1348  ;;  %v1500_v29 = vpop.permute.xlu1 %1499 }
 0x2ce   :  { %v1541_v30 = vsel %vm1527_vm14, %v1498_v27, %v1500_v29 }
 0x2cf   :  { %1558 = vrot.lane.b32.xlu0 %v5888_v21, %s5380_s29  ;;  %1653 = vmatprep.subr.mxu0 %v1541_v30 }
 0x2d0   :  { %1011 = vrot.lane.b32.xlu1 %v5710_v40, %s5391_s22 }
 0x2d1   :  { %v5914_v31 = vpop.permute.xlu0 %1405  ;;  %v5916_v32 = vpop.permute.xlu1 %1495 }
 0x2d2   :  { %v1542_v34 = vsel %vm1527_vm14, %v5916_v32, %v1498_v27 }
 0x2d3   :  { %1456 = vrot.lane.b32.xlu0 %v5865_v8, %s5381_s30  ;;  %1654 = vmatpush1.msra.mxu0 %v1542_v34 }
 0x2d4   :  { %909 = vrot.lane.b32.xlu1 %v5700_v50, %s5393_s24 }
 0x2d5   :  { %v5925_v35 = vpop.permute.xlu0 %1303  ;;  %v5927_v36 = vpop.permute.xlu1 %1552 }
 0x2d6   :  { %v1588_v41 = vsel %vm1576_vm12, %v5835_v47, %v5927_v36 }
 0x2d7   :  { %1509 = vrot.lane.b32.xlu0 %v5888_v21, %s5382_s15  ;;  %1722 = vmatprep.subr.mxu1 %v1588_v41 }
 0x2d8   :  { %907 = vrot.lane.b32.xlu1 %v5702_v52, %s5393_s24  ;;  %1723 = vmatpush1.msra.mxu1 %v1589_v46 }
 0x2d9   :  { %v5941_v48 = vpop.permute.xlu0 %1354  ;;  %v1451_v55 = vpop.permute.xlu1 %1450 }
 0x2da   :  { %v1492_v56 = vsel %vm1478_vm15, %v5843_v58, %v1451_v55  ;;  %v881_v58 = vmul.f32 0.2, %v849_v38  ;;  %v1491_v24 = vsel %vm1478_vm15, %v1451_v55, %v5884_v54 }
 0x2db   :  { %1407 = vrot.lane.b32.xlu0 %v5865_v8, %s5383_s16  ;;  %1655 = vmatprep.subr.mxu0 %v1492_v56 }
 0x2dc   :  { %964 = vrot.lane.b32.xlu1 %v5726_v59, %s5392_s23  ;;  %1656 = vmatpush1.msra.mxu0 %v1493_v45  ;;  %v5975_v4 = vsel %vm865_vm1, %v849_v38, %v881_v58 }
 0x2dd   :  { %v5956_v49 = vpop.permute.xlu0 %1252  ;;  %v1502_v43 = vpop.permute.xlu1 %1501 }
 0x2de   :  { %v1539_v47 = vsel %vm1527_vm14, %v1502_v43, %v5863_v53  ;;  %v1540_v51 = vsel %vm1527_vm14, %v1500_v29, %v1502_v43 }
 0x2df   :  { %1460 = vrot.lane.b32.xlu0 %v5888_v21, %s5381_s30  ;;  %1724 = vmatprep.subr.mxu1 %v1539_v47 }
 0x2e0   :  { %915 = vrot.lane.b32.xlu1 %v5726_v59, %s5393_s24  ;;  %1725 = vmatpush1.msra.mxu1 %v1540_v51 }
 0x2e1   :  { %v5968_v60 = vpop.permute.xlu0 %1250  ;;  %v1400_v0 = vpop.permute.xlu1 %1399 }
 0x2e2   :  { %v1443_v1 = vsel %vm1429_vm0, %v1400_v0, %v5878_v16 }
 0x2e3   :  { %1358 = vrot.lane.b32.xlu0 %v5865_v8, %s5384_s17  ;;  %1657 = vmatprep.subr.mxu0 %v1443_v1 }
 0x2e4   :  { %1605 = vrot.lane.b32.xlu1 %v5975_v4, %s5379_s0 }
 0x2e5   :  { %v5981_v6 = vpop.permute.xlu0 %1307  ;;  %v5983_v12 = vpop.permute.xlu1 %1397 }
 0x2e6   :  { %v1444_v13 = vsel %vm1429_vm0, %v5983_v12, %v1400_v0 }
 0x2e7   :  { %1411 = vrot.lane.b32.xlu0 %v5888_v21, %s5383_s16  ;;  %1658 = vmatpush1.msra.mxu0 %v1444_v13 }
 0x2e8   :  { %1556 = vrot.lane.b32.xlu1 %v5975_v4, %s5380_s29 }
 0x2e9   :  { %v5992_v62 = vpop.permute.xlu0 %1205  ;;  %v5994_v17 = vpop.permute.xlu1 %1454 }
 0x2ea   :  { %v1490_v19 = vsel %vm1478_vm15, %v5884_v54, %v5994_v17  ;;  %v1395_v54 = vsel %vm1380_vm3, %v5906_v28, %v5899_v25 }
 0x2eb   :  { %1309 = vrot.lane.b32.xlu0 %v5865_v8, %s5385_s18  ;;  %1726 = vmatprep.subr.mxu1 %v1490_v19 }
 0x2ec   :  { %1609 = vrot.lane.b32.xlu1 %v6002_v22, %s5379_s0  ;;  %1727 = vmatpush1.msra.mxu1 %v1491_v24 }
 0x2ed   :  { %v6010_v27 = vpop.permute.xlu0 %1256  ;;  %v1353_v29 = vpop.permute.xlu1 %1352 }
 0x2ee   :  { %v1394_v30 = vsel %vm1380_vm3, %v5899_v25, %v1353_v29  ;;  %v1393_v0 = vsel %vm1380_vm3, %v1353_v29, %v5941_v48 }
 0x2ef   :  { %1362 = vrot.lane.b32.xlu0 %v5888_v21, %s5384_s17  ;;  %1659 = vmatprep.subr.mxu0 %v1394_v30 }
 0x2f0   :  { %1507 = vrot.lane.b32.xlu1 %v5975_v4, %s5382_s15  ;;  %1660 = vmatpush1.msra.mxu0 %v1395_v54 }
 0x2f1   :  { %v6023_v34 = vpop.permute.xlu0 %1154  ;;  %v1404_v41 = vpop.permute.xlu1 %1403 }
 0x2f2   :  { %v1441_v46 = vsel %vm1429_vm0, %v1404_v41, %v5914_v31  ;;  %v1442_v55 = vsel %vm1429_vm0, %v5878_v16, %v1404_v41 }
 0x2f3   :  { %1260 = vrot.lane.b32.xlu0 %v5865_v8, %s5386_s2  ;;  %1728 = vmatprep.subr.mxu1 %v1441_v46 }
 0x2f4   :  { %1560 = vrot.lane.b32.xlu1 %v6002_v22, %s5380_s29  ;;  %1729 = vmatpush1.msra.mxu1 %v1442_v55 }
 0x2f5   :  { %v6036_v25 = vpop.permute.xlu0 %1152  ;;  %v1302_v56 = vpop.permute.xlu1 %1301 }
 0x2f6   :  { %v1345_v45 = vsel %vm1331_vm4, %v1302_v56, %v5925_v35 }
 0x2f7   :  { %1313 = vrot.lane.b32.xlu0 %v5888_v21, %s5385_s18  ;;  %1661 = vmatprep.subr.mxu0 %v1345_v45 }
 0x2f8   :  { %1458 = vrot.lane.b32.xlu1 %v5975_v4, %s5381_s30 }
 0x2f9   :  { %v6045_v16 = vpop.permute.xlu0 %1209  ;;  %v6047_v38 = vpop.permute.xlu1 %1299 }
 0x2fa   :  { %v1346_v43 = vsel %vm1331_vm4, %v6047_v38, %v1302_v56 }
 0x2fb   :  { %1211 = vrot.lane.b32.xlu0 %v5865_v8, %s5387_s19  ;;  %1662 = vmatpush1.msra.mxu0 %v1346_v43 }
 0x2fc   :  { %1511 = vrot.lane.b32.xlu1 %v6002_v22, %s5382_s15 }
 0x2fd   :  { %v6056_v47 = vpop.permute.xlu0 %1107  ;;  %v6058_v51 = vpop.permute.xlu1 %1356 }
 0x2fe   :  { %v1392_v58 = vsel %vm1380_vm3, %v5941_v48, %v6058_v51  ;;  %v1297_v48 = vsel %vm1282_vm5, %v5968_v60, %v5956_v49 }
 0x2ff   :  { %1264 = vrot.lane.b32.xlu0 %v5888_v21, %s5386_s2  ;;  %1730 = vmatprep.subr.mxu1 %v1392_v58 }
 0x300   :  { %1409 = vrot.lane.b32.xlu1 %v5975_v4, %s5383_s16  ;;  %1731 = vmatpush1.msra.mxu1 %v1393_v0 }
 0x301   :  { %v6072_v1 = vpop.permute.xlu0 %1158  ;;  %v1255_v5 = vpop.permute.xlu1 %1254 }
 0x302   :  { %v1296_v13 = vsel %vm1282_vm5, %v5956_v49, %v1255_v5  ;;  %v1295_v43 = vsel %vm1282_vm5, %v1255_v5, %v6010_v27 }
 0x303   :  { %1162 = vrot.lane.b32.xlu0 %v5865_v8, %s5388_s20  ;;  %1663 = vmatprep.subr.mxu0 %v1296_v13 }
 0x304   :  { %1462 = vrot.lane.b32.xlu1 %v6002_v22, %s5381_s30  ;;  %1664 = vmatpush1.msra.mxu0 %v1297_v48 }
 0x305   :  { %v6085_v15 = vpop.permute.xlu0 %1056  ;;  %v1306_v19 = vpop.permute.xlu1 %1305 }
 0x306   :  { %v1343_v24 = vsel %vm1331_vm4, %v1306_v19, %v5981_v6  ;;  %v1344_v29 = vsel %vm1331_vm4, %v5925_v35, %v1306_v19 }
 0x307   :  { %1215 = vrot.lane.b32.xlu0 %v5888_v21, %s5387_s19  ;;  %1732 = vmatprep.subr.mxu1 %v1343_v24 }
 0x308   :  { %1360 = vrot.lane.b32.xlu1 %v5975_v4, %s5384_s17  ;;  %1733 = vmatpush1.msra.mxu1 %v1344_v29 }
 0x309   :  { %v6098_v49 = vpop.permute.xlu0 %1054  ;;  %v1204_v30 = vpop.permute.xlu1 %1203 }
 0x30a   :  { %v1247_v54 = vsel %vm1233_vm6, %v1204_v30, %v5992_v62 }
 0x30b   :  { %1113 = vrot.lane.b32.xlu0 %v5865_v8, %s5389_s1  ;;  %1665 = vmatprep.subr.mxu0 %v1247_v54 }
 0x30c   :  { %1413 = vrot.lane.b32.xlu1 %v6002_v22, %s5383_s16 }
 0x30d   :  { %v6107_v35 = vpop.permute.xlu0 %1111  ;;  %v6109_v41 = vpop.permute.xlu1 %1201 }
 0x30e   :  { %v1248_v46 = vsel %vm1233_vm6, %v6109_v41, %v1204_v30 }
 0x30f   :  { %1166 = vrot.lane.b32.xlu0 %v5888_v21, %s5388_s20  ;;  %1666 = vmatpush1.msra.mxu0 %v1248_v46 }
 0x310   :  { %1311 = vrot.lane.b32.xlu1 %v5975_v4, %s5385_s18 }
 0x311   :  { %v6118_v55 = vpop.permute.xlu0 %1009  ;;  %v6120_v56 = vpop.permute.xlu1 %1258 }
 0x312   :  { %v1294_v45 = vsel %vm1282_vm5, %v6010_v27, %v6120_v56  ;;  %v1199_v27 = vsel %vm1184_vm7, %v6036_v25, %v6023_v34 }
 0x313   :  { %1064 = vrot.lane.b32.xlu0 %v5865_v8, %s5390_s21  ;;  %1734 = vmatprep.subr.mxu1 %v1294_v45 }
 0x314   :  { %1364 = vrot.lane.b32.xlu1 %v6002_v22, %s5384_s17  ;;  %1735 = vmatpush1.msra.mxu1 %v1295_v43 }
 0x315   :  { %v6134_v58 = vpop.permute.xlu0 %1060  ;;  %v1157_v0 = vpop.permute.xlu1 %1156 }
 0x316   :  { %v1198_v13 = vsel %vm1184_vm7, %v6023_v34, %v1157_v0 }
 0x317   :  { %1117 = vrot.lane.b32.xlu0 %v5888_v21, %s5389_s1  ;;  %1667 = vmatprep.subr.mxu0 %v1198_v13 }
 0x318   :  { %1262 = vrot.lane.b32.xlu1 %v5975_v4, %s5386_s2  ;;  %1668 = vmatpush1.msra.mxu0 %v1199_v27  ;;  %v1197_v27 = vsel %vm1184_vm7, %v1157_v0, %v6072_v1 }
 0x319   :  { %v6147_v5 = vpop.permute.xlu0 %958  ;;  %v1208_v48 = vpop.permute.xlu1 %1207 }
 0x31a   :  { %v1245_v19 = vsel %vm1233_vm6, %v1208_v48, %v6045_v16  ;;  %v1246_v24 = vsel %vm1233_vm6, %v5992_v62, %v1208_v48 }
 0x31b   :  { %1015 = vrot.lane.b32.xlu0 %v5865_v8, %s5391_s22  ;;  %1736 = vmatprep.subr.mxu1 %v1245_v19 }
 0x31c   :  { %1315 = vrot.lane.b32.xlu1 %v6002_v22, %s5385_s18  ;;  %1737 = vmatpush1.msra.mxu1 %v1246_v24 }
 0x31d   :  { %v6160_v34 = vpop.permute.xlu0 %956  ;;  %v1106_v29 = vpop.permute.xlu1 %1105 }
 0x31e   :  { %v1149_v30 = vsel %vm10056_vm8, %v1106_v29, %v6056_v47 }
 0x31f   :  { %1068 = vrot.lane.b32.xlu0 %v5888_v21, %s5390_s21  ;;  %1669 = vmatprep.subr.mxu0 %v1149_v30  ;;  %v852_v30 = vmul.f32 %v5694_v33, %v5658_v61 }
 0x320   :  { %1213 = vrot.lane.b32.xlu1 %v5975_v4, %s5387_s19 }
 0x321   :  { %v6169_v62 = vpop.permute.xlu0 %1013  ;;  %v6171_v54 = vpop.permute.xlu1 %1103  ;;  %vm868_vm13 = vcmp.ge.f32.partialorder %v852_v30, 0.0 }
 0x322   :  { %v1150_v46 = vsel %vm10056_vm8, %v6171_v54, %v1106_v29 }
 0x323   :  { %966 = vrot.lane.b32.xlu0 %v5865_v8, %s5392_s23  ;;  %1670 = vmatpush1.msra.mxu0 %v1150_v46 }
 0x324   :  { %1266 = vrot.lane.b32.xlu1 %v6002_v22, %s5386_s2 }
 0x325   :  { %v6180_v45 = vpop.permute.xlu0 %911 }
 0x326   :  { %v6182_v43 = vpop.permute.xlu1 %1160 }
 0x327   :  { %1019 = vrot.lane.b32.xlu0 %v5888_v21, %s5391_s22  ;;  %v1196_v13 = vsel %vm1184_vm7, %v6072_v1, %v6182_v43  ;;  %v1101_v1 = vsel %vm1086_vm9, %v6098_v49, %v6085_v15 }
 0x328   :  { %1164 = vrot.lane.b32.xlu1 %v5975_v4, %s5388_s20  ;;  %1738 = vmatprep.subr.mxu1 %v1196_v13 }
 0x329   :  { %1739 = vmatpush1.msra.mxu1 %v1197_v27  ;;  %v6195_v48 = vpop.permute.xlu0 %962  ;;  %v884_v27 = vmul.f32 0.2, %v852_v30 }
 0x32a   :  { %v1059_v19 = vpop.permute.xlu1 %1058 }
 0x32b   :  { %917 = vrot.lane.b32.xlu0 %v5865_v8, %s5393_s24  ;;  %v1100_v24 = vsel %vm1086_vm9, %v6085_v15, %v1059_v19 }
 0x32c   :  { %1217 = vrot.lane.b32.xlu1 %v6002_v22, %s5387_s19  ;;  %1671 = vmatprep.subr.mxu0 %v1100_v24 }
 0x32d   :  { %1672 = vmatpush1.msra.mxu0 %v1101_v1  ;;  %v6209_v0 = vpop.permute.xlu0 %913 }
 0x32e   :  { %v1110_v29 = vpop.permute.xlu1 %1109 }
 0x32f   :  { %970 = vrot.lane.b32.xlu0 %v5888_v21, %s5392_s23  ;;  %v1147_v46 = vsel %vm10056_vm8, %v1110_v29, %v6107_v35  ;;  %v1148_v13 = vsel %vm10056_vm8, %v6056_v47, %v1110_v29  ;;  %v6237_v29 = vsel %vm868_vm13, %v852_v30, %v884_v27  ;;  %vm10057_vm13 = vcmp.lt.s32.totalorder %v5604_v37, 127 }
 0x330   :  { %1115 = vrot.lane.b32.xlu1 %v5975_v4, %s5389_s1  ;;  %1740 = vmatprep.subr.mxu1 %v1147_v46  ;;  %v854_v46 = vmul.f32 %v5694_v33, %v5670_v9 }
 0x331   :  { %1741 = vmatpush1.msra.mxu1 %v1148_v13  ;;  %v6224_v15 = vpop.permute.xlu0 %1603 }
 0x332   :  { %v1008_v61 = vpop.permute.xlu1 %1007  ;;  %v886_v30 = vmul.f32 0.2, %v854_v46  ;;  %vm870_vm1 = vcmp.ge.f32.partialorder %v854_v46, 0.0 }
 0x333   :  { %921 = vrot.lane.b32.xlu0 %v5888_v21, %s5393_s24  ;;  %v1051_v24 = vsel %vm1037_vm11, %v1008_v61, %v6118_v55 }
 0x334   :  { %1168 = vrot.lane.b32.xlu1 %v6002_v22, %s5388_s20  ;;  %1673 = vmatprep.subr.mxu0 %v1051_v24  ;;  %v6266_v26 = vsel %vm870_vm1, %v854_v46, %v886_v30 }
 0x335   :  { %v6233_v47 = vpop.permute.xlu0 %1554 }
 0x336   :  { %v6235_v1 = vpop.permute.xlu1 %1005 }
 0x337   :  { %1611 = vrot.lane.b32.xlu0 %v6237_v29, %s5379_s0  ;;  %v1052_v13 = vsel %vm1037_vm11, %v6235_v1, %v1008_v61  ;;  %v1099_v61 = vsel %vm1086_vm9, %v1059_v19, %v6134_v58 }
 0x338   :  { %1066 = vrot.lane.b32.xlu1 %v5975_v4, %s5390_s21  ;;  %1674 = vmatpush1.msra.mxu0 %v1052_v13 }
 0x339   :  { %v6248_v24 = vpop.permute.xlu0 %1607 }
 0x33a   :  { %v6250_v10 = vpop.permute.xlu1 %1062 }
 0x33b   :  { %1562 = vrot.lane.b32.xlu0 %v6237_v29, %s5380_s29  ;;  %v1098_v9 = vsel %vm1086_vm9, %v6134_v58, %v6250_v10  ;;  %v1003_v58 = vsel %vm10058_vm2, %v6160_v34, %v6147_v5 }
 0x33c   :  { %1119 = vrot.lane.b32.xlu1 %v6002_v22, %s5389_s1  ;;  %1742 = vmatprep.subr.mxu1 %v1098_v9 }
 0x33d   :  { %1743 = vmatpush1.msra.mxu1 %v1099_v61  ;;  %v6263_v27 = vpop.permute.xlu0 %1505 }
 0x33e   :  { %v961_v13 = vpop.permute.xlu1 %960 }
 0x33f   :  { %1615 = vrot.lane.b32.xlu0 %v6266_v26, %s5379_s0  ;;  %v1002_v7 = vsel %vm10058_vm2, %v6147_v5, %v961_v13 }
 0x340   :  { %1017 = vrot.lane.b32.xlu1 %v5975_v4, %s5391_s22  ;;  %1675 = vmatprep.subr.mxu0 %v1002_v7 }
 0x341   :  { %1676 = vmatpush1.msra.mxu0 %v1003_v58  ;;  %v6279_v19 = vpop.permute.xlu0 %1558 }
 0x342   :  { %v1012_v46 = vpop.permute.xlu1 %1011 }
 0x343   :  { %1513 = vrot.lane.b32.xlu0 %v6237_v29, %s5382_s15  ;;  %v1049_v30 = vsel %vm1037_vm11, %v1012_v46, %v6169_v62  ;;  %v1050_v7 = vsel %vm1037_vm11, %v6118_v55, %v1012_v46 }
 0x344   :  { %1070 = vrot.lane.b32.xlu1 %v6002_v22, %s5390_s21  ;;  %1744 = vmatprep.subr.mxu1 %v1049_v30  ;;  %v6315_v30 = vld [vmem:[%s10034_s3] sm:$0xff] }
 0x345   :  { %1745 = vmatpush1.msra.mxu1 %v1050_v7  ;;  %v6291_v5 = vpop.permute.xlu0 %1456 }
 0x346   :  { %v910_v9 = vpop.permute.xlu1 %909 }
 0x347   :  { %1566 = vrot.lane.b32.xlu0 %v6266_v26, %s5380_s29  ;;  %v953_v61 = vsel %vm10057_vm13, %v910_v9, %v6180_v45 }
 0x348   :  { %968 = vrot.lane.b32.xlu1 %v5975_v4, %s5392_s23  ;;  %1677 = vmatprep.subr.mxu0 %v953_v61 }
 0x349   :  { %v6301_v55 = vpop.permute.xlu0 %1509 }
 0x34a   :  { %v6303_v58 = vpop.permute.xlu1 %907 }
 0x34b   :  { %1464 = vrot.lane.b32.xlu0 %v6237_v29, %s5381_s30  ;;  %v954_v46 = vsel %vm10057_vm13, %v6303_v58, %v910_v9 }
 0x34c   :  { %1021 = vrot.lane.b32.xlu1 %v6002_v22, %s5391_s22  ;;  %1678 = vmatpush1.msra.mxu0 %v954_v46  ;;  %v10066_v46 = vmov 0.0  }
 0x34d   :  { %1679 = vmatprep.subr.mxu0 %v5700_v50  ;;  %v6318_v7 = vpop.permute.xlu0 %1407  ;;  %v1001_v50 = vsel %vm10058_vm2, %v961_v13, %v6195_v48 }
 0x34e   :  { %1680 = vmatpush1.msra.mxu0 %v5702_v52  ;;  %v6321_v61 = vpop.permute.xlu1 %964 }
 0x34f   :  { %1517 = vrot.lane.b32.xlu0 %v6266_v26, %s5382_s15  ;;  %v1000_v9 = vsel %vm10058_vm2, %v6195_v48, %v6321_v61  ;;  %1714 = vmatmul.mubr.f32.vlgmr.msra.gmra.mxu0 %v6315_v30  ;;  %v952_v48 = vsel %vm10057_vm13, %v6180_v45, %v6209_v0 }
 0x350   :  { %919 = vrot.lane.b32.xlu1 %v5975_v4, %s5393_s24  ;;  %1746 = vmatprep.subr.mxu1 %v1000_v9  ;;  %v853_v9 = vmul.f32 %v5694_v33, %v5662_v3 }
 0x351   :  { %1747 = vmatpush1.msra.mxu1 %v1001_v50  ;;  %v6335_v52 = vpop.permute.xlu0 %1460  ;;  %1855 = vmatprep.mubr.f32.mxu0 %v10066_v46 }
 0x352   :  { %v6338_v57 = vpop.permute.xlu1 %915  ;;  %v885_v3 = vmul.f32 0.2, %v853_v9  ;;  %vm869_vm1 = vcmp.ge.f32.partialorder %v853_v9, 0.0 }
 0x353   :  { %1415 = vrot.lane.b32.xlu0 %v6237_v29, %s5383_s16  ;;  %v951_v44 = vsel %vm10057_vm13, %v6209_v0, %v6338_v57 }
 0x354   :  { %972 = vrot.lane.b32.xlu1 %v6002_v22, %s5392_s23  ;;  %1748 = vmatprep.subr.mxu1 %v951_v44  ;;  %v6375_v0 = vsel %vm869_vm1, %v853_v9, %v885_v3 }
 0x355   :  { %1749 = vmatpush1.msra.mxu1 %v952_v48  ;;  %v6354_v13 = vpop.permute.xlu0 %1358 }
 0x356   :  { %1750 = vmatprep.subr.mxu1 %v5710_v40  ;;  %v1606_v50 = vpop.permute.xlu1 %1605  ;;  %v1636_v40 = vsel %vm1625_vm10, %v5886_v20, %v6224_v15  ;;  %v855_v20 = vmul.f32 %v5694_v33, %v5672_v11 }
 0x357   :  { %1751 = vmatpush1.msra.mxu1 %v5708_v39  ;;  %1468 = vrot.lane.b32.xlu0 %v6266_v26, %s5381_s30  ;;  %v1635_v44 = vsel %vm1625_vm10, %v6224_v15, %v1606_v50  ;;  %v1587_v15 = vsel %vm1576_vm12, %v5927_v36, %v6233_v47  ;;  %v1634_v36 = vsel %vm1625_vm10, %v1606_v50, %v6248_v24 }
 0x358   :  { %923 = vrot.lane.b32.xlu1 %v6002_v22, %s5393_s24  ;;  %1791 = vmatprep.subr.mxu0 %v1635_v44  ;;  %v887_v3 = vmul.f32 0.2, %v855_v20  ;;  %vm871_vm1 = vcmp.ge.f32.partialorder %v855_v20, 0.0 }
 0x359   :  { %1792 = vmatpush1.msra.mxu0 %v1636_v40  ;;  %v6369_v39 = vpop.permute.xlu0 %1411  ;;  %1785 = vmatmul.mubr.f32.vlgmr.msra.gmra.mxu1 %v6315_v30 }
 0x35a   :  { %v1557_v45 = vpop.permute.xlu1 %1556  ;;  %1926 = vmatprep.mubr.f32.mxu1 %v10066_v46 }
 0x35b   :  { %1366 = vrot.lane.b32.xlu0 %v6237_v29, %s5384_s17  ;;  %v1586_v48 = vsel %vm1576_vm12, %v6233_v47, %v1557_v45 }
 0x35c   :  { %1613 = vrot.lane.b32.xlu1 %v6375_v0, %s5379_s0  ;;  %1793 = vmatprep.subr.mxu0 %v1586_v48  ;;  %v6407_v48 = vsel %vm871_vm1, %v855_v20, %v887_v3 }
 0x35d   :  { %1794 = vmatpush1.msra.mxu0 %v1587_v15  ;;  %v6388_v44 = vpop.permute.xlu0 %1309 }
 0x35e   :  { %v6390_v9 = vpop.permute.xlu1 %1609 }
 0x35f   :  { %1419 = vrot.lane.b32.xlu0 %v6266_v26, %s5383_s16  ;;  %v1633_v11 = vsel %vm1625_vm10, %v6248_v24, %v6390_v9  ;;  %v1538_v24 = vsel %vm1527_vm14, %v5863_v53, %v6263_v27  ;;  %v1585_v53 = vsel %vm1576_vm12, %v1557_v45, %v6279_v19 }
 0x360   :  { %1564 = vrot.lane.b32.xlu1 %v6375_v0, %s5380_s29  ;;  %1862 = vmatprep.subr.mxu1 %v1633_v11 }
 0x361   :  { %1863 = vmatpush1.msra.mxu1 %v1634_v36  ;;  %v6403_v47 = vpop.permute.xlu0 %1362 }
 0x362   :  { %v1508_v40 = vpop.permute.xlu1 %1507 }
 0x363   :  { %1317 = vrot.lane.b32.xlu0 %v6237_v29, %s5385_s18  ;;  %v1537_v15 = vsel %vm1527_vm14, %v6263_v27, %v1508_v40 }
 0x364   :  { %1617 = vrot.lane.b32.xlu1 %v6407_v48, %s5379_s0  ;;  %1795 = vmatprep.subr.mxu0 %v1537_v15 }
 0x365   :  { %1796 = vmatpush1.msra.mxu0 %v1538_v24  ;;  %v6418_v50 = vpop.permute.xlu0 %1260 }
 0x366   :  { %v6420_v11 = vpop.permute.xlu1 %1560 }
 0x367   :  { %1370 = vrot.lane.b32.xlu0 %v6266_v26, %s5384_s17  ;;  %v1584_v20 = vsel %vm1576_vm12, %v6279_v19, %v6420_v11  ;;  %v1489_v19 = vsel %vm1478_vm15, %v5994_v17, %v6291_v5  ;;  %v1536_v17 = vsel %vm1527_vm14, %v1508_v40, %v6301_v55 }
 0x368   :  { %1515 = vrot.lane.b32.xlu1 %v6375_v0, %s5382_s15  ;;  %1864 = vmatprep.subr.mxu1 %v1584_v20 }
 0x369   :  { %1865 = vmatpush1.msra.mxu1 %v1585_v53  ;;  %v6433_v27 = vpop.permute.xlu0 %1313 }
 0x36a   :  { %v1459_v3 = vpop.permute.xlu1 %1458 }
 0x36b   :  { %1268 = vrot.lane.b32.xlu0 %v6237_v29, %s5386_s2  ;;  %v1488_v36 = vsel %vm1478_vm15, %v6291_v5, %v1459_v3 }
 0x36c   :  { %1568 = vrot.lane.b32.xlu1 %v6407_v48, %s5380_s29  ;;  %1797 = vmatprep.subr.mxu0 %v1488_v36 }
 0x36d   :  { %1798 = vmatpush1.msra.mxu0 %v1489_v19  ;;  %v6446_v45 = vpop.permute.xlu0 %1211 }
 0x36e   :  { %v6448_v15 = vpop.permute.xlu1 %1511 }
 0x36f   :  { %1321 = vrot.lane.b32.xlu0 %v6266_v26, %s5385_s18  ;;  %v1535_v24 = vsel %vm1527_vm14, %v6301_v55, %v6448_v15  ;;  %v1440_v55 = vsel %vm1429_vm0, %v5914_v31, %v6318_v7  ;;  %v1487_v31 = vsel %vm1478_vm15, %v1459_v3, %v6335_v52 }
 0x370   :  { %1466 = vrot.lane.b32.xlu1 %v6375_v0, %s5381_s30  ;;  %1866 = vmatprep.subr.mxu1 %v1535_v24 }
 0x371   :  { %1867 = vmatpush1.msra.mxu1 %v1536_v17  ;;  %v6461_v5 = vpop.permute.xlu0 %1264 }
 0x372   :  { %v1410_v20 = vpop.permute.xlu1 %1409 }
 0x373   :  { %1219 = vrot.lane.b32.xlu0 %v6237_v29, %s5387_s19  ;;  %v1439_v53 = vsel %vm1429_vm0, %v6318_v7, %v1410_v20 }
 0x374   :  { %1519 = vrot.lane.b32.xlu1 %v6407_v48, %s5382_s15  ;;  %1799 = vmatprep.subr.mxu0 %v1439_v53 }
 0x375   :  { %1800 = vmatpush1.msra.mxu0 %v1440_v55  ;;  %v6474_v40 = vpop.permute.xlu0 %1162 }
 0x376   :  { %v6476_v36 = vpop.permute.xlu1 %1462 }
 0x377   :  { %1272 = vrot.lane.b32.xlu0 %v6266_v26, %s5386_s2  ;;  %v1486_v19 = vsel %vm1478_vm15, %v6335_v52, %v6476_v36  ;;  %v1391_v52 = vsel %vm1380_vm3, %v6058_v51, %v6354_v13  ;;  %v1438_v51 = vsel %vm1429_vm0, %v1410_v20, %v6369_v39 }
 0x378   :  { %1417 = vrot.lane.b32.xlu1 %v6375_v0, %s5383_s16  ;;  %1868 = vmatprep.subr.mxu1 %v1486_v19 }
 0x379   :  { %1869 = vmatpush1.msra.mxu1 %v1487_v31  ;;  %v6489_v7 = vpop.permute.xlu0 %1215 }
 0x37a   :  { %v1361_v24 = vpop.permute.xlu1 %1360 }
 0x37b   :  { %1170 = vrot.lane.b32.xlu0 %v6237_v29, %s5388_s20  ;;  %v1390_v17 = vsel %vm1380_vm3, %v6354_v13, %v1361_v24 }
 0x37c   :  { %1470 = vrot.lane.b32.xlu1 %v6407_v48, %s5381_s30  ;;  %1801 = vmatprep.subr.mxu0 %v1390_v17 }
 0x37d   :  { %1802 = vmatpush1.msra.mxu0 %v1391_v52  ;;  %v6502_v3 = vpop.permute.xlu0 %1113 }
 0x37e   :  { %v6504_v53 = vpop.permute.xlu1 %1413 }
 0x37f   :  { %1223 = vrot.lane.b32.xlu0 %v6266_v26, %s5387_s19  ;;  %v1437_v55 = vsel %vm1429_vm0, %v6369_v39, %v6504_v53  ;;  %v1342_v39 = vsel %vm1331_vm4, %v5981_v6, %v6388_v44  ;;  %v1389_v6 = vsel %vm1380_vm3, %v1361_v24, %v6403_v47 }
 0x380   :  { %1368 = vrot.lane.b32.xlu1 %v6375_v0, %s5384_s17  ;;  %1870 = vmatprep.subr.mxu1 %v1437_v55 }
 0x381   :  { %1871 = vmatpush1.msra.mxu1 %v1438_v51  ;;  %v6517_v13 = vpop.permute.xlu0 %1166 }
 0x382   :  { %v1312_v19 = vpop.permute.xlu1 %1311 }
 0x383   :  { %1121 = vrot.lane.b32.xlu0 %v6237_v29, %s5389_s1  ;;  %v1341_v31 = vsel %vm1331_vm4, %v6388_v44, %v1312_v19 }
 0x384   :  { %1421 = vrot.lane.b32.xlu1 %v6407_v48, %s5383_s16  ;;  %1803 = vmatprep.subr.mxu0 %v1341_v31 }
 0x385   :  { %1804 = vmatpush1.msra.mxu0 %v1342_v39  ;;  %v6530_v20 = vpop.permute.xlu0 %1064 }
 0x386   :  { %v6532_v17 = vpop.permute.xlu1 %1364 }
 0x387   :  { %1174 = vrot.lane.b32.xlu0 %v6266_v26, %s5388_s20  ;;  %v1388_v52 = vsel %vm1380_vm3, %v6403_v47, %v6532_v17  ;;  %v1293_v47 = vsel %vm1282_vm5, %v6120_v56, %v6418_v50  ;;  %v1340_v56 = vsel %vm1331_vm4, %v1312_v19, %v6433_v27 }
 0x388   :  { %1319 = vrot.lane.b32.xlu1 %v6375_v0, %s5385_s18  ;;  %1872 = vmatprep.subr.mxu1 %v1388_v52 }
 0x389   :  { %1873 = vmatpush1.msra.mxu1 %v1389_v6  ;;  %v6545_v44 = vpop.permute.xlu0 %1117 }
 0x38a   :  { %v1263_v55 = vpop.permute.xlu1 %1262 }
 0x38b   :  { %1072 = vrot.lane.b32.xlu0 %v6237_v29, %s5390_s21  ;;  %v1292_v51 = vsel %vm1282_vm5, %v6418_v50, %v1263_v55 }
 0x38c   :  { %1372 = vrot.lane.b32.xlu1 %v6407_v48, %s5384_s17  ;;  %1805 = vmatprep.subr.mxu0 %v1292_v51 }
 0x38d   :  { %1806 = vmatpush1.msra.mxu0 %v1293_v47  ;;  %v6558_v24 = vpop.permute.xlu0 %1015 }
 0x38e   :  { %v6560_v31 = vpop.permute.xlu1 %1315 }
 0x38f   :  { %1125 = vrot.lane.b32.xlu0 %v6266_v26, %s5389_s1  ;;  %v1339_v39 = vsel %vm1331_vm4, %v6433_v27, %v6560_v31  ;;  %v1244_v27 = vsel %vm1233_vm6, %v6045_v16, %v6446_v45  ;;  %v1291_v16 = vsel %vm1282_vm5, %v1263_v55, %v6461_v5 }
 0x390   :  { %1270 = vrot.lane.b32.xlu1 %v6375_v0, %s5386_s2  ;;  %1874 = vmatprep.subr.mxu1 %v1339_v39 }
 0x391   :  { %1875 = vmatpush1.msra.mxu1 %v1340_v56  ;;  %v6573_v50 = vpop.permute.xlu0 %1068 }
 0x392   :  { %v1214_v52 = vpop.permute.xlu1 %1213 }
 0x393   :  { %1023 = vrot.lane.b32.xlu0 %v6237_v29, %s5391_s22  ;;  %v1243_v6 = vsel %vm1233_vm6, %v6446_v45, %v1214_v52 }
 0x394   :  { %1323 = vrot.lane.b32.xlu1 %v6407_v48, %s5385_s18  ;;  %1807 = vmatprep.subr.mxu0 %v1243_v6 }
 0x395   :  { %1808 = vmatpush1.msra.mxu0 %v1244_v27  ;;  %v6586_v19 = vpop.permute.xlu0 %966 }
 0x396   :  { %v6588_v51 = vpop.permute.xlu1 %1266 }
 0x397   :  { %1076 = vrot.lane.b32.xlu0 %v6266_v26, %s5390_s21  ;;  %v1290_v47 = vsel %vm1282_vm5, %v6461_v5, %v6588_v51  ;;  %v1195_v5 = vsel %vm1184_vm7, %v6182_v43, %v6474_v40  ;;  %v1242_v43 = vsel %vm1233_vm6, %v1214_v52, %v6489_v7 }
 0x398   :  { %1221 = vrot.lane.b32.xlu1 %v6375_v0, %s5387_s19  ;;  %1876 = vmatprep.subr.mxu1 %v1290_v47 }
 0x399   :  { %1877 = vmatpush1.msra.mxu1 %v1291_v16  ;;  %v6601_v45 = vpop.permute.xlu0 %1019 }
 0x39a   :  { %v1165_v39 = vpop.permute.xlu1 %1164 }
 0x39b   :  { %974 = vrot.lane.b32.xlu0 %v6237_v29, %s5392_s23  ;;  %v1194_v56 = vsel %vm1184_vm7, %v6474_v40, %v1165_v39 }
 0x39c   :  { %1274 = vrot.lane.b32.xlu1 %v6407_v48, %s5386_s2  ;;  %1809 = vmatprep.subr.mxu0 %v1194_v56 }
 0x39d   :  { %1810 = vmatpush1.msra.mxu0 %v1195_v5  ;;  %v6614_v55 = vpop.permute.xlu0 %917  ;;  %v856_v5 = vmul.f32 %v5694_v33, %v5676_v14 }
 0x39e   :  { %v6616_v6 = vpop.permute.xlu1 %1217 }
 0x39f   :  { %1027 = vrot.lane.b32.xlu0 %v6266_v26, %s5391_s22  ;;  %v1241_v27 = vsel %vm1233_vm6, %v6489_v7, %v6616_v6  ;;  %v1146_v7 = vsel %vm10056_vm8, %v6107_v35, %v6502_v3  ;;  %v1193_v35 = vsel %vm1184_vm7, %v1165_v39, %v6517_v13  ;;  %vm872_vm1 = vcmp.ge.f32.partialorder %v856_v5, 0.0 }
 0x3a0   :  { %1172 = vrot.lane.b32.xlu1 %v6375_v0, %s5388_s20  ;;  %1878 = vmatprep.subr.mxu1 %v1241_v27 }
 0x3a1   :  { %1879 = vmatpush1.msra.mxu1 %v1242_v43  ;;  %v6629_v40 = vpop.permute.xlu0 %970  ;;  %v888_v43 = vmul.f32 0.2, %v856_v5 }
 0x3a2   :  { %v1116_v47 = vpop.permute.xlu1 %1115 }
 0x3a3   :  { %925 = vrot.lane.b32.xlu0 %v6237_v29, %s5393_s24  ;;  %v1145_v16 = vsel %vm10056_vm8, %v6502_v3, %v1116_v47 }
 0x3a4   :  { %1225 = vrot.lane.b32.xlu1 %v6407_v48, %s5387_s19  ;;  %1811 = vmatprep.subr.mxu0 %v1145_v16 }
 0x3a5   :  { %1812 = vmatpush1.msra.mxu0 %v1146_v7  ;;  %v6642_v52 = vpop.permute.xlu0 %921 }
 0x3a6   :  { %v6644_v56 = vpop.permute.xlu1 %1168 }
 0x3a7   :  { %978 = vrot.lane.b32.xlu0 %v6266_v26, %s5392_s23  ;;  %v1192_v27 = vsel %vm1184_vm7, %v6517_v13, %v6644_v56  ;;  %v1097_v13 = vsel %vm1086_vm9, %v6250_v10, %v6530_v20  ;;  %v1144_v10 = vsel %vm10056_vm8, %v1116_v47, %v6545_v44 }
 0x3a8   :  { %1123 = vrot.lane.b32.xlu1 %v6375_v0, %s5389_s1  ;;  %1880 = vmatprep.subr.mxu1 %v1192_v27  ;;  %v6676_v27 = vsel %vm872_vm1, %v856_v5, %v888_v43  ;;  %v857_v43 = vmul.f32 %v5694_v33, %v5680_v18 }
 0x3a9   :  { %1881 = vmatpush1.msra.mxu1 %v1193_v35  ;;  %v6659_v3 = vpop.permute.xlu0 %1611  ;;  %v858_v35 = vmul.f32 %v5694_v33, %v5688_v23 }
 0x3aa   :  { %v1067_v14 = vpop.permute.xlu1 %1066 }
 0x3ab   :  { %929 = vrot.lane.b32.xlu0 %v6266_v26, %s5393_s24  ;;  %v1096_v16 = vsel %vm1086_vm9, %v6530_v20, %v1067_v14  ;;  %v890_v5 = vmul.f32 0.2, %v858_v35  ;;  %vm874_vm1 = vcmp.ge.f32.partialorder %v858_v35, 0.0 }
 0x3ac   :  { %1176 = vrot.lane.b32.xlu1 %v6407_v48, %s5388_s20  ;;  %1813 = vmatprep.subr.mxu0 %v1096_v16 }
 0x3ad   :  { %1814 = vmatpush1.msra.mxu0 %v1097_v13  ;;  %v6672_v39 = vpop.permute.xlu0 %1562  ;;  %v6710_v33 = vsel %vm874_vm1, %v858_v35, %v890_v5 }
 0x3ae   :  { %v6674_v7 = vpop.permute.xlu1 %1119 }
 0x3af   :  { %1619 = vrot.lane.b32.xlu0 %v6676_v27, %s5379_s0  ;;  %v1143_v16 = vsel %vm10056_vm8, %v6545_v44, %v6674_v7  ;;  %v1048_v44 = vsel %vm1037_vm11, %v6169_v62, %v6558_v24  ;;  %vm873_vm8 = vcmp.ge.f32.partialorder %v857_v43, 0.0  ;;  %v1095_v62 = vsel %vm1086_vm9, %v1067_v14, %v6573_v50 }
 0x3b0   :  { %1074 = vrot.lane.b32.xlu1 %v6375_v0, %s5390_s21  ;;  %1882 = vmatprep.subr.mxu1 %v1143_v16  ;;  %v889_v16 = vmul.f32 0.2, %v857_v43 }
 0x3b1   :  { %1883 = vmatpush1.msra.mxu1 %v1144_v10  ;;  %v6691_v20 = vpop.permute.xlu0 %1615 }
 0x3b2   :  { %v1018_v23 = vpop.permute.xlu1 %1017  ;;  %v6725_v5 = vsel %vm873_vm8, %v857_v43, %v889_v16  ;;  %vm10067_vm8 = vcmp.lt.s32.totalorder %v5604_v37, 123 }
 0x3b3   :  { %1570 = vrot.lane.b32.xlu0 %v6676_v27, %s5380_s29  ;;  %v1047_v13 = vsel %vm1037_vm11, %v6558_v24, %v1018_v23  ;;  %vm10068_vm1 = vmmov %vm10067_vm8 }
 0x3b4   :  { %1127 = vrot.lane.b32.xlu1 %v6407_v48, %s5389_s1  ;;  %1815 = vmatprep.subr.mxu0 %v1047_v13 }
 0x3b5   :  { %1816 = vmatpush1.msra.mxu0 %v1048_v44  ;;  %v6706_v47 = vpop.permute.xlu0 %1513 }
 0x3b6   :  { %v6708_v18 = vpop.permute.xlu1 %1070 }
 0x3b7   :  { %1623 = vrot.lane.b32.xlu0 %v6710_v33, %s5379_s0  ;;  %v1094_v10 = vsel %vm1086_vm9, %v6573_v50, %v6708_v18  ;;  %v999_v50 = vsel %vm10058_vm2, %v6321_v61, %v6586_v19  ;;  %v1046_v61 = vsel %vm1037_vm11, %v1018_v23, %v6601_v45 }
 0x3b8   :  { %1025 = vrot.lane.b32.xlu1 %v6375_v0, %s5391_s22  ;;  %1884 = vmatprep.subr.mxu1 %v1094_v10 }
 0x3b9   :  { %1885 = vmatpush1.msra.mxu1 %v1095_v62  ;;  %v6723_v24 = vpop.permute.xlu0 %1566 }
 0x3ba   :  { %v969_v35 = vpop.permute.xlu1 %968 }
 0x3bb   :  { %1523 = vrot.lane.b32.xlu0 %v6725_v5, %s5382_s15  ;;  %v998_v13 = vsel %vm10058_vm2, %v6586_v19, %v969_v35 }
 0x3bc   :  { %1078 = vrot.lane.b32.xlu1 %v6407_v48, %s5390_s21  ;;  %1817 = vmatprep.subr.mxu0 %v998_v13 }
 0x3bd   :  { %1818 = vmatpush1.msra.mxu0 %v999_v50  ;;  %v6738_v14 = vpop.permute.xlu0 %1464 }
 0x3be   :  { %v6740_v43 = vpop.permute.xlu1 %1021 }
 0x3bf   :  { %1472 = vrot.lane.b32.xlu0 %v6676_v27, %s5381_s30  ;;  %v1045_v44 = vsel %vm1037_vm11, %v6601_v45, %v6740_v43  ;;  %v950_v45 = vsel %vm10057_vm13, %v6338_v57, %v6614_v55  ;;  %v997_v57 = vsel %vm10058_vm2, %v969_v35, %v6629_v40 }
 0x3c0   :  { %976 = vrot.lane.b32.xlu1 %v6375_v0, %s5392_s23  ;;  %1886 = vmatprep.subr.mxu1 %v1045_v44 }
 0x3c1   :  { %1887 = vmatpush1.msra.mxu1 %v1046_v61  ;;  %v6753_v19 = vpop.permute.xlu0 %1517 }
 0x3c2   :  { %v920_v16 = vpop.permute.xlu1 %919 }
 0x3c3   :  { %1525 = vrot.lane.b32.xlu0 %v6710_v33, %s5382_s15  ;;  %v949_v10 = vsel %vm10057_vm13, %v6614_v55, %v920_v16 }
 0x3c4   :  { %1029 = vrot.lane.b32.xlu1 %v6407_v48, %s5391_s22  ;;  %1819 = vmatprep.subr.mxu0 %v949_v10 }
 0x3c5   :  { %1820 = vmatpush1.msra.mxu0 %v950_v45  ;;  %v6766_v23 = vpop.permute.xlu0 %1415 }
 0x3c6   :  { %1821 = vmatprep.subr.mxu0 %v5865_v8  ;;  %v6769_v62 = vpop.permute.xlu1 %972 }
 0x3c7   :  { %1822 = vmatpush1.msra.mxu0 %v5726_v59  ;;  %1425 = vrot.lane.b32.xlu0 %v6725_v5, %s5383_s16  ;;  %v996_v13 = vsel %vm10058_vm2, %v6629_v40, %v6769_v62  ;;  %v948_v40 = vsel %vm10057_vm13, %v920_v16, %v6642_v52 }
 0x3c8   :  { %927 = vrot.lane.b32.xlu1 %v6375_v0, %s5393_s24  ;;  %1888 = vmatprep.subr.mxu1 %v996_v13 }
 0x3c9   :  { %1889 = vmatpush1.msra.mxu1 %v997_v57  ;;  %v6783_v8 = vpop.permute.xlu0 %1468  ;;  %1856 = vmatmul.mubr.f32.vlgmr.msra.gmra.mxu0 %v6315_v30 }
 0x3ca   :  { %v6786_v59 = vpop.permute.xlu1 %923  ;;  %1997 = vmatprep.mubr.f32.mxu0 %v10066_v46 }
 0x3cb   :  { %1374 = vrot.lane.b32.xlu0 %v6676_v27, %s5384_s17  ;;  %v947_v55 = vsel %vm10057_vm13, %v6642_v52, %v6786_v59  ;;  %v1632_v52 = vsel %vm1625_vm10, %v6390_v9, %v6659_v3  ;;  %v1583_v9 = vsel %vm1576_vm12, %v6420_v11, %v6672_v39 }
 0x3cc   :  { %980 = vrot.lane.b32.xlu1 %v6407_v48, %s5392_s23  ;;  %1890 = vmatprep.subr.mxu1 %v947_v55 }
 0x3cd   :  { %1891 = vmatpush1.msra.mxu1 %v948_v40  ;;  %v6800_v35 = vpop.permute.xlu0 %1366 }
 0x3ce   :  { %1892 = vmatprep.subr.mxu1 %v5888_v21  ;;  %v1614_v50 = vpop.permute.xlu1 %1613 }
 0x3cf   :  { %1893 = vmatpush1.msra.mxu1 %v5975_v4  ;;  %1427 = vrot.lane.b32.xlu0 %v6710_v33, %s5383_s16  ;;  %v1631_v44 = vsel %vm1625_vm10, %v6659_v3, %v1614_v50  ;;  %v1630_v11 = vsel %vm1625_vm10, %v1614_v50, %v6691_v20 }
 0x3d0   :  { %931 = vrot.lane.b32.xlu1 %v6407_v48, %s5393_s24  ;;  %1933 = vmatprep.subr.mxu0 %v1631_v44 }
 0x3d1   :  { %1934 = vmatpush1.msra.mxu0 %v1632_v52  ;;  %v6815_v21 = vpop.permute.xlu0 %1419  ;;  %1927 = vmatmul.mubr.f32.vlgmr.msra.gmra.mxu1 %v6315_v30 }
 0x3d2   :  { %v1565_v4 = vpop.permute.xlu1 %1564  ;;  %2068 = vmatprep.mubr.f32.mxu1 %v10066_v46 }
 0x3d3   :  { %1327 = vrot.lane.b32.xlu0 %v6725_v5, %s5385_s18  ;;  %v1582_v61 = vsel %vm1576_vm12, %v6672_v39, %v1565_v4 }
 0x3d4   :  { %1621 = vrot.lane.b32.xlu1 %v6725_v5, %s5379_s0  ;;  %1935 = vmatprep.subr.mxu0 %v1582_v61 }
 0x3d5   :  { %1936 = vmatpush1.msra.mxu0 %v1583_v9  ;;  %v6830_v3 = vpop.permute.xlu0 %1317 }
 0x3d6   :  { %v6832_v16 = vpop.permute.xlu1 %1617 }
 0x3d7   :  { %1276 = vrot.lane.b32.xlu0 %v6676_v27, %s5386_s2  ;;  %v1629_v10 = vsel %vm1625_vm10, %v6691_v20, %v6832_v16  ;;  %v1534_v20 = vsel %vm1527_vm14, %v6448_v15, %v6706_v47  ;;  %v1581_v15 = vsel %vm1576_vm12, %v1565_v4, %v6723_v24 }
 0x3d8   :  { %1572 = vrot.lane.b32.xlu1 %v6725_v5, %s5380_s29  ;;  %2004 = vmatprep.subr.mxu1 %v1629_v10 }
 0x3d9   :  { %2005 = vmatpush1.msra.mxu1 %v1630_v11  ;;  %v6845_v39 = vpop.permute.xlu0 %1370 }
 0x3da   :  { %v1516_v45 = vpop.permute.xlu1 %1515 }
 0x3db   :  { %1329 = vrot.lane.b32.xlu0 %v6710_v33, %s5385_s18  ;;  %v1533_v13 = vsel %vm1527_vm14, %v6706_v47, %v1516_v45 }
 0x3dc   :  { %1521 = vrot.lane.b32.xlu1 %v6676_v27, %s5382_s15  ;;  %1937 = vmatprep.subr.mxu0 %v1533_v13 }
 0x3dd   :  { %1938 = vmatpush1.msra.mxu0 %v1534_v20  ;;  %v6858_v57 = vpop.permute.xlu0 %1268 }
 0x3de   :  { %v6860_v55 = vpop.permute.xlu1 %1568 }
 0x3df   :  { %1229 = vrot.lane.b32.xlu0 %v6725_v5, %s5387_s19  ;;  %v1580_v40 = vsel %vm1576_vm12, %v6723_v24, %v6860_v55  ;;  %v1485_v24 = vsel %vm1478_vm15, %v6476_v36, %v6738_v14  ;;  %v1532_v36 = vsel %vm1527_vm14, %v1516_v45, %v6753_v19 }
 0x3e0   :  { %1574 = vrot.lane.b32.xlu1 %v6710_v33, %s5380_s29  ;;  %2006 = vmatprep.subr.mxu1 %v1580_v40 }
 0x3e1   :  { %2007 = vmatpush1.msra.mxu1 %v1581_v15  ;;  %v6873_v47 = vpop.permute.xlu0 %1321 }
 0x3e2   :  { %v1467_v50 = vpop.permute.xlu1 %1466 }
 0x3e3   :  { %1178 = vrot.lane.b32.xlu0 %v6676_v27, %s5388_s20  ;;  %v1484_v44 = vsel %vm1478_vm15, %v6738_v14, %v1467_v50 }
 0x3e4   :  { %1474 = vrot.lane.b32.xlu1 %v6725_v5, %s5381_s30  ;;  %1939 = vmatprep.subr.mxu0 %v1484_v44 }
 0x3e5   :  { %1940 = vmatpush1.msra.mxu0 %v1485_v24  ;;  %v6886_v52 = vpop.permute.xlu0 %1219 }
 0x3e6   :  { %v6888_v4 = vpop.permute.xlu1 %1519 }
 0x3e7   :  { %1231 = vrot.lane.b32.xlu0 %v6710_v33, %s5387_s19  ;;  %v1531_v61 = vsel %vm1527_vm14, %v6753_v19, %v6888_v4  ;;  %v1436_v19 = vsel %vm1429_vm0, %v6504_v53, %v6766_v23  ;;  %v1483_v53 = vsel %vm1478_vm15, %v1467_v50, %v6783_v8 }
 0x3e8   :  { %1423 = vrot.lane.b32.xlu1 %v6676_v27, %s5383_s16  ;;  %2008 = vmatprep.subr.mxu1 %v1531_v61 }
 0x3e9   :  { %2009 = vmatpush1.msra.mxu1 %v1532_v36  ;;  %v6901_v14 = vpop.permute.xlu0 %1272 }
 0x3ea   :  { %v1418_v9 = vpop.permute.xlu1 %1417 }
 0x3eb   :  { %1131 = vrot.lane.b32.xlu0 %v6725_v5, %s5389_s1  ;;  %v1435_v10 = vsel %vm1429_vm0, %v6766_v23, %v1418_v9 }
 0x3ec   :  { %1476 = vrot.lane.b32.xlu1 %v6710_v33, %s5381_s30  ;;  %1941 = vmatprep.subr.mxu0 %v1435_v10 }
 0x3ed   :  { %1942 = vmatpush1.msra.mxu0 %v1436_v19  ;;  %v6914_v11 = vpop.permute.xlu0 %1170 }
 0x3ee   :  { %v6916_v45 = vpop.permute.xlu1 %1470 }
 0x3ef   :  { %1080 = vrot.lane.b32.xlu0 %v6676_v27, %s5390_s21  ;;  %v1482_v13 = vsel %vm1478_vm15, %v6783_v8, %v6916_v45  ;;  %v1387_v8 = vsel %vm1380_vm3, %v6532_v17, %v6800_v35  ;;  %v1434_v17 = vsel %vm1429_vm0, %v1418_v9, %v6815_v21 }
 0x3f0   :  { %1376 = vrot.lane.b32.xlu1 %v6725_v5, %s5384_s17  ;;  %2010 = vmatprep.subr.mxu1 %v1482_v13 }
 0x3f1   :  { %2011 = vmatpush1.msra.mxu1 %v1483_v53  ;;  %v6929_v23 = vpop.permute.xlu0 %1223 }
 0x3f2   :  { %v1369_v20 = vpop.permute.xlu1 %1368 }
 0x3f3   :  { %1133 = vrot.lane.b32.xlu0 %v6710_v33, %s5389_s1  ;;  %v1386_v40 = vsel %vm1380_vm3, %v6800_v35, %v1369_v20 }
 0x3f4   :  { %1325 = vrot.lane.b32.xlu1 %v6676_v27, %s5385_s18  ;;  %1943 = vmatprep.subr.mxu0 %v1386_v40 }
 0x3f5   :  { %1944 = vmatpush1.msra.mxu0 %v1387_v8  ;;  %v6942_v15 = vpop.permute.xlu0 %1121 }
 0x3f6   :  { %v6944_v50 = vpop.permute.xlu1 %1421 }
 0x3f7   :  { %1033 = vrot.lane.b32.xlu0 %v6725_v5, %s5391_s22  ;;  %v1433_v44 = vsel %vm1429_vm0, %v6815_v21, %v6944_v50  ;;  %v1338_v21 = vsel %vm1331_vm4, %v6560_v31, %v6830_v3  ;;  %v1385_v31 = vsel %vm1380_vm3, %v1369_v20, %v6845_v39 }
 0x3f8   :  { %1378 = vrot.lane.b32.xlu1 %v6710_v33, %s5384_s17  ;;  %2012 = vmatprep.subr.mxu1 %v1433_v44 }
 0x3f9   :  { %2013 = vmatpush1.msra.mxu1 %v1434_v17  ;;  %v6957_v35 = vpop.permute.xlu0 %1174  ;;  %v1240_v17 = vsel %vm1233_vm6, %v6616_v6, %v6886_v52 }
 0x3fa   :  { %v1320_v24 = vpop.permute.xlu1 %1319 }
 0x3fb   :  { %982 = vrot.lane.b32.xlu0 %v6676_v27, %s5392_s23  ;;  %v1337_v61 = vsel %vm1331_vm4, %v6830_v3, %v1320_v24 }
 0x3fc   :  { %1278 = vrot.lane.b32.xlu1 %v6725_v5, %s5386_s2  ;;  %1945 = vmatprep.subr.mxu0 %v1337_v61 }
 0x3fd   :  { %1946 = vmatpush1.msra.mxu0 %v1338_v21  ;;  %v6970_v36 = vpop.permute.xlu0 %1072 }
 0x3fe   :  { %v6972_v9 = vpop.permute.xlu1 %1372 }
 0x3ff   :  { %1035 = vrot.lane.b32.xlu0 %v6710_v33, %s5391_s22  ;;  %v1384_v10 = vsel %vm1380_vm3, %v6845_v39, %v6972_v9  ;;  %v1289_v39 = vsel %vm1282_vm5, %v6588_v51, %v6858_v57  ;;  %v1336_v51 = vsel %vm1331_vm4, %v1320_v24, %v6873_v47 }
 0x400   :  { %1227 = vrot.lane.b32.xlu1 %v6676_v27, %s5387_s19  ;;  %2014 = vmatprep.subr.mxu1 %v1384_v10 }
 0x401   :  { %2015 = vmatpush1.msra.mxu1 %v1385_v31  ;;  %v6985_v3 = vpop.permute.xlu0 %1125  ;;  %v1191_v31 = vsel %vm1184_vm7, %v6644_v56, %v6914_v11 }
 0x402   :  { %v1271_v19 = vpop.permute.xlu1 %1270 }
 0x403   :  { %935 = vrot.lane.b32.xlu0 %v6725_v5, %s5393_s24  ;;  %v1288_v13 = vsel %vm1282_vm5, %v6858_v57, %v1271_v19  ;;  %v1287_v21 = vsel %vm1282_vm5, %v1271_v19, %v6901_v14 }
 0x404   :  { %1280 = vrot.lane.b32.xlu1 %v6710_v33, %s5386_s2  ;;  %1947 = vmatprep.subr.mxu0 %v1288_v13 }
 0x405   :  { %1948 = vmatpush1.msra.mxu0 %v1289_v39  ;;  %v6998_v53 = vpop.permute.xlu0 %1023 }
 0x406   :  { %v7000_v20 = vpop.permute.xlu1 %1323 }
 0x407   :  { %937 = vrot.lane.b32.xlu0 %v6710_v33, %s5393_s24  ;;  %v1335_v40 = vsel %vm1331_vm4, %v6873_v47, %v7000_v20 }
 0x408   :  { %1180 = vrot.lane.b32.xlu1 %v6725_v5, %s5388_s20  ;;  %2016 = vmatprep.subr.mxu1 %v1335_v40 }
 0x409   :  { %2017 = vmatpush1.msra.mxu1 %v1336_v51  ;;  %v7013_v57 = vpop.permute.xlu0 %1076  ;;  %v1142_v51 = vsel %vm10068_vm1, %v6674_v7, %v6942_v15 }
 0x40a   :  { %v1222_v8 = vpop.permute.xlu1 %1221 }
 0x40b   :  { %v1239_v44 = vsel %vm1233_vm6, %v6886_v52, %v1222_v8  ;;  %v1238_v39 = vsel %vm1233_vm6, %v1222_v8, %v6929_v23 }
 0x40c   :  { %1129 = vrot.lane.b32.xlu1 %v6676_v27, %s5389_s1  ;;  %1949 = vmatprep.subr.mxu0 %v1239_v44 }
 0x40d   :  { %1950 = vmatpush1.msra.mxu0 %v1240_v17  ;;  %v7024_v61 = vpop.permute.xlu0 %974 }
 0x40e   :  { %v7026_v47 = vpop.permute.xlu1 %1274 }
 0x40f   :  { %v1286_v24 = vsel %vm1282_vm5, %v6901_v14, %v7026_v47 }
 0x410   :  { %1182 = vrot.lane.b32.xlu1 %v6710_v33, %s5388_s20  ;;  %2018 = vmatprep.subr.mxu1 %v1286_v24 }
 0x411   :  { %2019 = vmatpush1.msra.mxu1 %v1287_v21  ;;  %v7037_v6 = vpop.permute.xlu0 %1027  ;;  %v1093_v21 = vsel %vm1086_vm9, %v6708_v18, %v6970_v36 }
 0x412   :  { %v1173_v52 = vpop.permute.xlu1 %1172 }
 0x413   :  { %v1190_v10 = vsel %vm1184_vm7, %v6914_v11, %v1173_v52  ;;  %v1189_v17 = vsel %vm1184_vm7, %v1173_v52, %v6957_v35 }
 0x414   :  { %1082 = vrot.lane.b32.xlu1 %v6725_v5, %s5390_s21  ;;  %1951 = vmatprep.subr.mxu0 %v1190_v10 }
 0x415   :  { %1952 = vmatpush1.msra.mxu0 %v1191_v31  ;;  %v7048_v13 = vpop.permute.xlu0 %925 }
 0x416   :  { %v7050_v14 = vpop.permute.xlu1 %1225 }
 0x417   :  { %v1237_v19 = vsel %vm1233_vm6, %v6929_v23, %v7050_v14 }
 0x418   :  { %1031 = vrot.lane.b32.xlu1 %v6676_v27, %s5391_s22  ;;  %2020 = vmatprep.subr.mxu1 %v1237_v19 }
 0x419   :  { %2021 = vmatpush1.msra.mxu1 %v1238_v39  ;;  %v7061_v56 = vpop.permute.xlu0 %978 }
 0x41a   :  { %v1124_v11 = vpop.permute.xlu1 %1123 }
 0x41b   :  { %v1141_v40 = vsel %vm10067_vm8, %v6942_v15, %v1124_v11  ;;  %vm10069_vm8 = vmmov %vm10068_vm1  ;;  %v1140_v31 = vsel %vm10068_vm1, %v1124_v11, %v6985_v3 }
 0x41c   :  { %1084 = vrot.lane.b32.xlu1 %v6710_v33, %s5390_s21  ;;  %1953 = vmatprep.subr.mxu0 %v1141_v40  ;;  %v1044_v40 = vsel %vm1037_vm11, %v6740_v43, %v6998_v53 }
 0x41d   :  { %1954 = vmatpush1.msra.mxu0 %v1142_v51  ;;  %v7072_v44 = vpop.permute.xlu0 %929 }
 0x41e   :  { %v7074_v23 = vpop.permute.xlu1 %1176 }
 0x41f   :  { %v1188_v8 = vsel %vm1184_vm7, %v6957_v35, %v7074_v23 }
 0x420   :  { %984 = vrot.lane.b32.xlu1 %v6725_v5, %s5392_s23  ;;  %2022 = vmatprep.subr.mxu1 %v1188_v8 }
 0x421   :  { %2023 = vmatpush1.msra.mxu1 %v1189_v17  ;;  %v7085_v7 = vpop.permute.xlu0 %1619 }
 0x422   :  { %v1075_v15 = vpop.permute.xlu1 %1074 }
 0x423   :  { %v1092_v24 = vsel %vm1086_vm9, %v6970_v36, %v1075_v15  ;;  %v1643_v36 = vld [vmem:[%s10035_s4] sm:$0xff]  ;;  %v1091_v8 = vsel %vm1086_vm9, %v1075_v15, %v7013_v57 }
 0x424   :  { %933 = vrot.lane.b32.xlu1 %v6676_v27, %s5393_s24  ;;  %1955 = vmatprep.subr.mxu0 %v1092_v24  ;;  %v995_v24 = vsel %vm10058_vm2, %v6769_v62, %v7024_v61 }
 0x425   :  { %1956 = vmatpush1.msra.mxu0 %v1093_v21  ;;  %v7096_v10 = vpop.permute.xlu0 %1570 }
 0x426   :  { %v7098_v35 = vpop.permute.xlu1 %1127 }
 0x427   :  { %v1139_v52 = vsel %vm10069_vm8, %v6985_v3, %v7098_v35  ;;  %vm10070_vm8 = vmmov %vm10068_vm1 }
 0x428   :  { %986 = vrot.lane.b32.xlu1 %v6710_v33, %s5392_s23  ;;  %2024 = vmatprep.subr.mxu1 %v1139_v52 }
 0x429   :  { %2025 = vmatpush1.msra.mxu1 %v1140_v31  ;;  %v1624_v18 = vpop.permute.xlu0 %1623 }
 0x42a   :  { %v1026_v19 = vpop.permute.xlu1 %1025 }
 0x42b   :  { %v1043_v39 = vsel %vm1037_vm11, %v6998_v53, %v1026_v19  ;;  %v1042_v15 = vsel %vm1037_vm11, %v1026_v19, %v7037_v6 }
 0x42c   :  { %1957 = vmatprep.subr.mxu0 %v1043_v39  ;;  %1646 = vperm.xlu1 %5322, %v1643_v36  }
 0x42d   :  { %1958 = vmatpush1.msra.mxu0 %v1044_v40  ;;  %v7119_v3 = vpop.permute.xlu0 %1523 }
 0x42e   :  { %v7121_v11 = vpop.permute.xlu1 %1078 }
 0x42f   :  { %v1090_v51 = vsel %vm1086_vm9, %v7013_v57, %v7121_v11 }
 0x430   :  { %2026 = vmatprep.subr.mxu1 %v1090_v51  ;;  %v1641_v51 = vsel %vm1625_vm10, %v1624_v18, %v5845_v63 }
 0x431   :  { %2027 = vmatpush1.msra.mxu1 %v1091_v8  ;;  %v7130_v17 = vpop.permute.xlu0 %1472 }
 0x432   :  { %v977_v43 = vpop.permute.xlu1 %976 }
 0x433   :  { %v994_v53 = vsel %vm10058_vm2, %v7024_v61, %v977_v43  ;;  %v946_v61 = vsel %vm10057_vm13, %v6786_v59, %v7048_v13  ;;  %v993_v40 = vsel %vm10058_vm2, %v977_v43, %v7061_v56 }
 0x434   :  { %1959 = vmatprep.subr.mxu0 %v994_v53 }
 0x435   :  { %1960 = vmatpush1.msra.mxu0 %v995_v24  ;;  %v7139_v21 = vpop.permute.xlu0 %1525 }
 0x436   :  { %v7141_v52 = vpop.permute.xlu1 %1029 }
 0x437   :  { %v1041_v57 = vsel %vm1037_vm11, %v7037_v6, %v7141_v52 }
 0x438   :  { %2028 = vmatprep.subr.mxu1 %v1041_v57 }
 0x439   :  { %2029 = vmatpush1.msra.mxu1 %v1042_v15  ;;  %v7150_v31 = vpop.permute.xlu0 %1425 }
 0x43a   :  { %v928_v36 = vpop.permute.xlu1 %927 }
 0x43b   :  { %v945_v62 = vsel %vm10057_vm13, %v7048_v13, %v928_v36  ;;  %v944_v59 = vsel %vm10057_vm13, %v928_v36, %v7072_v44  ;;  %v1528_v36 = vsel %vm1527_vm14, %v7119_v3, %v7139_v21 }
 0x43c   :  { %1961 = vmatprep.subr.mxu0 %v945_v62 }
 0x43d   :  { %1962 = vmatpush1.msra.mxu0 %v946_v61  ;;  %v7167_v19 = vpop.permute.xlu0 %1374  ;;  %v1481_v61 = vsel %vm1478_vm15, %v6916_v45, %v7130_v17 }
 0x43e   :  { %1963 = vmatprep.subr.mxu0 %v6237_v29  ;;  %v7160_v39 = vpop.permute.xlu1 %980 }
 0x43f   :  { %1964 = vmatpush1.msra.mxu0 %v6002_v22  ;;  %v992_v6 = vsel %vm10058_vm2, %v7061_v56, %v7160_v39 }
 0x440   :  { %2030 = vmatprep.subr.mxu1 %v992_v6  ;;  %1998 = vmatmul.mubr.f32.vlgmr.msra.gmra.mxu0 %v6315_v30 }
 0x441   :  { %2031 = vmatpush1.msra.mxu1 %v993_v40  ;;  %2139 = vmatprep.mubr.f32.mxu0 %v10066_v46  ;;  %v1428_v13 = vpop.permute.xlu0 %1427 }
 0x442   :  { %v7174_v29 = vpop.permute.xlu1 %931 }
 0x443   :  { %v943_v22 = vsel %vm10057_vm13, %v7072_v44, %v7174_v29 }
 0x444   :  { %2032 = vmatprep.subr.mxu1 %v943_v22 }
 0x445   :  { %2033 = vmatpush1.msra.mxu1 %v944_v59 }
 0x446   :  { %2034 = vmatprep.subr.mxu1 %v6266_v26  ;;  %v1622_v30 = vpop.permute.xlu1 %1621  ;;  %v1628_v26 = vsel %vm1625_vm10, %v6832_v16, %v7085_v7  ;;  %v1579_v16 = vsel %vm1576_vm12, %v6860_v55, %v7096_v10 }
 0x447   :  { %2035 = vmatpush1.msra.mxu1 %v6375_v0  ;;  %v1627_v56 = vsel %vm1625_vm10, %v7085_v7, %v1622_v30  ;;  %v1626_v8 = vsel %vm1625_vm10, %v1622_v30, %v1624_v18  ;;  %v7200_v0 = vld [vmem:[%s10034_s3] sm:$0xff]  ;;  %v1328_v18 = vpop.permute.xlu0 %1327 }
 0x448   :  { %2075 = vmatprep.subr.mxu0 %v1627_v56  ;;  %2146 = vmatprep.subr.mxu1 %v1641_v51  ;;  %v1383_v56 = vsel %vm1380_vm3, %v6972_v9, %v7167_v19 }
 0x449   :  { %2069 = vmatmul.mubr.f32.vlgmr.msra.gmra.mxu1 %v7200_v0  ;;  %2076 = vmatpush1.msra.mxu0 %v1628_v26 }
 0x44a   :  { %2147 = vmatpush1.msra.mxu1 %v1626_v8  ;;  %v1573_v63 = vpop.permute.xlu1 %1572  ;;  %2210 = vmatprep.mubr.f32.mxu1 %v10066_v46 }
 0x44b   :  { %v1578_v44 = vsel %vm1576_vm12, %v7096_v10, %v1573_v63  ;;  %v1277_v24 = vpop.permute.xlu0 %1276  ;;  %v1543_v10 = vsel %vm1527_vm14, %v7139_v21, %v5916_v32 }
 0x44c   :  { %2077 = vmatprep.subr.mxu0 %v1578_v44 }
 0x44d   :  { %2078 = vmatpush1.msra.mxu0 %v1579_v16 }
 0x44e   :  { %v1522_v7 = vpop.permute.xlu1 %1521 }
 0x44f   :  { %v1529_v43 = vsel %vm1527_vm14, %v1522_v7, %v7119_v3  ;;  %v1530_v53 = vsel %vm1527_vm14, %v6888_v4, %v1522_v7  ;;  %v1330_v62 = vpop.permute.xlu0 %1329 }
 0x450   :  { %2079 = vmatprep.subr.mxu0 %v1529_v43 }
 0x451   :  { %2080 = vmatpush1.msra.mxu0 %v1530_v53 }
 0x452   :  { %v1575_v57 = vpop.permute.xlu1 %1574 }
 0x453   :  { %v1592_v15 = vsel %vm1576_vm12, %v1575_v57, %v5828_v42  ;;  %v1577_v55 = vsel %vm1576_vm12, %v1573_v63, %v1575_v57  ;;  %v1230_v21 = vpop.permute.xlu0 %1229 }
 0x454   :  { %2148 = vmatprep.subr.mxu1 %v1592_v15 }
 0x455   :  { %2149 = vmatpush1.msra.mxu1 %v1577_v55 }
 0x456   :  { %2150 = vmatprep.subr.mxu1 %v1543_v10  ;;  %v1475_v4 = vpop.permute.xlu1 %1474 }
 0x457   :  { %2151 = vmatpush1.msra.mxu1 %v1528_v36  ;;  %v1480_v42 = vsel %vm1478_vm15, %v7130_v17, %v1475_v4  ;;  %v1445_v17 = vsel %vm1429_vm0, %v1428_v13, %v5983_v12  ;;  %v1179_v30 = vpop.permute.xlu0 %1178 }
 0x458   :  { %2081 = vmatprep.subr.mxu0 %v1480_v42 }
 0x459   :  { %2082 = vmatpush1.msra.mxu0 %v1481_v61 }
 0x45a   :  { %v1424_v32 = vpop.permute.xlu1 %1423 }
 0x45b   :  { %v1431_v6 = vsel %vm1429_vm0, %v1424_v32, %v7150_v31  ;;  %v1432_v3 = vsel %vm1429_vm0, %v6944_v50, %v1424_v32  ;;  %v1430_v50 = vsel %vm1429_vm0, %v7150_v31, %v1428_v13  ;;  %v1232_v13 = vpop.permute.xlu0 %1231 }
 0x45c   :  { %2083 = vmatprep.subr.mxu0 %v1431_v6 }
 0x45d   :  { %2084 = vmatpush1.msra.mxu0 %v1432_v3 }
 0x45e   :  { %v1477_v40 = vpop.permute.xlu1 %1476 }
 0x45f   :  { %v1494_v22 = vsel %vm1478_vm15, %v1477_v40, %v5856_v2  ;;  %v1479_v45 = vsel %vm1478_vm15, %v1475_v4, %v1477_v40  ;;  %v1132_v16 = vpop.permute.xlu0 %1131 }
 0x460   :  { %2152 = vmatprep.subr.mxu1 %v1494_v22 }
 0x461   :  { %2153 = vmatpush1.msra.mxu1 %v1479_v45 }
 0x462   :  { %2154 = vmatprep.subr.mxu1 %v1445_v17  ;;  %v1377_v59 = vpop.permute.xlu1 %1376 }
 0x463   :  { %2155 = vmatpush1.msra.mxu1 %v1430_v50  ;;  %v1382_v2 = vsel %vm1380_vm3, %v7167_v19, %v1377_v59  ;;  %v1347_v19 = vsel %vm1331_vm4, %v1330_v62, %v6047_v38 }
 0x464   :  { %2085 = vmatprep.subr.mxu0 %v1382_v2 }
 0x465   :  { %2086 = vmatpush1.msra.mxu0 %v1383_v56 }
 0x466   :  { %v1326_v12 = vpop.permute.xlu1 %1325 }
 0x467   :  { %v1333_v51 = vsel %vm1331_vm4, %v1326_v12, %v1328_v18  ;;  %v1334_v31 = vsel %vm1331_vm4, %v7000_v20, %v1326_v12  ;;  %v1332_v20 = vsel %vm1331_vm4, %v1328_v18, %v1330_v62  ;;  %v1081_v18 = vpop.permute.xlu0 %1080 }
 0x468   :  { %2087 = vmatprep.subr.mxu0 %v1333_v51 }
 0x469   :  { %2088 = vmatpush1.msra.mxu0 %v1334_v31 }
 0x46a   :  { %v1379_v8 = vpop.permute.xlu1 %1378 }
 0x46b   :  { %v1396_v26 = vsel %vm1380_vm3, %v1379_v8, %v5906_v28  ;;  %v1381_v9 = vsel %vm1380_vm3, %v1377_v59, %v1379_v8  ;;  %v1285_v28 = vsel %vm1282_vm5, %v7026_v47, %v1277_v24  ;;  %v1134_v10 = vpop.permute.xlu0 %1133 }
 0x46c   :  { %2156 = vmatprep.subr.mxu1 %v1396_v26 }
 0x46d   :  { %2157 = vmatpush1.msra.mxu1 %v1381_v9  ;;  %v1786_v9 = vpop.f32.mrf.mxu1 }
 0x46e   :  { %2158 = vmatprep.subr.mxu1 %v1347_v19  ;;  %v1279_v63 = vpop.permute.xlu1 %1278 }
 0x46f   :  { %2159 = vmatpush1.msra.mxu1 %v1332_v20  ;;  %v1284_v44 = vsel %vm1282_vm5, %v1277_v24, %v1279_v63  ;;  %v1249_v24 = vsel %vm1233_vm6, %v1232_v13, %v6109_v41  ;;  %v1034_v42 = vpop.permute.xlu0 %1033 }
 0x470   :  { %2089 = vmatprep.subr.mxu0 %v1284_v44 }
 0x471   :  { %2090 = vmatpush1.msra.mxu0 %v1285_v28  ;;  %v10072_v28 = vld [vmem:[#allocation8_spill] sm:$0xff] }
 0x472   :  { %v1228_v7 = vpop.permute.xlu1 %1227 }
 0x473   :  { %v1235_v38 = vsel %vm1233_vm6, %v1228_v7, %v1230_v21  ;;  %v1236_v43 = vsel %vm1233_vm6, %v7050_v14, %v1228_v7  ;;  %v1234_v14 = vsel %vm1233_vm6, %v1230_v21, %v1232_v13  ;;  %v983_v21 = vpop.permute.xlu0 %982 }
 0x474   :  { %2091 = vmatprep.subr.mxu0 %v1235_v38 }
 0x475   :  { %2092 = vmatpush1.msra.mxu0 %v1236_v43 }
 0x476   :  { %v1281_v53 = vpop.permute.xlu1 %1280 }
 0x477   :  { %v1298_v57 = vsel %vm1282_vm5, %v1281_v53, %v5968_v60  ;;  %v1283_v47 = vsel %vm1282_vm5, %v1279_v63, %v1281_v53  ;;  %v1187_v60 = vsel %vm1184_vm7, %v7074_v23, %v1179_v30  ;;  %v1036_v45 = vpop.permute.xlu0 %1035  ;;  %v1788_v63 = vpop.f32.mrf.mxu1 }
 0x478   :  { %2160 = vmatprep.subr.mxu1 %v1298_v57  ;;  %v1053_v50 = vsel %vm1037_vm11, %v1036_v45, %v6235_v1 }
 0x479   :  { %2161 = vmatpush1.msra.mxu1 %v1283_v47 }
 0x47a   :  { %2162 = vmatprep.subr.mxu1 %v1249_v24  ;;  %v1181_v15 = vpop.permute.xlu1 %1180 }
 0x47b   :  { %2163 = vmatpush1.msra.mxu1 %v1234_v14  ;;  %v1186_v55 = vsel %vm1184_vm7, %v1179_v30, %v1181_v15  ;;  %v936_v56 = vpop.permute.xlu0 %935 }
 0x47c   :  { %2093 = vmatprep.subr.mxu0 %v1186_v55  ;;  %v10073_v55 = vld [vmem:[#allocation9_spill] sm:$0xff] }
 0x47d   :  { %2094 = vmatpush1.msra.mxu0 %v1187_v60 }
 0x47e   :  { %v1130_v4 = vpop.permute.xlu1 %1129 }
 0x47f   :  { %v1137_v41 = vsel %vm10070_vm8, %v1130_v4, %v1132_v16  ;;  %v1138_v36 = vsel %vm10068_vm1, %v7098_v35, %v1130_v4  ;;  %vm10071_vm8 = vmmov %vm10068_vm1  ;;  %v1136_v35 = vsel %vm10068_vm1, %v1132_v16, %v1134_v10  ;;  %v938_v31 = vpop.permute.xlu0 %937  ;;  %vm2224_vm1 = vcmp.lt.s32.totalorder %v10073_v55, 470 }
 0x480   :  { %2095 = vmatprep.subr.mxu0 %v1137_v41  ;;  %v1151_v32 = vsel %vm10071_vm8, %v1134_v10, %v6171_v54  ;;  %vm2220_vm8 = vcmp.lt.s32.totalorder %v10072_v28, 470 }
 0x481   :  { %2096 = vmatpush1.msra.mxu0 %v1138_v36 }
 0x482   :  { %v1183_v62 = vpop.permute.xlu1 %1182 }
 0x483   :  { %v1200_v61 = vsel %vm1184_vm7, %v1183_v62, %v6036_v25  ;;  %v1185_v23 = vsel %vm1184_vm7, %v1181_v15, %v1183_v62  ;;  %v1089_v25 = vsel %vm1086_vm9, %v7121_v11, %v1081_v18 }
 0x484   :  { %2164 = vmatprep.subr.mxu1 %v1200_v61 }
 0x485   :  { %2165 = vmatpush1.msra.mxu1 %v1185_v23 }
 0x486   :  { %2166 = vmatprep.subr.mxu1 %v1151_v32  ;;  %v1083_v6 = vpop.permute.xlu1 %1082 }
 0x487   :  { %2167 = vmatpush1.msra.mxu1 %v1136_v35  ;;  %v1088_v3 = vsel %vm1086_vm9, %v1081_v18, %v1083_v6 }
 0x488   :  { %2097 = vmatprep.subr.mxu0 %v1088_v3 }
 0x489   :  { %2098 = vmatpush1.msra.mxu0 %v1089_v25 }
 0x48a   :  { %v1032_v40 = vpop.permute.xlu1 %1031 }
 0x48b   :  { %v1039_v54 = vsel %vm1037_vm11, %v1032_v40, %v1034_v42  ;;  %v1040_v22 = vsel %vm1037_vm11, %v7141_v52, %v1032_v40  ;;  %v1038_v52 = vsel %vm1037_vm11, %v1034_v42, %v1036_v45 }
 0x48c   :  { %2099 = vmatprep.subr.mxu0 %v1039_v54 }
 0x48d   :  { %2100 = vmatpush1.msra.mxu0 %v1040_v22 }
 0x48e   :  { %v1085_v17 = vpop.permute.xlu1 %1084 }
 0x48f   :  { %v1102_v59 = vsel %vm1086_vm9, %v1085_v17, %v6098_v49  ;;  %v1087_v11 = vsel %vm1086_vm9, %v1083_v6, %v1085_v17  ;;  %v991_v49 = vsel %vm10058_vm2, %v7160_v39, %v983_v21 }
 0x490   :  { %2168 = vmatprep.subr.mxu1 %v1102_v59 }
 0x491   :  { %2169 = vmatpush1.msra.mxu1 %v1087_v11  ;;  %v1928_v18 = vpop.f32.mrf.mxu1 }
 0x492   :  { %2170 = vmatprep.subr.mxu1 %v1053_v50  ;;  %v985_v2 = vpop.permute.xlu1 %984 }
 0x493   :  { %2171 = vmatpush1.msra.mxu1 %v1038_v52  ;;  %v990_v30 = vsel %vm10058_vm2, %v983_v21, %v985_v2  ;;  %v1930_v47 = vpop.f32.mrf.mxu1  ;;  %v10074_v21 = vld [vmem:[#allocation10_spill] sm:$0xff] }
 0x494   :  { %2101 = vmatprep.subr.mxu0 %v990_v30 }
 0x495   :  { %2102 = vmatpush1.msra.mxu0 %v991_v49 }
 0x496   :  { %v934_v12 = vpop.permute.xlu1 %933 }
 0x497   :  { %v941_v1 = vsel %vm10057_vm13, %v934_v12, %v936_v56  ;;  %v942_v51 = vsel %vm10057_vm13, %v7174_v29, %v934_v12  ;;  %v955_v29 = vsel %vm10057_vm13, %v938_v31, %v6303_v58 }
 0x498   :  { %2103 = vmatprep.subr.mxu0 %v941_v1 }
 0x499   :  { %2104 = vmatpush1.msra.mxu0 %v942_v51 }
 0x49a   :  { %2105 = vmatprep.subr.mxu0 %v6676_v27  ;;  %v987_v13 = vpop.permute.xlu1 %986 }
 0x49b   :  { %2106 = vmatpush1.msra.mxu0 %v6407_v48  ;;  %v1004_v39 = vsel %vm10058_vm2, %v987_v13, %v6160_v34  ;;  %v989_v8 = vsel %vm10058_vm2, %v985_v2, %v987_v13  ;;  %v940_v48 = vsel %vm10057_vm13, %v936_v56, %v938_v31  ;;  %v1715_v34 = vpop.f32.mrf.mxu0  ;;  %vm2228_vm13 = vcmp.lt.s32.totalorder %v10074_v21, 470  ;;  %v10075_v56 = vld [vmem:[#allocation11_spill] sm:$0xff] }
 0x49c   :  { %2140 = vmatmul.mubr.f32.vlgmr.msra.gmra.mxu0 %v7200_v0  ;;  %2172 = vmatprep.subr.mxu1 %v1004_v39  ;;  %vm2232_vm2 = vcmp.lt.s32.totalorder %v10075_v56, 470 }
 0x49d   :  { %2173 = vmatpush1.msra.mxu1 %v989_v8  ;;  %3223 = vmatprep.mubr.f32.mxu0 %v10066_v46  ;;  %v1717_v27 = vpop.f32.mrf.mxu0 }
 0x49e   :  { %2174 = vmatprep.subr.mxu1 %v955_v29 }
 0x49f   :  { %2175 = vmatpush1.msra.mxu1 %v940_v48 }
 0x4a0   :  { %2176 = vmatprep.subr.mxu1 %v6710_v33 }
 0x4a1   :  { %2177 = vmatpush1.msra.mxu1 %v6725_v5  ;;  %v1857_v5 = vpop.f32.mrf.mxu0 }
 0x4a2   :  { %2211 = vmatmul.mubr.f32.vlgmr.msra.gmra.mxu1 %v7200_v0 }
 0x4a3   :  { %3294 = vmatprep.mubr.f32.mxu1 %v10066_v46  ;;  %v1859_v43 = vpop.f32.mrf.mxu0 }
 0x4a7   :  { %v1647_v26 = vpop.permute.xlu1 %1646 }
 0x4a8   :  { %v1716_v58 = vadd.f32 %v1715_v34, %v1647_v26  ;;  %v1718_v19 = vadd.f32 %v1717_v27, %v1647_v26  ;;  %v1787_v20 = vadd.f32 %v1786_v9, %v1647_v26  ;;  %v1789_v16 = vadd.f32 %v1788_v63, %v1647_v26 }
 0x4a9   :  { %v1858_v38 = vadd.f32 %v1857_v5, %v1647_v26  ;;  %v1860_v57 = vadd.f32 %v1859_v43, %v1647_v26  ;;  %v1929_v15 = vadd.f32 %v1928_v18, %v1647_v26  ;;  %v1931_v14 = vadd.f32 %v1930_v47, %v1647_v26 }
 0x4aa   :  { %v2281_v44 = vadd.f32 %v1718_v19, %v1716_v58  ;;  %v2268_v33 = vsel %vm2220_vm8, %v1789_v16, 0.0 }
 0x4ab   :  { %v2272_v60 = vsel %vm2224_vm1, %v1931_v14, 0.0 }
 0x4ac   :  { %v2282_v7 = vadd.f32 %v2281_v44, %v1787_v20 }
 0x4ae   :  { %v2283_v0 = vadd.f32 %v2282_v7, %v2268_v33 }
 0x4b0   :  { %v2284_v53 = vadd.f32 %v2283_v0, %v1858_v38 }
 0x4b2   :  { %v2285_v24 = vadd.f32 %v2284_v53, %v1860_v57 }
 0x4b4   :  { %v2286_v10 = vadd.f32 %v2285_v24, %v1929_v15 }
 0x4b6   :  { %v2287_v41 = vadd.f32 %v2286_v10, %v2272_v60 }
 0x500   :  { %v1999_v4 = vpop.f32.mrf.mxu0 }
 0x501   :  { %v2000_v36 = vadd.f32 %v1999_v4, %v1647_v26 }
 0x502   :  { %v2001_v42 = vpop.f32.mrf.mxu0 }
 0x503   :  { %v2288_v61 = vadd.f32 %v2287_v41, %v2000_v36  ;;  %v2002_v23 = vadd.f32 %v2001_v42, %v1647_v26 }
 0x505   :  { %v2289_v6 = vadd.f32 %v2288_v61, %v2002_v23 }
 0x509   :  { %v2070_v62 = vpop.f32.mrf.mxu1 }
 0x50a   :  { %v2071_v35 = vadd.f32 %v2070_v62, %v1647_v26 }
 0x50b   :  { %v2072_v32 = vpop.f32.mrf.mxu1 }
 0x50c   :  { %v2073_v3 = vadd.f32 %v2072_v32, %v1647_v26  ;;  %v2290_v25 = vadd.f32 %v2289_v6, %v2071_v35 }
 0x50e   :  { %v2276_v40 = vsel %vm2228_vm13, %v2073_v3, 0.0 }
 0x50f   :  { %v2291_v22 = vadd.f32 %v2290_v25, %v2276_v40 }
 0x55c   :  { %v2141_v54 = vpop.f32.mrf.mxu0 }
 0x55d   :  { %v2142_v45 = vadd.f32 %v2141_v54, %v1647_v26 }
 0x55e   :  { %v2143_v17 = vpop.f32.mrf.mxu0 }
 0x55f   :  { %v2292_v59 = vadd.f32 %v2291_v22, %v2142_v45  ;;  %v2144_v11 = vadd.f32 %v2143_v17, %v1647_v26 }
 0x561   :  { %v2293_v2 = vadd.f32 %v2292_v59, %v2144_v11 }
 0x562   :  { %v2212_v50 = vpop.f32.mrf.mxu1 }
 0x563   :  { %v2213_v52 = vadd.f32 %v2212_v50, %v1647_v26 }
 0x564   :  { %v2214_v30 = vpop.f32.mrf.mxu1 }
 0x565   :  { %v2294_v49 = vadd.f32 %v2293_v2, %v2213_v52  ;;  %v2215_v12 = vadd.f32 %v2214_v30, %v1647_v26 }
 0x567   :  { %v2280_v1 = vsel %vm2232_vm2, %v2215_v12, 0.0 }
 0x568   :  { %v2295_v51 = vadd.f32 %v2294_v49, %v2280_v1 }
 0x56a   :  { %2296 = vadd.xlane.f32.xlu0 %v2295_v51 }
 0x5f3   :  { %v2297_v31 = vpop.xlane.xlu0 %2296 }
 0x5f4   :  { %v2299_v13 = vmul.f32 0.0005319149, %v2297_v31 }
 0x5f6   :  { %v2300_v39 = vsub.f32 %v1716_v58, %v2299_v13  ;;  %v2301_v8 = vsub.f32 %v1718_v19, %v2299_v13  ;;  %v2303_v29 = vsub.f32 %v1789_v16, %v2299_v13  ;;  %v2302_v48 = vsub.f32 %v1787_v20, %v2299_v13 }
 0x5f7   :  { %v7380_v63 = vsub.f32 %v1858_v38, %v2299_v13  ;;  %v7382_v7 = vsub.f32 %v1860_v57, %v2299_v13  ;;  %v2307_v58 = vsub.f32 %v1931_v14, %v2299_v13  ;;  %v7386_v19 = vsub.f32 %v1929_v15, %v2299_v13 }
 0x5f8   :  { %v2332_v34 = vmul.f32 %v2300_v39, %v2300_v39  ;;  %v2333_v27 = vmul.f32 %v2301_v8, %v2301_v8  ;;  %v7378_v9 = vsel %vm2220_vm8, %v2303_v29, 0.0  ;;  %v2334_v26 = vmul.f32 %v2302_v48, %v2302_v48 }
 0x5f9   :  { %v2335_v33 = vmul.f32 %v7378_v9, %v7378_v9  ;;  %v2336_v20 = vmul.f32 %v7380_v63, %v7380_v63  ;;  %v2337_v0 = vmul.f32 %v7382_v7, %v7382_v7  ;;  %v7394_v43 = vsel %vm2224_vm1, %v2307_v58, 0.0 }
 0x5fa   :  { %v2348_v44 = vadd.f32 %v2333_v27, %v2332_v34  ;;  %v7396_v18 = vsub.f32 %v2000_v36, %v2299_v13  ;;  %v2338_v53 = vmul.f32 %v7386_v19, %v7386_v19  ;;  %v7400_v47 = vsub.f32 %v2002_v23, %v2299_v13 }
 0x5fb   :  { %v2339_v24 = vmul.f32 %v7394_v43, %v7394_v43  ;;  %v2311_v14 = vsub.f32 %v2073_v3, %v2299_v13  ;;  %v7404_v10 = vsub.f32 %v2071_v35, %v2299_v13  ;;  %v7414_v62 = vsub.f32 %v2142_v45, %v2299_v13 }
 0x5fc   :  { %v2349_v5 = vadd.f32 %v2348_v44, %v2334_v26  ;;  %v2340_v60 = vmul.f32 %v7396_v18, %v7396_v18  ;;  %v2341_v41 = vmul.f32 %v7400_v47, %v7400_v47  ;;  %v7418_v32 = vsub.f32 %v2144_v11, %v2299_v13 }
 0x5fd   :  { %v7412_v42 = vsel %vm2228_vm13, %v2311_v14, 0.0  ;;  %v2342_v61 = vmul.f32 %v7404_v10, %v7404_v10  ;;  %v2315_v3 = vsub.f32 %v2215_v12, %v2299_v13  ;;  %v7422_v25 = vsub.f32 %v2213_v52, %v2299_v13 }
 0x5fe   :  { %v2350_v16 = vadd.f32 %v2349_v5, %v2335_v33  ;;  %v2343_v6 = vmul.f32 %v7412_v42, %v7412_v42  ;;  %v2344_v40 = vmul.f32 %v7414_v62, %v7414_v62  ;;  %v2345_v22 = vmul.f32 %v7418_v32, %v7418_v32 }
 0x5ff   :  { %v7430_v17 = vsel %vm2232_vm2, %v2315_v3, 0.0  ;;  %v2346_v59 = vmul.f32 %v7422_v25, %v7422_v25 }
 0x600   :  { %v2351_v38 = vadd.f32 %v2350_v16, %v2336_v20  ;;  %v2347_v50 = vmul.f32 %v7430_v17, %v7430_v17 }
 0x602   :  { %v2352_v57 = vadd.f32 %v2351_v38, %v2337_v0 }
 0x604   :  { %v2353_v15 = vadd.f32 %v2352_v57, %v2338_v53 }
 0x606   :  { %v2354_v4 = vadd.f32 %v2353_v15, %v2339_v24 }
 0x608   :  { %v2355_v36 = vadd.f32 %v2354_v4, %v2340_v60 }
 0x60a   :  { %v2356_v23 = vadd.f32 %v2355_v36, %v2341_v41 }
 0x60c   :  { %v2357_v35 = vadd.f32 %v2356_v23, %v2342_v61 }
 0x60e   :  { %v2358_v54 = vadd.f32 %v2357_v35, %v2343_v6 }
 0x610   :  { %v2359_v45 = vadd.f32 %v2358_v54, %v2344_v40 }
 0x612   :  { %v2360_v11 = vadd.f32 %v2359_v45, %v2345_v22 }
 0x614   :  { %v2361_v2 = vadd.f32 %v2360_v11, %v2346_v59 }
 0x616   :  { %v2362_v52 = vadd.f32 %v2361_v2, %v2347_v50 }
 0x618   :  { %2363 = vadd.xlane.f32.xlu1 %v2362_v52 }
 0x6a1   :  { %v2364_v30 = vpop.xlane.xlu1 %2363 }
 0x6a2   :  { %v2365_v49 = vmul.f32 0.0005319149, %v2364_v30 }
 0x6a4   :  { %v2366_v12 = vadd.f32 1e-05, %v2365_v49 }
 0x6a6   :  { %5325 = vrsqrt.f32 %v2366_v12 }
 0x6b3   :  { %v7436_v1 = vpop.eup %5325 }
 0x6b4   :  { %v2370_v51 = vmul.f32 %v7436_v1, %v2302_v48  ;;  %v2369_v31 = vmul.f32 %v7436_v1, %v2301_v8  ;;  %v2368_v13 = vmul.f32 %v7436_v1, %v2300_v39  ;;  %v2372_v39 = vmul.f32 %v7436_v1, %v7380_v63 }
 0x6b5   :  { %v2371_v8 = vmul.f32 %v7436_v1, %v7378_v9  ;;  %v2373_v59 = vmul.f32 %v7436_v1, %v7382_v7  ;;  %v2374_v49 = vmul.f32 %v7436_v1, %v7386_v19 }
 0x6b6   :  { %vm2386_vm2 = vcmp.ge.f32.partialorder %v2370_v51, 0.0  ;;  %v2402_v29 = vmul.f32 0.2, %v2370_v51  ;;  %vm2385_vm13 = vcmp.ge.f32.partialorder %v2369_v31, 0.0  ;;  %v2401_v34 = vmul.f32 0.2, %v2369_v31 }
 0x6b7   :  { %v2400_v44 = vmul.f32 0.2, %v2368_v13  ;;  %vm2384_vm8 = vcmp.ge.f32.partialorder %v2368_v13, 0.0  ;;  %v2404_v33 = vmul.f32 0.2, %v2372_v39  ;;  %vm2388_vm1 = vcmp.ge.f32.partialorder %v2372_v39, 0.0 }
 0x6b8   :  { %v7441_v27 = vsel %vm2386_vm2, %v2370_v51, %v2402_v29  ;;  %v7443_v26 = vsel %vm2385_vm13, %v2369_v31, %v2401_v34  ;;  %v2403_v5 = vmul.f32 0.2, %v2371_v8  ;;  %vm2387_vm2 = vcmp.ge.f32.partialorder %v2371_v8, 0.0 }
 0x6b9   :  { %3108 = vrot.lane.b32.xlu1 %v7441_v27, %s5379_s0  ;;  %3106 = vrot.lane.b32.xlu0 %v7443_v26, %s5379_s0  ;;  %v7449_v48 = vsel %vm2384_vm8, %v2368_v13, %v2400_v44  ;;  %v7463_v63 = vsel %vm2388_vm1, %v2372_v39, %v2404_v33  ;;  %v2405_v30 = vmul.f32 0.2, %v2373_v59  ;;  %vm2389_vm13 = vcmp.ge.f32.partialorder %v2373_v59, 0.0 }
 0x6ba   :  { %v7465_v58 = vsel %vm2387_vm2, %v2371_v8, %v2403_v5  ;;  %v2375_v34 = vmul.f32 %v7436_v1, %v7394_v43  ;;  %v2406_v19 = vmul.f32 0.2, %v2374_v49  ;;  %vm2390_vm8 = vcmp.ge.f32.partialorder %v2374_v49, 0.0 }
 0x6bb   :  { %v7651_v31 = vsel %vm2389_vm13, %v2373_v59, %v2405_v30  ;;  %v2376_v5 = vmul.f32 %v7436_v1, %v7396_v18  ;;  %vm10076_vm13 = vcmp.lt.s32.totalorder %v5604_v37, 123 }
 0x6bc   :  { %v2407_v33 = vmul.f32 0.2, %v2375_v34  ;;  %v7668_v43 = vsel %vm2390_vm8, %v2374_v49, %v2406_v19  ;;  %vm2391_vm1 = vcmp.ge.f32.partialorder %v2375_v34, 0.0  ;;  %vm10077_vm8 = vmmov %vm10076_vm13 }
 0x6bd   :  { %3058 = vrot.lane.b32.xlu1 %v7443_v26, %s5380_s29  ;;  %3104 = vrot.lane.b32.xlu0 %v7449_v48, %s5379_s0  ;;  %vm2392_vm2 = vcmp.ge.f32.partialorder %v2376_v5, 0.0 }
 0x6c1   :  { %3056 = vrot.lane.b32.xlu1 %v7449_v48, %s5380_s29  ;;  %3060 = vrot.lane.b32.xlu0 %v7441_v27, %s5380_s29 }
 0x6c5   :  { %3112 = vrot.lane.b32.xlu1 %v7463_v63, %s5379_s0  ;;  %3110 = vrot.lane.b32.xlu0 %v7465_v58, %s5379_s0 }
 0x6c9   :  { %3012 = vrot.lane.b32.xlu1 %v7441_v27, %s5382_s15  ;;  %3010 = vrot.lane.b32.xlu0 %v7443_v26, %s5382_s15 }
 0x6cd   :  { %3062 = vrot.lane.b32.xlu1 %v7465_v58, %s5380_s29  ;;  %3008 = vrot.lane.b32.xlu0 %v7449_v48, %s5382_s15 }
 0x6d1   :  { %2962 = vrot.lane.b32.xlu1 %v7443_v26, %s5381_s30  ;;  %3064 = vrot.lane.b32.xlu0 %v7463_v63, %s5380_s29 }
 0x6d5   :  { %2960 = vrot.lane.b32.xlu1 %v7449_v48, %s5381_s30  ;;  %2964 = vrot.lane.b32.xlu0 %v7441_v27, %s5381_s30 }
 0x6d9   :  { %3016 = vrot.lane.b32.xlu1 %v7463_v63, %s5382_s15  ;;  %3014 = vrot.lane.b32.xlu0 %v7465_v58, %s5382_s15 }
 0x6dd   :  { %2916 = vrot.lane.b32.xlu1 %v7441_v27, %s5383_s16  ;;  %2914 = vrot.lane.b32.xlu0 %v7443_v26, %s5383_s16 }
 0x6e1   :  { %2966 = vrot.lane.b32.xlu1 %v7465_v58, %s5381_s30  ;;  %2912 = vrot.lane.b32.xlu0 %v7449_v48, %s5383_s16 }
 0x6e5   :  { %2866 = vrot.lane.b32.xlu1 %v7443_v26, %s5384_s17  ;;  %2968 = vrot.lane.b32.xlu0 %v7463_v63, %s5381_s30 }
 0x6e9   :  { %2864 = vrot.lane.b32.xlu1 %v7449_v48, %s5384_s17  ;;  %2868 = vrot.lane.b32.xlu0 %v7441_v27, %s5384_s17 }
 0x6ed   :  { %2920 = vrot.lane.b32.xlu1 %v7463_v63, %s5383_s16  ;;  %2918 = vrot.lane.b32.xlu0 %v7465_v58, %s5383_s16 }
 0x6f1   :  { %2820 = vrot.lane.b32.xlu1 %v7441_v27, %s5385_s18  ;;  %2818 = vrot.lane.b32.xlu0 %v7443_v26, %s5385_s18 }
 0x6f5   :  { %2870 = vrot.lane.b32.xlu1 %v7465_v58, %s5384_s17  ;;  %2816 = vrot.lane.b32.xlu0 %v7449_v48, %s5385_s18 }
 0x6f9   :  { %2770 = vrot.lane.b32.xlu1 %v7443_v26, %s5386_s2  ;;  %2872 = vrot.lane.b32.xlu0 %v7463_v63, %s5384_s17 }
 0x6fd   :  { %2768 = vrot.lane.b32.xlu1 %v7449_v48, %s5386_s2  ;;  %2772 = vrot.lane.b32.xlu0 %v7441_v27, %s5386_s2 }
 0x701   :  { %2824 = vrot.lane.b32.xlu1 %v7463_v63, %s5385_s18  ;;  %2822 = vrot.lane.b32.xlu0 %v7465_v58, %s5385_s18 }
 0x705   :  { %2724 = vrot.lane.b32.xlu1 %v7441_v27, %s5387_s19  ;;  %2722 = vrot.lane.b32.xlu0 %v7443_v26, %s5387_s19 }
 0x709   :  { %2774 = vrot.lane.b32.xlu1 %v7465_v58, %s5386_s2  ;;  %2720 = vrot.lane.b32.xlu0 %v7449_v48, %s5387_s19 }
 0x70d   :  { %2674 = vrot.lane.b32.xlu1 %v7443_v26, %s5388_s20  ;;  %2776 = vrot.lane.b32.xlu0 %v7463_v63, %s5386_s2 }
 0x711   :  { %2672 = vrot.lane.b32.xlu1 %v7449_v48, %s5388_s20  ;;  %2676 = vrot.lane.b32.xlu0 %v7441_v27, %s5388_s20 }
 0x715   :  { %2728 = vrot.lane.b32.xlu1 %v7463_v63, %s5387_s19  ;;  %2726 = vrot.lane.b32.xlu0 %v7465_v58, %s5387_s19 }
 0x719   :  { %2628 = vrot.lane.b32.xlu1 %v7441_v27, %s5389_s1  ;;  %2626 = vrot.lane.b32.xlu0 %v7443_v26, %s5389_s1 }
 0x71d   :  { %2678 = vrot.lane.b32.xlu1 %v7465_v58, %s5388_s20  ;;  %2624 = vrot.lane.b32.xlu0 %v7449_v48, %s5389_s1 }
 0x721   :  { %2578 = vrot.lane.b32.xlu1 %v7443_v26, %s5390_s21  ;;  %2680 = vrot.lane.b32.xlu0 %v7463_v63, %s5388_s20 }
 0x725   :  { %2576 = vrot.lane.b32.xlu1 %v7449_v48, %s5390_s21  ;;  %2580 = vrot.lane.b32.xlu0 %v7441_v27, %s5390_s21 }
 0x729   :  { %2632 = vrot.lane.b32.xlu1 %v7463_v63, %s5389_s1  ;;  %2630 = vrot.lane.b32.xlu0 %v7465_v58, %s5389_s1 }
 0x72b   :  { %v3109_v9 = vpop.permute.xlu1 %3108  ;;  %v3107_v20 = vpop.permute.xlu0 %3106 }
 0x72c   :  { %v3149_v16 = vsel %vm1625_vm10, %v3107_v20, %v3109_v9 }
 0x72d   :  { %3159 = vmatprep.subr.mxu0 %v3149_v16  ;;  %2532 = vrot.lane.b32.xlu1 %v7441_v27, %s5391_s22  ;;  %v7676_v16 = vsel %vm2391_vm1, %v2375_v34, %v2407_v33  ;;  %vm10078_vm1 = vmmov %vm10077_vm8 }
 0x72e   :  { %2530 = vrot.lane.b32.xlu0 %v7443_v26, %s5391_s22 }
 0x72f   :  { %v3059_v0 = vpop.permute.xlu1 %3058  ;;  %v7577_v38 = vpop.permute.xlu0 %3104 }
 0x730   :  { %v3150_v53 = vsel %vm1625_vm10, %v7577_v38, %v3107_v20 }
 0x731   :  { %2582 = vrot.lane.b32.xlu1 %v7465_v58, %s5390_s21  ;;  %3160 = vmatpush1.msra.mxu0 %v3150_v53  ;;  %v2408_v53 = vmul.f32 0.2, %v2376_v5 }
 0x732   :  { %2528 = vrot.lane.b32.xlu0 %v7449_v48, %s5391_s22 }
 0x733   :  { %v7586_v57 = vpop.permute.xlu1 %3056  ;;  %v3061_v24 = vpop.permute.xlu0 %3060 }
 0x734   :  { %v3101_v15 = vsel %vm1576_vm12, %v3059_v0, %v3061_v24  ;;  %v3102_v14 = vsel %vm1576_vm12, %v7586_v57, %v3059_v0 }
 0x735   :  { %2482 = vrot.lane.b32.xlu1 %v7443_v26, %s5392_s23  ;;  %3161 = vmatprep.subr.mxu0 %v3101_v15 }
 0x736   :  { %2584 = vrot.lane.b32.xlu0 %v7463_v63, %s5390_s21  ;;  %3162 = vmatpush1.msra.mxu0 %v3102_v14  ;;  %v7692_v14 = vsel %vm2392_vm2, %v2376_v5, %v2408_v53  ;;  %vm10079_vm2 = vmmov %vm10078_vm1 }
 0x737   :  { %v7597_v60 = vpop.permute.xlu1 %3112  ;;  %v3111_v4 = vpop.permute.xlu0 %3110 }
 0x738   :  { %v3147_v41 = vsel %vm1625_vm10, %v3111_v4, %v7597_v60  ;;  %v3148_v36 = vsel %vm1625_vm10, %v3109_v9, %v3111_v4 }
 0x739   :  { %2480 = vrot.lane.b32.xlu1 %v7449_v48, %s5392_s23  ;;  %3230 = vmatprep.subr.mxu1 %v3147_v41 }
 0x73a   :  { %2484 = vrot.lane.b32.xlu0 %v7441_v27, %s5392_s23  ;;  %3231 = vmatpush1.msra.mxu1 %v3148_v36 }
 0x73b   :  { %v3013_v61 = vpop.permute.xlu1 %3012  ;;  %v3011_v23 = vpop.permute.xlu0 %3010 }
 0x73c   :  { %v3053_v6 = vsel %vm1527_vm14, %v3011_v23, %v3013_v61 }
 0x73d   :  { %2536 = vrot.lane.b32.xlu1 %v7463_v63, %s5391_s22  ;;  %3163 = vmatprep.subr.mxu0 %v3053_v6 }
 0x73e   :  { %2534 = vrot.lane.b32.xlu0 %v7465_v58, %s5391_s22 }
 0x73f   :  { %v3063_v35 = vpop.permute.xlu1 %3062  ;;  %v7614_v3 = vpop.permute.xlu0 %3008 }
 0x740   :  { %v3054_v40 = vsel %vm1527_vm14, %v7614_v3, %v3011_v23  ;;  %v3100_v11 = vsel %vm1576_vm12, %v3061_v24, %v3063_v35 }
 0x741   :  { %2436 = vrot.lane.b32.xlu1 %v7441_v27, %s5393_s24  ;;  %3164 = vmatpush1.msra.mxu0 %v3054_v40 }
 0x742   :  { %2434 = vrot.lane.b32.xlu0 %v7443_v26, %s5393_s24 }
 0x743   :  { %v2963_v54 = vpop.permute.xlu1 %2962  ;;  %v7623_v22 = vpop.permute.xlu0 %3064 }
 0x744   :  { %v3099_v45 = vsel %vm1576_vm12, %v3063_v35, %v7623_v22 }
 0x745   :  { %2486 = vrot.lane.b32.xlu1 %v7465_v58, %s5392_s23  ;;  %3232 = vmatprep.subr.mxu1 %v3099_v45 }
 0x746   :  { %2432 = vrot.lane.b32.xlu0 %v7449_v48, %s5393_s24  ;;  %3233 = vmatpush1.msra.mxu1 %v3100_v11 }
 0x747   :  { %v7636_v50 = vpop.permute.xlu1 %2960  ;;  %v2965_v2 = vpop.permute.xlu0 %2964 }
 0x748   :  { %v3005_v52 = vsel %vm1478_vm15, %v2963_v54, %v2965_v2  ;;  %v3006_v7 = vsel %vm1478_vm15, %v7636_v50, %v2963_v54 }
 0x749   :  { %2438 = vrot.lane.b32.xlu1 %v7465_v58, %s5393_s24  ;;  %3165 = vmatprep.subr.mxu0 %v3005_v52 }
 0x74a   :  { %2488 = vrot.lane.b32.xlu0 %v7463_v63, %s5392_s23  ;;  %3166 = vmatpush1.msra.mxu0 %v3006_v7 }
 0x74b   :  { %v7649_v12 = vpop.permute.xlu1 %3016  ;;  %v3015_v51 = vpop.permute.xlu0 %3014 }
 0x74c   :  { %v3051_v13 = vsel %vm1527_vm14, %v3015_v51, %v7649_v12  ;;  %v3052_v29 = vsel %vm1527_vm14, %v3013_v61, %v3015_v51 }
 0x74d   :  { %3114 = vrot.lane.b32.xlu1 %v7651_v31, %s5379_s0  ;;  %3234 = vmatprep.subr.mxu1 %v3051_v13 }
 0x74e   :  { %2440 = vrot.lane.b32.xlu0 %v7463_v63, %s5393_s24  ;;  %3235 = vmatpush1.msra.mxu1 %v3052_v29 }
 0x74f   :  { %v2917_v44 = vpop.permute.xlu1 %2916  ;;  %v2915_v39 = vpop.permute.xlu0 %2914 }
 0x750   :  { %v2957_v8 = vsel %vm1429_vm0, %v2915_v39, %v2917_v44 }
 0x751   :  { %3066 = vrot.lane.b32.xlu1 %v7651_v31, %s5380_s29  ;;  %3167 = vmatprep.subr.mxu0 %v2957_v8 }
 0x752   :  { %3116 = vrot.lane.b32.xlu0 %v7668_v43, %s5379_s0 }
 0x753   :  { %v2967_v9 = vpop.permute.xlu1 %2966  ;;  %v7674_v20 = vpop.permute.xlu0 %2912 }
 0x754   :  { %v2958_v0 = vsel %vm1429_vm0, %v7674_v20, %v2915_v39  ;;  %v3004_v4 = vsel %vm1478_vm15, %v2965_v2, %v2967_v9 }
 0x755   :  { %3118 = vrot.lane.b32.xlu1 %v7676_v16, %s5379_s0  ;;  %3168 = vmatpush1.msra.mxu0 %v2958_v0 }
 0x756   :  { %3068 = vrot.lane.b32.xlu0 %v7668_v43, %s5380_s29 }
 0x757   :  { %v2867_v18 = vpop.permute.xlu1 %2866  ;;  %v7685_v24 = vpop.permute.xlu0 %2968 }
 0x758   :  { %v3003_v15 = vsel %vm1478_vm15, %v2967_v9, %v7685_v24 }
 0x759   :  { %3018 = vrot.lane.b32.xlu1 %v7651_v31, %s5382_s15  ;;  %3236 = vmatprep.subr.mxu1 %v3003_v15 }
 0x75a   :  { %3120 = vrot.lane.b32.xlu0 %v7692_v14, %s5379_s0  ;;  %3237 = vmatpush1.msra.mxu1 %v3004_v4 }
 0x75b   :  { %v7698_v41 = vpop.permute.xlu1 %2864  ;;  %v2869_v36 = vpop.permute.xlu0 %2868 }
 0x75c   :  { %v2909_v61 = vsel %vm1380_vm3, %v2867_v18, %v2869_v36  ;;  %v2910_v23 = vsel %vm1380_vm3, %v7698_v41, %v2867_v18 }
 0x75d   :  { %3070 = vrot.lane.b32.xlu1 %v7676_v16, %s5380_s29  ;;  %3169 = vmatprep.subr.mxu0 %v2909_v61 }
 0x75e   :  { %3020 = vrot.lane.b32.xlu0 %v7668_v43, %s5382_s15  ;;  %3170 = vmatpush1.msra.mxu0 %v2910_v23 }
 0x75f   :  { %v7709_v6 = vpop.permute.xlu1 %2920  ;;  %v2919_v35 = vpop.permute.xlu0 %2918 }
 0x760   :  { %v2955_v40 = vsel %vm1429_vm0, %v2919_v35, %v7709_v6  ;;  %v2956_v54 = vsel %vm1429_vm0, %v2917_v44, %v2919_v35 }
 0x761   :  { %2970 = vrot.lane.b32.xlu1 %v7651_v31, %s5381_s30  ;;  %3238 = vmatprep.subr.mxu1 %v2955_v40 }
 0x762   :  { %3072 = vrot.lane.b32.xlu0 %v7692_v14, %s5380_s29  ;;  %3239 = vmatpush1.msra.mxu1 %v2956_v54 }
 0x763   :  { %v2821_v45 = vpop.permute.xlu1 %2820  ;;  %v2819_v59 = vpop.permute.xlu0 %2818 }
 0x764   :  { %v2861_v11 = vsel %vm1331_vm4, %v2819_v59, %v2821_v45 }
 0x765   :  { %3022 = vrot.lane.b32.xlu1 %v7676_v16, %s5382_s15  ;;  %3171 = vmatprep.subr.mxu0 %v2861_v11 }
 0x766   :  { %2972 = vrot.lane.b32.xlu0 %v7668_v43, %s5381_s30 }
 0x767   :  { %v2871_v2 = vpop.permute.xlu1 %2870  ;;  %v7726_v52 = vpop.permute.xlu0 %2816 }
 0x768   :  { %v2862_v7 = vsel %vm1331_vm4, %v7726_v52, %v2819_v59  ;;  %v2908_v13 = vsel %vm1380_vm3, %v2869_v36, %v2871_v2 }
 0x769   :  { %2922 = vrot.lane.b32.xlu1 %v7651_v31, %s5383_s16  ;;  %3172 = vmatpush1.msra.mxu0 %v2862_v7 }
 0x76a   :  { %3024 = vrot.lane.b32.xlu0 %v7692_v14, %s5382_s15 }
 0x76b   :  { %v2771_v30 = vpop.permute.xlu1 %2770  ;;  %v7735_v49 = vpop.permute.xlu0 %2872 }
 0x76c   :  { %v2907_v51 = vsel %vm1380_vm3, %v2871_v2, %v7735_v49 }
 0x76d   :  { %2974 = vrot.lane.b32.xlu1 %v7676_v16, %s5381_s30  ;;  %3240 = vmatprep.subr.mxu1 %v2907_v51 }
 0x76e   :  { %2924 = vrot.lane.b32.xlu0 %v7668_v43, %s5383_s16  ;;  %3241 = vmatpush1.msra.mxu1 %v2908_v13 }
 0x76f   :  { %v7746_v29 = vpop.permute.xlu1 %2768  ;;  %v2773_v34 = vpop.permute.xlu0 %2772 }
 0x770   :  { %v2813_v19 = vsel %vm1282_vm5, %v2771_v30, %v2773_v34  ;;  %v2814_v44 = vsel %vm1282_vm5, %v7746_v29, %v2771_v30 }
 0x771   :  { %2874 = vrot.lane.b32.xlu1 %v7651_v31, %s5384_s17  ;;  %3173 = vmatprep.subr.mxu0 %v2813_v19 }
 0x772   :  { %2976 = vrot.lane.b32.xlu0 %v7692_v14, %s5381_s30  ;;  %3174 = vmatpush1.msra.mxu0 %v2814_v44 }
 0x773   :  { %v7757_v39 = vpop.permute.xlu1 %2824  ;;  %v2823_v8 = vpop.permute.xlu0 %2822 }
 0x774   :  { %v2859_v33 = vsel %vm1331_vm4, %v2823_v8, %v7757_v39  ;;  %v2860_v5 = vsel %vm1331_vm4, %v2821_v45, %v2823_v8 }
 0x775   :  { %2926 = vrot.lane.b32.xlu1 %v7676_v16, %s5383_s16  ;;  %3242 = vmatprep.subr.mxu1 %v2859_v33 }
 0x776   :  { %2876 = vrot.lane.b32.xlu0 %v7668_v43, %s5384_s17  ;;  %3243 = vmatpush1.msra.mxu1 %v2860_v5 }
 0x777   :  { %v2725_v9 = vpop.permute.xlu1 %2724  ;;  %v2723_v0 = vpop.permute.xlu0 %2722 }
 0x778   :  { %v2765_v53 = vsel %vm1233_vm6, %v2723_v0, %v2725_v9 }
 0x779   :  { %2826 = vrot.lane.b32.xlu1 %v7651_v31, %s5385_s18  ;;  %3175 = vmatprep.subr.mxu0 %v2765_v53 }
 0x77a   :  { %2928 = vrot.lane.b32.xlu0 %v7692_v14, %s5383_s16 }
 0x77b   :  { %v2775_v18 = vpop.permute.xlu1 %2774  ;;  %v7774_v15 = vpop.permute.xlu0 %2720 }
 0x77c   :  { %v2766_v4 = vsel %vm1233_vm6, %v7774_v15, %v2723_v0  ;;  %v2812_v35 = vsel %vm1282_vm5, %v2773_v34, %v2775_v18 }
 0x77d   :  { %2878 = vrot.lane.b32.xlu1 %v7676_v16, %s5384_s17  ;;  %3176 = vmatpush1.msra.mxu0 %v2766_v4 }
 0x77e   :  { %2828 = vrot.lane.b32.xlu0 %v7668_v43, %s5385_s18 }
 0x77f   :  { %v2675_v36 = vpop.permute.xlu1 %2674  ;;  %v7783_v61 = vpop.permute.xlu0 %2776 }
 0x780   :  { %v2811_v23 = vsel %vm1282_vm5, %v2775_v18, %v7783_v61 }
 0x781   :  { %2778 = vrot.lane.b32.xlu1 %v7651_v31, %s5386_s2  ;;  %3244 = vmatprep.subr.mxu1 %v2811_v23 }
 0x782   :  { %2880 = vrot.lane.b32.xlu0 %v7692_v14, %s5384_s17  ;;  %3245 = vmatpush1.msra.mxu1 %v2812_v35 }
 0x783   :  { %v7794_v40 = vpop.permute.xlu1 %2672  ;;  %v2677_v54 = vpop.permute.xlu0 %2676 }
 0x784   :  { %v2717_v45 = vsel %vm1184_vm7, %v2675_v36, %v2677_v54  ;;  %v2718_v59 = vsel %vm1184_vm7, %v7794_v40, %v2675_v36 }
 0x785   :  { %2830 = vrot.lane.b32.xlu1 %v7676_v16, %s5385_s18  ;;  %3177 = vmatprep.subr.mxu0 %v2717_v45 }
 0x786   :  { %2780 = vrot.lane.b32.xlu0 %v7668_v43, %s5386_s2  ;;  %3178 = vmatpush1.msra.mxu0 %v2718_v59 }
 0x787   :  { %v7805_v11 = vpop.permute.xlu1 %2728  ;;  %v2727_v2 = vpop.permute.xlu0 %2726 }
 0x788   :  { %v2763_v7 = vsel %vm1233_vm6, %v2727_v2, %v7805_v11  ;;  %v2764_v30 = vsel %vm1233_vm6, %v2725_v9, %v2727_v2 }
 0x789   :  { %2730 = vrot.lane.b32.xlu1 %v7651_v31, %s5387_s19  ;;  %3246 = vmatprep.subr.mxu1 %v2763_v7 }
 0x78a   :  { %2832 = vrot.lane.b32.xlu0 %v7692_v14, %s5385_s18  ;;  %3247 = vmatpush1.msra.mxu1 %v2764_v30 }
 0x78b   :  { %v2629_v51 = vpop.permute.xlu1 %2628  ;;  %v2627_v13 = vpop.permute.xlu0 %2626 }
 0x78c   :  { %v2669_v34 = vsel %vm10076_vm13, %v2627_v13, %v2629_v51  ;;  %vm10080_vm13 = vcmp.lt.s32.totalorder %v5604_v37, 126 }
 0x78d   :  { %2782 = vrot.lane.b32.xlu1 %v7676_v16, %s5386_s2  ;;  %3179 = vmatprep.subr.mxu0 %v2669_v34 }
 0x78e   :  { %2732 = vrot.lane.b32.xlu0 %v7668_v43, %s5387_s19 }
 0x78f   :  { %v2679_v19 = vpop.permute.xlu1 %2678  ;;  %v7822_v44 = vpop.permute.xlu0 %2624 }
 0x790   :  { %v2670_v8 = vsel %vm10077_vm8, %v7822_v44, %v2627_v13  ;;  %v2716_v0 = vsel %vm1184_vm7, %v2677_v54, %v2679_v19  ;;  %vm10081_vm8 = vmmov %vm10080_vm13 }
 0x791   :  { %2682 = vrot.lane.b32.xlu1 %v7651_v31, %s5388_s20  ;;  %3180 = vmatpush1.msra.mxu0 %v2670_v8 }
 0x792   :  { %2784 = vrot.lane.b32.xlu0 %v7692_v14, %s5386_s2 }
 0x793   :  { %v2579_v33 = vpop.permute.xlu1 %2578  ;;  %v7831_v5 = vpop.permute.xlu0 %2680 }
 0x794   :  { %v2715_v9 = vsel %vm1184_vm7, %v2679_v19, %v7831_v5 }
 0x795   :  { %2734 = vrot.lane.b32.xlu1 %v7676_v16, %s5387_s19  ;;  %3248 = vmatprep.subr.mxu1 %v2715_v9 }
 0x796   :  { %2684 = vrot.lane.b32.xlu0 %v7668_v43, %s5388_s20  ;;  %3249 = vmatpush1.msra.mxu1 %v2716_v0 }
 0x797   :  { %v7842_v53 = vpop.permute.xlu1 %2576  ;;  %v2581_v18 = vpop.permute.xlu0 %2580 }
 0x798   :  { %v2621_v4 = vsel %vm1086_vm9, %v2579_v33, %v2581_v18  ;;  %v2622_v36 = vsel %vm1086_vm9, %v7842_v53, %v2579_v33 }
 0x799   :  { %2634 = vrot.lane.b32.xlu1 %v7651_v31, %s5389_s1  ;;  %3181 = vmatprep.subr.mxu0 %v2621_v4 }
 0x79a   :  { %2736 = vrot.lane.b32.xlu0 %v7692_v14, %s5387_s19  ;;  %3182 = vmatpush1.msra.mxu0 %v2622_v36 }
 0x79b   :  { %v7853_v23 = vpop.permute.xlu1 %2632  ;;  %v2631_v35 = vpop.permute.xlu0 %2630 }
 0x79c   :  { %v2667_v54 = vsel %vm10078_vm1, %v2631_v35, %v7853_v23  ;;  %v2668_v45 = vsel %vm10079_vm2, %v2629_v51, %v2631_v35  ;;  %vm10082_vm1 = vcmp.lt.s32.totalorder %v5604_v37, 127 }
 0x79d   :  { %2686 = vrot.lane.b32.xlu1 %v7676_v16, %s5388_s20  ;;  %3250 = vmatprep.subr.mxu1 %v2667_v54  ;;  %vm10083_vm2 = vmmov %vm10082_vm1 }
 0x79e   :  { %2636 = vrot.lane.b32.xlu0 %v7668_v43, %s5389_s1  ;;  %3251 = vmatpush1.msra.mxu1 %v2668_v45 }
 0x79f   :  { %v2533_v59 = vpop.permute.xlu1 %2532 }
 0x7a0   :  { %v2531_v2 = vpop.permute.xlu0 %2530 }
 0x7a1   :  { %2586 = vrot.lane.b32.xlu1 %v7651_v31, %s5390_s21  ;;  %v2573_v7 = vsel %vm1037_vm11, %v2531_v2, %v2533_v59 }
 0x7a2   :  { %2688 = vrot.lane.b32.xlu0 %v7692_v14, %s5388_s20  ;;  %3183 = vmatprep.subr.mxu0 %v2573_v7 }
 0x7a3   :  { %v2583_v30 = vpop.permute.xlu1 %2582 }
 0x7a4   :  { %v7870_v51 = vpop.permute.xlu0 %2528  ;;  %v2620_v33 = vsel %vm1086_vm9, %v2581_v18, %v2583_v30 }
 0x7a5   :  { %2638 = vrot.lane.b32.xlu1 %v7676_v16, %s5389_s1  ;;  %v2574_v13 = vsel %vm1037_vm11, %v7870_v51, %v2531_v2 }
 0x7a6   :  { %2588 = vrot.lane.b32.xlu0 %v7668_v43, %s5390_s21  ;;  %3184 = vmatpush1.msra.mxu0 %v2574_v13 }
 0x7a7   :  { %v2483_v34 = vpop.permute.xlu1 %2482 }
 0x7a8   :  { %v7879_v19 = vpop.permute.xlu0 %2584 }
 0x7a9   :  { %2538 = vrot.lane.b32.xlu1 %v7651_v31, %s5391_s22  ;;  %v2619_v8 = vsel %vm1086_vm9, %v2583_v30, %v7879_v19 }
 0x7aa   :  { %2640 = vrot.lane.b32.xlu0 %v7692_v14, %s5389_s1  ;;  %3252 = vmatprep.subr.mxu1 %v2619_v8  ;;  %v7930_v8 = vld [vmem:[%s10036_s5] sm:$0xff] }
 0x7ab   :  { %3253 = vmatpush1.msra.mxu1 %v2620_v33  ;;  %v7890_v9 = vpop.permute.xlu1 %2480 }
 0x7ac   :  { %v2485_v0 = vpop.permute.xlu0 %2484  ;;  %v2526_v4 = vsel %vm10080_vm13, %v7890_v9, %v2483_v34  ;;  %vm10084_vm13 = vmmov %vm10081_vm8 }
 0x7ad   :  { %2590 = vrot.lane.b32.xlu1 %v7676_v16, %s5390_s21  ;;  %v2525_v36 = vsel %vm10081_vm8, %v2483_v34, %v2485_v0 }
 0x7ae   :  { %2540 = vrot.lane.b32.xlu0 %v7668_v43, %s5391_s22  ;;  %3185 = vmatprep.subr.mxu0 %v2525_v36  ;;  %v2377_v36 = vmul.f32 %v7436_v1, %v7400_v47 }
 0x7af   :  { %3186 = vmatpush1.msra.mxu0 %v2526_v4  ;;  %v7901_v18 = vpop.permute.xlu1 %2536 }
 0x7b0   :  { %v2535_v35 = vpop.permute.xlu0 %2534 }
 0x7b1   :  { %2490 = vrot.lane.b32.xlu1 %v7651_v31, %s5392_s23  ;;  %v2571_v54 = vsel %vm1037_vm11, %v2535_v35, %v7901_v18  ;;  %v2572_v45 = vsel %vm1037_vm11, %v2533_v59, %v2535_v35 }
 0x7b2   :  { %2592 = vrot.lane.b32.xlu0 %v7692_v14, %s5390_s21  ;;  %3254 = vmatprep.subr.mxu1 %v2571_v54  ;;  %v2409_v54 = vmul.f32 0.2, %v2377_v36 }
 0x7b3   :  { %3255 = vmatpush1.msra.mxu1 %v2572_v45  ;;  %v2437_v2 = vpop.permute.xlu1 %2436 }
 0x7b4   :  { %v2435_v7 = vpop.permute.xlu0 %2434 }
 0x7b5   :  { %2542 = vrot.lane.b32.xlu1 %v7676_v16, %s5391_s22  ;;  %v2477_v30 = vsel %vm10082_vm1, %v2435_v7, %v2437_v2 }
 0x7b6   :  { %2492 = vrot.lane.b32.xlu0 %v7668_v43, %s5392_s23  ;;  %3187 = vmatprep.subr.mxu0 %v2477_v30 }
 0x7b7   :  { %v2487_v13 = vpop.permute.xlu1 %2486 }
 0x7b8   :  { %v7918_v34 = vpop.permute.xlu0 %2432 }
 0x7b9   :  { %2442 = vrot.lane.b32.xlu1 %v7651_v31, %s5393_s24  ;;  %v2478_v59 = vsel %vm10083_vm2, %v7918_v34, %v2435_v7  ;;  %vm2393_vm2 = vcmp.ge.f32.partialorder %v2377_v36, 0.0  ;;  %v2378_v7 = vmul.f32 %v7436_v1, %v7404_v10 }
 0x7ba   :  { %2544 = vrot.lane.b32.xlu0 %v7692_v14, %s5391_s22  ;;  %3188 = vmatpush1.msra.mxu0 %v2478_v59  ;;  %v7963_v59 = vsel %vm2393_vm2, %v2377_v36, %v2409_v54 }
 0x7bb   :  { %3189 = vmatprep.subr.mxu0 %v7443_v26  ;;  %v2439_v33 = vpop.permute.xlu1 %2438  ;;  %v2524_v26 = vsel %vm10081_vm8, %v2485_v0, %v2487_v13  ;;  %vm2394_vm8 = vcmp.ge.f32.partialorder %v2378_v7, 0.0 }
 0x7bc   :  { %3190 = vmatpush1.msra.mxu0 %v7449_v48  ;;  %v7934_v4 = vpop.permute.xlu0 %2488 }
 0x7bd   :  { %2494 = vrot.lane.b32.xlu1 %v7676_v16, %s5392_s23  ;;  %v2523_v35 = vsel %vm10084_vm13, %v2487_v13, %v7934_v4  ;;  %3224 = vmatmul.mubr.f32.vlgmr.msra.gmra.mxu0 %v7930_v8  ;;  %vm10085_vm13 = vmmov %vm10082_vm1 }
 0x7be   :  { %2444 = vrot.lane.b32.xlu0 %v7668_v43, %s5393_s24  ;;  %3256 = vmatprep.subr.mxu1 %v2523_v35  ;;  %v2476_v0 = vsel %vm10085_vm13, %v2437_v2, %v2439_v33  ;;  %v2379_v35 = vmul.f32 %v7436_v1, %v7412_v42  ;;  %vm10086_vm13 = vcmp.lt.s32.totalorder %v5604_v37, 123 }
 0x7bf   :  { %3257 = vmatpush1.msra.mxu1 %v2524_v26  ;;  %v3115_v48 = vpop.permute.xlu1 %3114  ;;  %3365 = vmatprep.mubr.f32.mxu0 %v10066_v46  ;;  %v2410_v26 = vmul.f32 0.2, %v2378_v7 }
 0x7c0   :  { %v7949_v47 = vpop.permute.xlu0 %2440  ;;  %v2411_v2 = vmul.f32 0.2, %v2379_v35 }
 0x7c1   :  { %2446 = vrot.lane.b32.xlu1 %v7676_v16, %s5393_s24  ;;  %v2475_v45 = vsel %vm10082_vm1, %v2439_v33, %v7949_v47  ;;  %v7981_v33 = vsel %vm2394_vm8, %v2378_v7, %v2410_v26  ;;  %vm2395_vm1 = vcmp.ge.f32.partialorder %v2379_v35, 0.0  ;;  %vm10087_vm8 = vmmov %vm10086_vm13 }
 0x7c2   :  { %2496 = vrot.lane.b32.xlu0 %v7692_v14, %s5392_s23  ;;  %3258 = vmatprep.subr.mxu1 %v2475_v45  ;;  %v7994_v7 = vsel %vm2395_vm1, %v2379_v35, %v2411_v2  ;;  %vm10088_vm1 = vmmov %vm10087_vm8 }
 0x7c3   :  { %3259 = vmatpush1.msra.mxu1 %v2476_v0  ;;  %v3067_v30 = vpop.permute.xlu1 %3066 }
 0x7c4   :  { %3260 = vmatprep.subr.mxu1 %v7465_v58  ;;  %v3117_v13 = vpop.permute.xlu0 %3116  ;;  %v3146_v58 = vsel %vm1625_vm10, %v7597_v60, %v3115_v48  ;;  %v2380_v60 = vmul.f32 %v7436_v1, %v7414_v62 }
 0x7c5   :  { %3261 = vmatpush1.msra.mxu1 %v7441_v27  ;;  %3122 = vrot.lane.b32.xlu1 %v7963_v59, %s5379_s0  ;;  %v3145_v10 = vsel %vm1625_vm10, %v3115_v48, %v3117_v13  ;;  %v3098_v48 = vsel %vm1576_vm12, %v7623_v22, %v3067_v30 }
 0x7c6   :  { %2448 = vrot.lane.b32.xlu0 %v7692_v14, %s5393_s24  ;;  %3301 = vmatprep.subr.mxu0 %v3145_v10  ;;  %v2412_v0 = vmul.f32 0.2, %v2380_v60  ;;  %vm2396_vm2 = vcmp.ge.f32.partialorder %v2380_v60, 0.0 }
 0x7c7   :  { %3302 = vmatpush1.msra.mxu0 %v3146_v58  ;;  %v3119_v42 = vpop.permute.xlu1 %3118  ;;  %3295 = vmatmul.mubr.f32.vlgmr.msra.gmra.mxu1 %v7930_v8 }
 0x7c8   :  { %v3069_v27 = vpop.permute.xlu0 %3068  ;;  %3436 = vmatprep.mubr.f32.mxu1 %v10066_v46  ;;  %v3144_v22 = vsel %vm1625_vm10, %v3117_v13, %v3119_v42  ;;  %v8007_v10 = vsel %vm2396_vm2, %v2380_v60, %v2412_v0  ;;  %vm10089_vm2 = vmmov %vm10088_vm1 }
 0x7c9   :  { %3074 = vrot.lane.b32.xlu1 %v7963_v59, %s5380_s29  ;;  %v3097_v36 = vsel %vm1576_vm12, %v3067_v30, %v3069_v27 }
 0x7ca   :  { %3124 = vrot.lane.b32.xlu0 %v7981_v33, %s5379_s0  ;;  %3303 = vmatprep.subr.mxu0 %v3097_v36 }
 0x7cb   :  { %3304 = vmatpush1.msra.mxu0 %v3098_v48  ;;  %v3019_v54 = vpop.permute.xlu1 %3018 }
 0x7cc   :  { %v7992_v45 = vpop.permute.xlu0 %3120  ;;  %v3050_v13 = vsel %vm1527_vm14, %v7649_v12, %v3019_v54 }
 0x7cd   :  { %3126 = vrot.lane.b32.xlu1 %v7994_v7, %s5379_s0  ;;  %v3143_v62 = vsel %vm1625_vm10, %v3119_v42, %v7992_v45 }
 0x7ce   :  { %3076 = vrot.lane.b32.xlu0 %v7981_v33, %s5380_s29  ;;  %3372 = vmatprep.subr.mxu1 %v3143_v62 }
 0x7cf   :  { %3373 = vmatpush1.msra.mxu1 %v3144_v22  ;;  %v3071_v30 = vpop.permute.xlu1 %3070 }
 0x7d0   :  { %v3021_v35 = vpop.permute.xlu0 %3020  ;;  %v3096_v36 = vsel %vm1576_vm12, %v3069_v27, %v3071_v30 }
 0x7d1   :  { %3026 = vrot.lane.b32.xlu1 %v7963_v59, %s5382_s15  ;;  %v3049_v26 = vsel %vm1527_vm14, %v3019_v54, %v3021_v35 }
 0x7d2   :  { %3128 = vrot.lane.b32.xlu0 %v8007_v10, %s5379_s0  ;;  %3305 = vmatprep.subr.mxu0 %v3049_v26 }
 0x7d3   :  { %3306 = vmatpush1.msra.mxu0 %v3050_v13  ;;  %v2971_v58 = vpop.permute.xlu1 %2970 }
 0x7d4   :  { %v8016_v42 = vpop.permute.xlu0 %3072  ;;  %v3002_v54 = vsel %vm1478_vm15, %v7685_v24, %v2971_v58 }
 0x7d5   :  { %3078 = vrot.lane.b32.xlu1 %v7994_v7, %s5380_s29  ;;  %v3095_v2 = vsel %vm1576_vm12, %v3071_v30, %v8016_v42 }
 0x7d6   :  { %3028 = vrot.lane.b32.xlu0 %v7981_v33, %s5382_s15  ;;  %3374 = vmatprep.subr.mxu1 %v3095_v2 }
 0x7d7   :  { %3375 = vmatpush1.msra.mxu1 %v3096_v36  ;;  %v3023_v12 = vpop.permute.xlu1 %3022 }
 0x7d8   :  { %v2973_v60 = vpop.permute.xlu0 %2972  ;;  %v3048_v22 = vsel %vm1527_vm14, %v3021_v35, %v3023_v12 }
 0x7d9   :  { %2978 = vrot.lane.b32.xlu1 %v7963_v59, %s5381_s30  ;;  %v3001_v48 = vsel %vm1478_vm15, %v2971_v58, %v2973_v60 }
 0x7da   :  { %3080 = vrot.lane.b32.xlu0 %v8007_v10, %s5380_s29  ;;  %3307 = vmatprep.subr.mxu0 %v3001_v48 }
 0x7db   :  { %3308 = vmatpush1.msra.mxu0 %v3002_v54  ;;  %v2923_v62 = vpop.permute.xlu1 %2922 }
 0x7dc   :  { %v8036_v27 = vpop.permute.xlu0 %3024  ;;  %v2954_v13 = vsel %vm1429_vm0, %v7709_v6, %v2923_v62 }
 0x7dd   :  { %3030 = vrot.lane.b32.xlu1 %v7994_v7, %s5382_s15  ;;  %v3047_v0 = vsel %vm1527_vm14, %v3023_v12, %v8036_v27 }
 0x7de   :  { %2980 = vrot.lane.b32.xlu0 %v7981_v33, %s5381_s30  ;;  %3376 = vmatprep.subr.mxu1 %v3047_v0 }
 0x7df   :  { %3377 = vmatpush1.msra.mxu1 %v3048_v22  ;;  %v2975_v24 = vpop.permute.xlu1 %2974 }
 0x7e0   :  { %v2925_v30 = vpop.permute.xlu0 %2924  ;;  %v3000_v36 = vsel %vm1478_vm15, %v2973_v60, %v2975_v24 }
 0x7e1   :  { %2930 = vrot.lane.b32.xlu1 %v7963_v59, %s5383_s16  ;;  %v2953_v26 = vsel %vm1429_vm0, %v2923_v62, %v2925_v30 }
 0x7e2   :  { %3032 = vrot.lane.b32.xlu0 %v8007_v10, %s5382_s15  ;;  %3309 = vmatprep.subr.mxu0 %v2953_v26 }
 0x7e3   :  { %3310 = vmatpush1.msra.mxu0 %v2954_v13  ;;  %v2875_v58 = vpop.permute.xlu1 %2874 }
 0x7e4   :  { %v8056_v35 = vpop.permute.xlu0 %2976  ;;  %v2906_v54 = vsel %vm1380_vm3, %v7735_v49, %v2875_v58 }
 0x7e5   :  { %2982 = vrot.lane.b32.xlu1 %v7994_v7, %s5381_s30  ;;  %v2999_v2 = vsel %vm1478_vm15, %v2975_v24, %v8056_v35 }
 0x7e6   :  { %2932 = vrot.lane.b32.xlu0 %v7981_v33, %s5383_s16  ;;  %3378 = vmatprep.subr.mxu1 %v2999_v2 }
 0x7e7   :  { %3379 = vmatpush1.msra.mxu1 %v3000_v36  ;;  %v2927_v6 = vpop.permute.xlu1 %2926 }
 0x7e8   :  { %v2877_v12 = vpop.permute.xlu0 %2876  ;;  %v2952_v22 = vsel %vm1429_vm0, %v2925_v30, %v2927_v6 }
 0x7e9   :  { %2882 = vrot.lane.b32.xlu1 %v7963_v59, %s5384_s17  ;;  %v2905_v48 = vsel %vm1380_vm3, %v2875_v58, %v2877_v12 }
 0x7ea   :  { %2984 = vrot.lane.b32.xlu0 %v8007_v10, %s5381_s30  ;;  %3311 = vmatprep.subr.mxu0 %v2905_v48 }
 0x7eb   :  { %3312 = vmatpush1.msra.mxu0 %v2906_v54  ;;  %v2827_v62 = vpop.permute.xlu1 %2826 }
 0x7ec   :  { %v8076_v60 = vpop.permute.xlu0 %2928  ;;  %v2858_v13 = vsel %vm1331_vm4, %v7757_v39, %v2827_v62 }
 0x7ed   :  { %2934 = vrot.lane.b32.xlu1 %v7994_v7, %s5383_s16  ;;  %v2951_v0 = vsel %vm1429_vm0, %v2927_v6, %v8076_v60 }
 0x7ee   :  { %2884 = vrot.lane.b32.xlu0 %v7981_v33, %s5384_s17  ;;  %3380 = vmatprep.subr.mxu1 %v2951_v0 }
 0x7ef   :  { %3381 = vmatpush1.msra.mxu1 %v2952_v22  ;;  %v2879_v49 = vpop.permute.xlu1 %2878 }
 0x7f0   :  { %v2829_v24 = vpop.permute.xlu0 %2828  ;;  %v2904_v36 = vsel %vm1380_vm3, %v2877_v12, %v2879_v49 }
 0x7f1   :  { %2834 = vrot.lane.b32.xlu1 %v7963_v59, %s5385_s18  ;;  %v2857_v26 = vsel %vm1331_vm4, %v2827_v62, %v2829_v24 }
 0x7f2   :  { %2936 = vrot.lane.b32.xlu0 %v8007_v10, %s5383_s16  ;;  %3313 = vmatprep.subr.mxu0 %v2857_v26 }
 0x7f3   :  { %3314 = vmatpush1.msra.mxu0 %v2858_v13  ;;  %v2779_v58 = vpop.permute.xlu1 %2778 }
 0x7f4   :  { %v8096_v30 = vpop.permute.xlu0 %2880  ;;  %v2810_v54 = vsel %vm1282_vm5, %v7783_v61, %v2779_v58 }
 0x7f5   :  { %2886 = vrot.lane.b32.xlu1 %v7994_v7, %s5384_s17  ;;  %v2903_v2 = vsel %vm1380_vm3, %v2879_v49, %v8096_v30 }
 0x7f6   :  { %2836 = vrot.lane.b32.xlu0 %v7981_v33, %s5385_s18  ;;  %3382 = vmatprep.subr.mxu1 %v2903_v2 }
 0x7f7   :  { %3383 = vmatpush1.msra.mxu1 %v2904_v36  ;;  %v2831_v39 = vpop.permute.xlu1 %2830 }
 0x7f8   :  { %v2781_v6 = vpop.permute.xlu0 %2780  ;;  %v2856_v22 = vsel %vm1331_vm4, %v2829_v24, %v2831_v39 }
 0x7f9   :  { %2786 = vrot.lane.b32.xlu1 %v7963_v59, %s5386_s2  ;;  %v2809_v48 = vsel %vm1282_vm5, %v2779_v58, %v2781_v6 }
 0x7fa   :  { %2888 = vrot.lane.b32.xlu0 %v8007_v10, %s5384_s17  ;;  %3315 = vmatprep.subr.mxu0 %v2809_v48 }
 0x7fb   :  { %3316 = vmatpush1.msra.mxu0 %v2810_v54  ;;  %v2731_v62 = vpop.permute.xlu1 %2730 }
 0x7fc   :  { %v8116_v12 = vpop.permute.xlu0 %2832  ;;  %v2762_v13 = vsel %vm1233_vm6, %v7805_v11, %v2731_v62 }
 0x7fd   :  { %2838 = vrot.lane.b32.xlu1 %v7994_v7, %s5385_s18  ;;  %v2855_v0 = vsel %vm1331_vm4, %v2831_v39, %v8116_v12 }
 0x7fe   :  { %2788 = vrot.lane.b32.xlu0 %v7981_v33, %s5386_s2  ;;  %3384 = vmatprep.subr.mxu1 %v2855_v0 }
 0x7ff   :  { %3385 = vmatpush1.msra.mxu1 %v2856_v22  ;;  %v2783_v61 = vpop.permute.xlu1 %2782 }
 0x800   :  { %v2733_v49 = vpop.permute.xlu0 %2732  ;;  %v2808_v36 = vsel %vm1282_vm5, %v2781_v6, %v2783_v61 }
 0x801   :  { %2738 = vrot.lane.b32.xlu1 %v7963_v59, %s5387_s19  ;;  %v2761_v26 = vsel %vm1233_vm6, %v2731_v62, %v2733_v49 }
 0x802   :  { %2840 = vrot.lane.b32.xlu0 %v8007_v10, %s5385_s18  ;;  %3317 = vmatprep.subr.mxu0 %v2761_v26 }
 0x803   :  { %3318 = vmatpush1.msra.mxu0 %v2762_v13  ;;  %v2683_v58 = vpop.permute.xlu1 %2682 }
 0x804   :  { %v8136_v24 = vpop.permute.xlu0 %2784  ;;  %v2714_v54 = vsel %vm1184_vm7, %v7831_v5, %v2683_v58 }
 0x805   :  { %2790 = vrot.lane.b32.xlu1 %v7994_v7, %s5386_s2  ;;  %v2807_v2 = vsel %vm1282_vm5, %v2783_v61, %v8136_v24 }
 0x806   :  { %2740 = vrot.lane.b32.xlu0 %v7981_v33, %s5387_s19  ;;  %3386 = vmatprep.subr.mxu1 %v2807_v2 }
 0x807   :  { %3387 = vmatpush1.msra.mxu1 %v2808_v36  ;;  %v2735_v11 = vpop.permute.xlu1 %2734 }
 0x808   :  { %v2685_v39 = vpop.permute.xlu0 %2684  ;;  %v2760_v22 = vsel %vm1233_vm6, %v2733_v49, %v2735_v11 }
 0x809   :  { %2690 = vrot.lane.b32.xlu1 %v7963_v59, %s5388_s20  ;;  %v2713_v48 = vsel %vm1184_vm7, %v2683_v58, %v2685_v39 }
 0x80a   :  { %2792 = vrot.lane.b32.xlu0 %v8007_v10, %s5386_s2  ;;  %3319 = vmatprep.subr.mxu0 %v2713_v48 }
 0x80b   :  { %3320 = vmatpush1.msra.mxu0 %v2714_v54  ;;  %v2635_v62 = vpop.permute.xlu1 %2634 }
 0x80c   :  { %v8156_v6 = vpop.permute.xlu0 %2736  ;;  %v2666_v13 = vsel %vm10087_vm8, %v7853_v23, %v2635_v62 }
 0x80d   :  { %2742 = vrot.lane.b32.xlu1 %v7994_v7, %s5387_s19  ;;  %v2759_v0 = vsel %vm1233_vm6, %v2735_v11, %v8156_v6 }
 0x80e   :  { %2692 = vrot.lane.b32.xlu0 %v7981_v33, %s5388_s20  ;;  %3388 = vmatprep.subr.mxu1 %v2759_v0 }
 0x80f   :  { %3389 = vmatpush1.msra.mxu1 %v2760_v22  ;;  %v2687_v5 = vpop.permute.xlu1 %2686 }
 0x810   :  { %v2637_v61 = vpop.permute.xlu0 %2636  ;;  %v2712_v36 = vsel %vm1184_vm7, %v2685_v39, %v2687_v5 }
 0x811   :  { %2642 = vrot.lane.b32.xlu1 %v7963_v59, %s5389_s1  ;;  %v2665_v26 = vsel %vm10086_vm13, %v2635_v62, %v2637_v61  ;;  %vm10090_vm13 = vcmp.lt.s32.totalorder %v5604_v37, 126 }
 0x812   :  { %2744 = vrot.lane.b32.xlu0 %v8007_v10, %s5387_s19  ;;  %3321 = vmatprep.subr.mxu0 %v2665_v26  ;;  %vm10091_vm8 = vmmov %vm10090_vm13 }
 0x813   :  { %3322 = vmatpush1.msra.mxu0 %v2666_v13  ;;  %v2587_v58 = vpop.permute.xlu1 %2586 }
 0x814   :  { %v8176_v49 = vpop.permute.xlu0 %2688  ;;  %v2618_v54 = vsel %vm1086_vm9, %v7879_v19, %v2587_v58 }
 0x815   :  { %2694 = vrot.lane.b32.xlu1 %v7994_v7, %s5388_s20  ;;  %v2711_v2 = vsel %vm1184_vm7, %v2687_v5, %v8176_v49 }
 0x816   :  { %2644 = vrot.lane.b32.xlu0 %v7981_v33, %s5389_s1  ;;  %3390 = vmatprep.subr.mxu1 %v2711_v2 }
 0x817   :  { %3391 = vmatpush1.msra.mxu1 %v2712_v36  ;;  %v2639_v23 = vpop.permute.xlu1 %2638 }
 0x818   :  { %v2589_v11 = vpop.permute.xlu0 %2588  ;;  %v2664_v22 = vsel %vm10089_vm2, %v2637_v61, %v2639_v23 }
 0x819   :  { %2594 = vrot.lane.b32.xlu1 %v7963_v59, %s5390_s21  ;;  %v2617_v48 = vsel %vm1086_vm9, %v2587_v58, %v2589_v11 }
 0x81a   :  { %2696 = vrot.lane.b32.xlu0 %v8007_v10, %s5388_s20  ;;  %3323 = vmatprep.subr.mxu0 %v2617_v48 }
 0x81b   :  { %3324 = vmatpush1.msra.mxu0 %v2618_v54  ;;  %v2539_v62 = vpop.permute.xlu1 %2538 }
 0x81c   :  { %v8196_v39 = vpop.permute.xlu0 %2640  ;;  %v2570_v13 = vsel %vm1037_vm11, %v7901_v18, %v2539_v62 }
 0x81d   :  { %2646 = vrot.lane.b32.xlu1 %v7994_v7, %s5389_s1  ;;  %v2663_v0 = vsel %vm10088_vm1, %v2639_v23, %v8196_v39  ;;  %vm10092_vm1 = vcmp.lt.s32.totalorder %v5604_v37, 127 }
 0x81e   :  { %2596 = vrot.lane.b32.xlu0 %v7981_v33, %s5390_s21  ;;  %3392 = vmatprep.subr.mxu1 %v2663_v0  ;;  %vm10093_vm2 = vmmov %vm10092_vm1 }
 0x81f   :  { %3393 = vmatpush1.msra.mxu1 %v2664_v22  ;;  %v2591_v19 = vpop.permute.xlu1 %2590 }
 0x820   :  { %v2541_v5 = vpop.permute.xlu0 %2540  ;;  %v2616_v36 = vsel %vm1086_vm9, %v2589_v11, %v2591_v19 }
 0x821   :  { %2546 = vrot.lane.b32.xlu1 %v7963_v59, %s5391_s22  ;;  %v2569_v26 = vsel %vm1037_vm11, %v2539_v62, %v2541_v5 }
 0x822   :  { %2648 = vrot.lane.b32.xlu0 %v8007_v10, %s5389_s1  ;;  %3325 = vmatprep.subr.mxu0 %v2569_v26 }
 0x823   :  { %3326 = vmatpush1.msra.mxu0 %v2570_v13  ;;  %v2491_v58 = vpop.permute.xlu1 %2490 }
 0x824   :  { %v8216_v61 = vpop.permute.xlu0 %2592  ;;  %v2522_v54 = vsel %vm10091_vm8, %v7934_v4, %v2491_v58 }
 0x825   :  { %2598 = vrot.lane.b32.xlu1 %v7994_v7, %s5390_s21  ;;  %v2615_v2 = vsel %vm1086_vm9, %v2591_v19, %v8216_v61 }
 0x826   :  { %2548 = vrot.lane.b32.xlu0 %v7981_v33, %s5391_s22  ;;  %3394 = vmatprep.subr.mxu1 %v2615_v2  ;;  %v2381_v2 = vmul.f32 %v7436_v1, %v7418_v32 }
 0x827   :  { %3395 = vmatpush1.msra.mxu1 %v2616_v36  ;;  %v2543_v18 = vpop.permute.xlu1 %2542 }
 0x828   :  { %v2493_v23 = vpop.permute.xlu0 %2492  ;;  %v2568_v22 = vsel %vm1037_vm11, %v2541_v5, %v2543_v18 }
 0x829   :  { %2498 = vrot.lane.b32.xlu1 %v7963_v59, %s5392_s23  ;;  %v2521_v48 = vsel %vm10090_vm13, %v2491_v58, %v2493_v23  ;;  %vm10094_vm13 = vmmov %vm10091_vm8 }
 0x82a   :  { %2600 = vrot.lane.b32.xlu0 %v8007_v10, %s5390_s21  ;;  %3327 = vmatprep.subr.mxu0 %v2521_v48 }
 0x82b   :  { %3328 = vmatpush1.msra.mxu0 %v2522_v54  ;;  %v2443_v62 = vpop.permute.xlu1 %2442 }
 0x82c   :  { %v8236_v11 = vpop.permute.xlu0 %2544  ;;  %v2474_v13 = vsel %vm10093_vm2, %v7949_v47, %v2443_v62  ;;  %vm2397_vm2 = vcmp.ge.f32.partialorder %v2381_v2, 0.0 }
 0x82d   :  { %2550 = vrot.lane.b32.xlu1 %v7994_v7, %s5391_s22  ;;  %v2567_v0 = vsel %vm1037_vm11, %v2543_v18, %v8236_v11 }
 0x82e   :  { %2500 = vrot.lane.b32.xlu0 %v7981_v33, %s5392_s23  ;;  %3396 = vmatprep.subr.mxu1 %v2567_v0 }
 0x82f   :  { %3397 = vmatpush1.msra.mxu1 %v2568_v22  ;;  %v2495_v4 = vpop.permute.xlu1 %2494  ;;  %v2383_v22 = vmul.f32 %v7436_v1, %v7430_v17 }
 0x830   :  { %v2445_v19 = vpop.permute.xlu0 %2444 }
 0x831   :  { %2450 = vrot.lane.b32.xlu1 %v7963_v59, %s5393_s24  ;;  %v2473_v26 = vsel %vm10092_vm1, %v2443_v62, %v2445_v19 }
 0x832   :  { %2552 = vrot.lane.b32.xlu0 %v8007_v10, %s5391_s22  ;;  %3329 = vmatprep.subr.mxu0 %v2473_v26 }
 0x833   :  { %3330 = vmatpush1.msra.mxu0 %v2474_v13  ;;  %v2447_v58 = vpop.permute.xlu1 %2446 }
 0x834   :  { %3331 = vmatprep.subr.mxu0 %v7651_v31  ;;  %v8257_v5 = vpop.permute.xlu0 %2496  ;;  %v2520_v31 = vsel %vm10091_vm8, %v2493_v23, %v2495_v4  ;;  %v2382_v23 = vmul.f32 %v7436_v1, %v7422_v25 }
 0x835   :  { %3332 = vmatpush1.msra.mxu0 %v7463_v63  ;;  %2502 = vrot.lane.b32.xlu1 %v7994_v7, %s5392_s23  ;;  %v2519_v36 = vsel %vm10094_vm13, %v2495_v4, %v8257_v5  ;;  %v2413_v63 = vmul.f32 0.2, %v2381_v2  ;;  %vm10095_vm13 = vmmov %vm10092_vm1 }
 0x836   :  { %2452 = vrot.lane.b32.xlu0 %v7981_v33, %s5393_s24  ;;  %3398 = vmatprep.subr.mxu1 %v2519_v36  ;;  %v2472_v48 = vsel %vm10095_vm13, %v2445_v19, %v2447_v58  ;;  %v2414_v4 = vmul.f32 0.2, %v2382_v23  ;;  %vm2398_vm8 = vcmp.ge.f32.partialorder %v2382_v23, 0.0 }
 0x837   :  { %3399 = vmatpush1.msra.mxu1 %v2520_v31  ;;  %v3123_v47 = vpop.permute.xlu1 %3122  ;;  %3366 = vmatmul.mubr.f32.vlgmr.msra.gmra.mxu0 %v7930_v8  ;;  %v8287_v0 = vsel %vm2397_vm2, %v2381_v2, %v2413_v63  ;;  %vm10096_vm2 = vcmp.lt.s32.totalorder %v5604_v37, 123 }
 0x838   :  { %v8272_v32 = vpop.permute.xlu0 %2448  ;;  %3507 = vmatprep.mubr.f32.mxu0 %v10066_v46  ;;  %v8305_v19 = vsel %vm2398_vm8, %v2382_v23, %v2414_v4  ;;  %vm10097_vm13 = vmmov %vm10096_vm2 }
 0x839   :  { %2454 = vrot.lane.b32.xlu1 %v7994_v7, %s5393_s24  ;;  %v2471_v18 = vsel %vm10092_vm1, %v2447_v58, %v8272_v32  ;;  %vm2399_vm1 = vcmp.ge.f32.partialorder %v2383_v22, 0.0  ;;  %vm10098_vm8 = vmmov %vm10096_vm2 }
 0x83a   :  { %2504 = vrot.lane.b32.xlu0 %v8007_v10, %s5392_s23  ;;  %3400 = vmatprep.subr.mxu1 %v2471_v18 }
 0x83b   :  { %3401 = vmatpush1.msra.mxu1 %v2472_v48  ;;  %v3075_v54 = vpop.permute.xlu1 %3074 }
 0x83c   :  { %3402 = vmatprep.subr.mxu1 %v7676_v16  ;;  %v3125_v62 = vpop.permute.xlu0 %3124  ;;  %v3142_v16 = vsel %vm1625_vm10, %v7992_v45, %v3123_v47 }
 0x83d   :  { %3403 = vmatpush1.msra.mxu1 %v7668_v43  ;;  %3130 = vrot.lane.b32.xlu1 %v8287_v0, %s5379_s0  ;;  %v3141_v25 = vsel %vm1625_vm10, %v3123_v47, %v3125_v62  ;;  %v2415_v43 = vmul.f32 0.2, %v2383_v22 }
 0x83e   :  { %2456 = vrot.lane.b32.xlu0 %v8007_v10, %s5393_s24  ;;  %3443 = vmatprep.subr.mxu0 %v3141_v25 }
 0x83f   :  { %3444 = vmatpush1.msra.mxu0 %v3142_v16  ;;  %v3127_v17 = vpop.permute.xlu1 %3126  ;;  %3437 = vmatmul.mubr.f32.vlgmr.msra.gmra.mxu1 %v7930_v8  ;;  %v3094_v8 = vsel %vm1576_vm12, %v8016_v42, %v3075_v54  ;;  %v8316_v58 = vsel %vm2399_vm1, %v2383_v22, %v2415_v43  ;;  %vm10099_vm1 = vmmov %vm10096_vm2 }
 0x840   :  { %v3077_v1 = vpop.permute.xlu0 %3076  ;;  %3578 = vmatprep.mubr.f32.mxu1 %v10066_v46  ;;  %v3140_v42 = vsel %vm1625_vm10, %v3125_v62, %v3127_v17 }
 0x841   :  { %3082 = vrot.lane.b32.xlu1 %v8287_v0, %s5380_s29  ;;  %v3093_v26 = vsel %vm1576_vm12, %v3075_v54, %v3077_v1 }
 0x842   :  { %3132 = vrot.lane.b32.xlu0 %v8305_v19, %s5379_s0  ;;  %3445 = vmatprep.subr.mxu0 %v3093_v26 }
 0x843   :  { %3446 = vmatpush1.msra.mxu0 %v3094_v8  ;;  %v3027_v45 = vpop.permute.xlu1 %3026 }
 0x844   :  { %v8314_v13 = vpop.permute.xlu0 %3128  ;;  %v3046_v63 = vsel %vm1527_vm14, %v8036_v27, %v3027_v45 }
 0x845   :  { %3134 = vrot.lane.b32.xlu1 %v8316_v58, %s5379_s0  ;;  %v3139_v2 = vsel %vm1625_vm10, %v3127_v17, %v8314_v13 }
 0x846   :  { %3084 = vrot.lane.b32.xlu0 %v8305_v19, %s5380_s29  ;;  %3514 = vmatprep.subr.mxu1 %v3139_v2 }
 0x847   :  { %3515 = vmatpush1.msra.mxu1 %v3140_v42  ;;  %v3079_v36 = vpop.permute.xlu1 %3078 }
 0x848   :  { %v3029_v31 = vpop.permute.xlu0 %3028  ;;  %v3092_v54 = vsel %vm1576_vm12, %v3077_v1, %v3079_v36 }
 0x849   :  { %3036 = vrot.lane.b32.xlu1 %v8305_v19, %s5382_s15  ;;  %v3045_v47 = vsel %vm1527_vm14, %v3027_v45, %v3029_v31 }
 0x84a   :  { %3034 = vrot.lane.b32.xlu0 %v8287_v0, %s5382_s15  ;;  %3447 = vmatprep.subr.mxu0 %v3045_v47 }
 0x84b   :  { %3448 = vmatpush1.msra.mxu0 %v3046_v63  ;;  %v2979_v18 = vpop.permute.xlu1 %2978 }
 0x84c   :  { %v8336_v23 = vpop.permute.xlu0 %3080  ;;  %v2998_v25 = vsel %vm1478_vm15, %v8056_v35, %v2979_v18 }
 0x84d   :  { %2986 = vrot.lane.b32.xlu1 %v8287_v0, %s5381_s30  ;;  %v3091_v48 = vsel %vm1576_vm12, %v3079_v36, %v8336_v23 }
 0x84e   :  { %3086 = vrot.lane.b32.xlu0 %v8316_v58, %s5380_s29  ;;  %3516 = vmatprep.subr.mxu1 %v3091_v48 }
 0x84f   :  { %3517 = vmatpush1.msra.mxu1 %v3092_v54  ;;  %v3031_v27 = vpop.permute.xlu1 %3030 }
 0x850   :  { %v2981_v62 = vpop.permute.xlu0 %2980  ;;  %v3044_v1 = vsel %vm1527_vm14, %v3029_v31, %v3031_v27 }
 0x851   :  { %3038 = vrot.lane.b32.xlu1 %v8316_v58, %s5382_s15  ;;  %v2997_v22 = vsel %vm1478_vm15, %v2979_v18, %v2981_v62 }
 0x852   :  { %2988 = vrot.lane.b32.xlu0 %v8305_v19, %s5381_s30  ;;  %3449 = vmatprep.subr.mxu0 %v2997_v22 }
 0x853   :  { %3450 = vmatpush1.msra.mxu0 %v2998_v25  ;;  %v2931_v4 = vpop.permute.xlu1 %2930 }
 0x854   :  { %v8356_v16 = vpop.permute.xlu0 %3032  ;;  %v2950_v8 = vsel %vm1429_vm0, %v8076_v60, %v2931_v4 }
 0x855   :  { %2940 = vrot.lane.b32.xlu1 %v8305_v19, %s5383_s16  ;;  %v3043_v17 = vsel %vm1527_vm14, %v3031_v27, %v8356_v16 }
 0x856   :  { %2938 = vrot.lane.b32.xlu0 %v8287_v0, %s5383_s16  ;;  %3518 = vmatprep.subr.mxu1 %v3043_v17 }
 0x857   :  { %3519 = vmatpush1.msra.mxu1 %v3044_v1  ;;  %v2983_v35 = vpop.permute.xlu1 %2982 }
 0x858   :  { %v2933_v43 = vpop.permute.xlu0 %2932  ;;  %v2996_v36 = vsel %vm1478_vm15, %v2981_v62, %v2983_v35 }
 0x859   :  { %2890 = vrot.lane.b32.xlu1 %v8287_v0, %s5384_s17  ;;  %v2949_v26 = vsel %vm1429_vm0, %v2931_v4, %v2933_v43 }
 0x85a   :  { %2990 = vrot.lane.b32.xlu0 %v8316_v58, %s5381_s30  ;;  %3451 = vmatprep.subr.mxu0 %v2949_v26 }
 0x85b   :  { %3452 = vmatpush1.msra.mxu0 %v2950_v8  ;;  %v2883_v45 = vpop.permute.xlu1 %2882 }
 0x85c   :  { %v8376_v2 = vpop.permute.xlu0 %2984  ;;  %v2902_v63 = vsel %vm1380_vm3, %v8096_v30, %v2883_v45 }
 0x85d   :  { %2942 = vrot.lane.b32.xlu1 %v8316_v58, %s5383_s16  ;;  %v2995_v42 = vsel %vm1478_vm15, %v2983_v35, %v8376_v2 }
 0x85e   :  { %2892 = vrot.lane.b32.xlu0 %v8305_v19, %s5384_s17  ;;  %3520 = vmatprep.subr.mxu1 %v2995_v42 }
 0x85f   :  { %3521 = vmatpush1.msra.mxu1 %v2996_v36  ;;  %v2935_v60 = vpop.permute.xlu1 %2934 }
 0x860   :  { %v2885_v31 = vpop.permute.xlu0 %2884  ;;  %v2948_v27 = vsel %vm1429_vm0, %v2933_v43, %v2935_v60 }
 0x861   :  { %2844 = vrot.lane.b32.xlu1 %v8305_v19, %s5385_s18  ;;  %v2901_v47 = vsel %vm1380_vm3, %v2883_v45, %v2885_v31 }
 0x862   :  { %2842 = vrot.lane.b32.xlu0 %v8287_v0, %s5385_s18  ;;  %3453 = vmatprep.subr.mxu0 %v2901_v47 }
 0x863   :  { %3454 = vmatpush1.msra.mxu0 %v2902_v63  ;;  %v2835_v18 = vpop.permute.xlu1 %2834 }
 0x864   :  { %v8396_v48 = vpop.permute.xlu0 %2936  ;;  %v2854_v25 = vsel %vm1331_vm4, %v8116_v12, %v2835_v18 }
 0x865   :  { %2794 = vrot.lane.b32.xlu1 %v8287_v0, %s5386_s2  ;;  %v2947_v54 = vsel %vm1429_vm0, %v2935_v60, %v8396_v48 }
 0x866   :  { %2894 = vrot.lane.b32.xlu0 %v8316_v58, %s5384_s17  ;;  %3522 = vmatprep.subr.mxu1 %v2947_v54 }
 0x867   :  { %3523 = vmatpush1.msra.mxu1 %v2948_v27  ;;  %v2887_v30 = vpop.permute.xlu1 %2886 }
 0x868   :  { %v2837_v62 = vpop.permute.xlu0 %2836  ;;  %v2900_v35 = vsel %vm1380_vm3, %v2885_v31, %v2887_v30 }
 0x869   :  { %2846 = vrot.lane.b32.xlu1 %v8316_v58, %s5385_s18  ;;  %v2853_v22 = vsel %vm1331_vm4, %v2835_v18, %v2837_v62 }
 0x86a   :  { %2796 = vrot.lane.b32.xlu0 %v8305_v19, %s5386_s2  ;;  %3455 = vmatprep.subr.mxu0 %v2853_v22 }
 0x86b   :  { %3456 = vmatpush1.msra.mxu0 %v2854_v25  ;;  %v2787_v4 = vpop.permute.xlu1 %2786 }
 0x86c   :  { %v8416_v17 = vpop.permute.xlu0 %2888  ;;  %v2806_v8 = vsel %vm1282_vm5, %v8136_v24, %v2787_v4 }
 0x86d   :  { %2748 = vrot.lane.b32.xlu1 %v8305_v19, %s5387_s19  ;;  %v2899_v1 = vsel %vm1380_vm3, %v2887_v30, %v8416_v17 }
 0x86e   :  { %2746 = vrot.lane.b32.xlu0 %v8287_v0, %s5387_s19  ;;  %3524 = vmatprep.subr.mxu1 %v2899_v1 }
 0x86f   :  { %3525 = vmatpush1.msra.mxu1 %v2900_v35  ;;  %v2839_v12 = vpop.permute.xlu1 %2838 }
 0x870   :  { %v2789_v43 = vpop.permute.xlu0 %2788  ;;  %v2852_v60 = vsel %vm1331_vm4, %v2837_v62, %v2839_v12 }
 0x871   :  { %2698 = vrot.lane.b32.xlu1 %v8287_v0, %s5388_s20  ;;  %v2805_v26 = vsel %vm1282_vm5, %v2787_v4, %v2789_v43 }
 0x872   :  { %2798 = vrot.lane.b32.xlu0 %v8316_v58, %s5386_s2  ;;  %3457 = vmatprep.subr.mxu0 %v2805_v26 }
 0x873   :  { %3458 = vmatpush1.msra.mxu0 %v2806_v8  ;;  %v2739_v45 = vpop.permute.xlu1 %2738 }
 0x874   :  { %v8436_v42 = vpop.permute.xlu0 %2840  ;;  %v2758_v63 = vsel %vm1233_vm6, %v8156_v6, %v2739_v45 }
 0x875   :  { %2750 = vrot.lane.b32.xlu1 %v8316_v58, %s5387_s19  ;;  %v2851_v36 = vsel %vm1331_vm4, %v2839_v12, %v8436_v42 }
 0x876   :  { %2700 = vrot.lane.b32.xlu0 %v8305_v19, %s5388_s20  ;;  %3526 = vmatprep.subr.mxu1 %v2851_v36 }
 0x877   :  { %3527 = vmatpush1.msra.mxu1 %v2852_v60  ;;  %v2791_v24 = vpop.permute.xlu1 %2790 }
 0x878   :  { %v2741_v31 = vpop.permute.xlu0 %2740  ;;  %v2804_v30 = vsel %vm1282_vm5, %v2789_v43, %v2791_v24 }
 0x879   :  { %2652 = vrot.lane.b32.xlu1 %v8305_v19, %s5389_s1  ;;  %v2757_v47 = vsel %vm1233_vm6, %v2739_v45, %v2741_v31 }
 0x87a   :  { %2650 = vrot.lane.b32.xlu0 %v8287_v0, %s5389_s1  ;;  %3459 = vmatprep.subr.mxu0 %v2757_v47 }
 0x87b   :  { %3460 = vmatpush1.msra.mxu0 %v2758_v63  ;;  %v2691_v18 = vpop.permute.xlu1 %2690 }
 0x87c   :  { %v8456_v54 = vpop.permute.xlu0 %2792  ;;  %v2710_v25 = vsel %vm1184_vm7, %v8176_v49, %v2691_v18 }
 0x87d   :  { %2602 = vrot.lane.b32.xlu1 %v8287_v0, %s5390_s21  ;;  %v2803_v27 = vsel %vm1282_vm5, %v2791_v24, %v8456_v54 }
 0x87e   :  { %2702 = vrot.lane.b32.xlu0 %v8316_v58, %s5388_s20  ;;  %3528 = vmatprep.subr.mxu1 %v2803_v27 }
 0x87f   :  { %3529 = vmatpush1.msra.mxu1 %v2804_v30  ;;  %v2743_v6 = vpop.permute.xlu1 %2742 }
 0x880   :  { %v2693_v62 = vpop.permute.xlu0 %2692  ;;  %v2756_v12 = vsel %vm1233_vm6, %v2741_v31, %v2743_v6 }
 0x881   :  { %2654 = vrot.lane.b32.xlu1 %v8316_v58, %s5389_s1  ;;  %v2709_v22 = vsel %vm1184_vm7, %v2691_v18, %v2693_v62 }
 0x882   :  { %2604 = vrot.lane.b32.xlu0 %v8305_v19, %s5390_s21  ;;  %3461 = vmatprep.subr.mxu0 %v2709_v22 }
 0x883   :  { %3462 = vmatpush1.msra.mxu0 %v2710_v25  ;;  %v2643_v4 = vpop.permute.xlu1 %2642 }
 0x884   :  { %v8476_v1 = vpop.permute.xlu0 %2744  ;;  %v2662_v8 = vsel %vm10097_vm13, %v8196_v39, %v2643_v4 }
 0x885   :  { %2556 = vrot.lane.b32.xlu1 %v8305_v19, %s5391_s22  ;;  %v2755_v35 = vsel %vm1233_vm6, %v2743_v6, %v8476_v1 }
 0x886   :  { %2554 = vrot.lane.b32.xlu0 %v8287_v0, %s5391_s22  ;;  %3530 = vmatprep.subr.mxu1 %v2755_v35 }
 0x887   :  { %3531 = vmatpush1.msra.mxu1 %v2756_v12  ;;  %v2695_v49 = vpop.permute.xlu1 %2694 }
 0x888   :  { %v2645_v43 = vpop.permute.xlu0 %2644  ;;  %v2708_v24 = vsel %vm1184_vm7, %v2693_v62, %v2695_v49  ;;  %v3153_v62 = vld [vmem:[%s10037_s6] sm:$0xff] }
 0x889   :  { %2506 = vrot.lane.b32.xlu1 %v8287_v0, %s5392_s23  ;;  %v2661_v26 = vsel %vm10096_vm2, %v2643_v4, %v2645_v43  ;;  %vm10100_vm2 = vcmp.lt.s32.totalorder %v5604_v37, 126 }
 0x88a   :  { %2606 = vrot.lane.b32.xlu0 %v8316_v58, %s5390_s21  ;;  %3463 = vmatprep.subr.mxu0 %v2661_v26  ;;  %vm10101_vm13 = vmmov %vm10100_vm2 }
 0x88b   :  { %3464 = vmatpush1.msra.mxu0 %v2662_v8  ;;  %v2595_v45 = vpop.permute.xlu1 %2594 }
 0x88c   :  { %v8496_v36 = vpop.permute.xlu0 %2696  ;;  %v2614_v63 = vsel %vm1086_vm9, %v8216_v61, %v2595_v45 }
 0x88d   :  { %2558 = vrot.lane.b32.xlu1 %v8316_v58, %s5391_s22  ;;  %v2707_v60 = vsel %vm1184_vm7, %v2695_v49, %v8496_v36 }
 0x88e   :  { %2508 = vrot.lane.b32.xlu0 %v8305_v19, %s5392_s23  ;;  %3532 = vmatprep.subr.mxu1 %v2707_v60 }
 0x88f   :  { %3533 = vmatpush1.msra.mxu1 %v2708_v24  ;;  %v2647_v39 = vpop.permute.xlu1 %2646 }
 0x890   :  { %v2597_v31 = vpop.permute.xlu0 %2596  ;;  %v2660_v6 = vsel %vm10099_vm1, %v2645_v43, %v2647_v39 }
 0x891   :  { %2460 = vrot.lane.b32.xlu1 %v8305_v19, %s5393_s24  ;;  %v2613_v47 = vsel %vm1086_vm9, %v2595_v45, %v2597_v31 }
 0x892   :  { %2458 = vrot.lane.b32.xlu0 %v8287_v0, %s5393_s24  ;;  %3465 = vmatprep.subr.mxu0 %v2613_v47 }
 0x893   :  { %3466 = vmatpush1.msra.mxu0 %v2614_v63  ;;  %v2547_v18 = vpop.permute.xlu1 %2546 }
 0x894   :  { %v8516_v27 = vpop.permute.xlu0 %2648  ;;  %v2566_v4 = vsel %vm1037_vm11, %v8236_v11, %v2547_v18 }
 0x895   :  { %2462 = vrot.lane.b32.xlu1 %v8316_v58, %s5393_s24  ;;  %v2659_v30 = vsel %vm10098_vm8, %v2647_v39, %v8516_v27  ;;  %vm10102_vm8 = vcmp.lt.s32.totalorder %v5604_v37, 127 }
 0x896   :  { %2510 = vrot.lane.b32.xlu0 %v8316_v58, %s5392_s23  ;;  %3534 = vmatprep.subr.mxu1 %v2659_v30  ;;  %vm10103_vm1 = vmmov %vm10102_vm8 }
 0x897   :  { %3535 = vmatpush1.msra.mxu1 %v2660_v6  ;;  %v2599_v61 = vpop.permute.xlu1 %2598 }
 0x898   :  { %v2549_v22 = vpop.permute.xlu0 %2548  ;;  %v2612_v43 = vsel %vm1086_vm9, %v2597_v31, %v2599_v61 }
 0x899   :  { %v2565_v25 = vsel %vm1037_vm11, %v2547_v18, %v2549_v22 }
 0x89a   :  { %3156 = vperm.xlu0 %5321, %v3153_v62   ;;  %3467 = vmatprep.subr.mxu0 %v2565_v25  ;;  %v8569_v62 = vld [vmem:[%s10036_s5] sm:$0xff] }
 0x89b   :  { %3468 = vmatpush1.msra.mxu0 %v2566_v4  ;;  %v2499_v35 = vpop.permute.xlu1 %2498 }
 0x89c   :  { %v8535_v12 = vpop.permute.xlu0 %2600  ;;  %v2518_v11 = vsel %vm10101_vm13, %v8257_v5, %v2499_v35  ;;  %vm10104_vm13 = vmmov %vm10100_vm2 }
 0x89d   :  { %v2611_v49 = vsel %vm1086_vm9, %v2599_v61, %v8535_v12 }
 0x89e   :  { %3536 = vmatprep.subr.mxu1 %v2611_v49 }
 0x89f   :  { %3537 = vmatpush1.msra.mxu1 %v2612_v43  ;;  %v2551_v26 = vpop.permute.xlu1 %2550 }
 0x8a0   :  { %v2501_v8 = vpop.permute.xlu0 %2500  ;;  %v2564_v31 = vsel %vm1037_vm11, %v2549_v22, %v2551_v26 }
 0x8a1   :  { %v2517_v45 = vsel %vm10100_vm2, %v2499_v35, %v2501_v8 }
 0x8a2   :  { %3469 = vmatprep.subr.mxu0 %v2517_v45 }
 0x8a3   :  { %3470 = vmatpush1.msra.mxu0 %v2518_v11  ;;  %v2451_v60 = vpop.permute.xlu1 %2450 }
 0x8a4   :  { %v8547_v24 = vpop.permute.xlu0 %2552  ;;  %v2470_v5 = vsel %vm10103_vm1, %v8272_v32, %v2451_v60 }
 0x8a5   :  { %v2563_v39 = vsel %vm1037_vm11, %v2551_v26, %v8547_v24 }
 0x8a6   :  { %3538 = vmatprep.subr.mxu1 %v2563_v39 }
 0x8a7   :  { %3539 = vmatpush1.msra.mxu1 %v2564_v31  ;;  %v2503_v47 = vpop.permute.xlu1 %2502 }
 0x8a8   :  { %v2453_v63 = vpop.permute.xlu0 %2452  ;;  %v2516_v32 = vsel %vm10104_vm13, %v2501_v8, %v2503_v47  ;;  %vm10117_vm13 = vmmov %vm10103_vm1 }
 0x8a9   :  { %v2469_v18 = vsel %vm10102_vm8, %v2451_v60, %v2453_v63  ;;  %vm10105_vm8 = vmmov %vm10103_vm1 }
 0x8aa   :  { %3471 = vmatprep.subr.mxu0 %v2469_v18 }
 0x8ab   :  { %3472 = vmatpush1.msra.mxu0 %v2470_v5  ;;  %v2455_v30 = vpop.permute.xlu1 %2454 }
 0x8ac   :  { %3473 = vmatprep.subr.mxu0 %v7963_v59  ;;  %v8560_v6 = vpop.permute.xlu0 %2504  ;;  %v2468_v25 = vsel %vm10103_vm1, %v2453_v63, %v2455_v30 }
 0x8ad   :  { %3474 = vmatpush1.msra.mxu0 %v7692_v14  ;;  %v2515_v61 = vsel %vm10100_vm2, %v2503_v47, %v8560_v6 }
 0x8ae   :  { %3508 = vmatmul.mubr.f32.vlgmr.msra.gmra.mxu0 %v8569_v62  ;;  %3540 = vmatprep.subr.mxu1 %v2515_v61 }
 0x8af   :  { %3541 = vmatpush1.msra.mxu1 %v2516_v32  ;;  %v3131_v59 = vpop.permute.xlu1 %3130  ;;  %3649 = vmatprep.mubr.f32.mxu0 %v10066_v46 }
 0x8b0   :  { %v8575_v14 = vpop.permute.xlu0 %2456  ;;  %v3138_v43 = vsel %vm1625_vm10, %v8314_v13, %v3131_v59 }
 0x8b1   :  { %v2467_v22 = vsel %vm10105_vm8, %v2455_v30, %v8575_v14  ;;  %vm3730_vm8 = vcmp.lt.s32.totalorder %v10072_v28, 455 }
 0x8b2   :  { %3542 = vmatprep.subr.mxu1 %v2467_v22 }
 0x8b3   :  { %3543 = vmatpush1.msra.mxu1 %v2468_v25  ;;  %v3083_v4 = vpop.permute.xlu1 %3082 }
 0x8b4   :  { %3544 = vmatprep.subr.mxu1 %v7994_v7  ;;  %v3133_v35 = vpop.permute.xlu0 %3132  ;;  %v3090_v13 = vsel %vm1576_vm12, %v8336_v23, %v3083_v4 }
 0x8b5   :  { %3545 = vmatpush1.msra.mxu1 %v7981_v33  ;;  %v3137_v49 = vsel %vm1625_vm10, %v3131_v59, %v3133_v35 }
 0x8b6   :  { %3579 = vmatmul.mubr.f32.vlgmr.msra.gmra.mxu1 %v8569_v62  ;;  %3585 = vmatprep.subr.mxu0 %v3137_v49 }
 0x8b7   :  { %3586 = vmatpush1.msra.mxu0 %v3138_v43  ;;  %v3135_v26 = vpop.permute.xlu1 %3134  ;;  %3720 = vmatprep.mubr.f32.mxu1 %v10066_v46 }
 0x8b8   :  { %v3085_v8 = vpop.permute.xlu0 %3084  ;;  %v3151_v7 = vsel %vm1625_vm10, %v3135_v26, %v7577_v38  ;;  %v3136_v33 = vsel %vm1625_vm10, %v3133_v35, %v3135_v26  ;;  %vm10106_vm10 = vcmp.lt.s32.totalorder %v5604_v37, 123 }
 0x8b9   :  { %v3089_v45 = vsel %vm1576_vm12, %v3083_v4, %v3085_v8  ;;  %3656 = vmatprep.subr.mxu1 %v3151_v7 }
 0x8ba   :  { %3587 = vmatprep.subr.mxu0 %v3089_v45  ;;  %3657 = vmatpush1.msra.mxu1 %v3136_v33 }
 0x8bb   :  { %3588 = vmatpush1.msra.mxu0 %v3090_v13  ;;  %v3037_v11 = vpop.permute.xlu1 %3036 }
 0x8bc   :  { %v3035_v60 = vpop.permute.xlu0 %3034 }
 0x8bd   :  { %v3041_v39 = vsel %vm1527_vm14, %v3035_v60, %v3037_v11  ;;  %v3042_v38 = vsel %vm1527_vm14, %v8356_v16, %v3035_v60 }
 0x8be   :  { %3589 = vmatprep.subr.mxu0 %v3041_v39 }
 0x8bf   :  { %3590 = vmatpush1.msra.mxu0 %v3042_v38  ;;  %v2987_v31 = vpop.permute.xlu1 %2986 }
 0x8c0   :  { %v3087_v47 = vpop.permute.xlu0 %3086 }
 0x8c1   :  { %v3103_v63 = vsel %vm1576_vm12, %v3087_v47, %v7586_v57  ;;  %v3088_v23 = vsel %vm1576_vm12, %v3085_v8, %v3087_v47  ;;  %v2994_v57 = vsel %vm1478_vm15, %v8376_v2, %v2987_v31  ;;  %vm10107_vm12 = vmmov %vm10106_vm10 }
 0x8c2   :  { %3658 = vmatprep.subr.mxu1 %v3103_v63 }
 0x8c3   :  { %3659 = vmatpush1.msra.mxu1 %v3088_v23  ;;  %v3039_v18 = vpop.permute.xlu1 %3038 }
 0x8c4   :  { %v2989_v5 = vpop.permute.xlu0 %2988  ;;  %v3055_v30 = vsel %vm1527_vm14, %v3039_v18, %v7614_v3  ;;  %v3040_v16 = vsel %vm1527_vm14, %v3037_v11, %v3039_v18  ;;  %vm10108_vm14 = vmmov %vm10106_vm10 }
 0x8c5   :  { %v2993_v61 = vsel %vm1478_vm15, %v2987_v31, %v2989_v5  ;;  %3660 = vmatprep.subr.mxu1 %v3055_v30 }
 0x8c6   :  { %3591 = vmatprep.subr.mxu0 %v2993_v61  ;;  %3661 = vmatpush1.msra.mxu1 %v3040_v16 }
 0x8c7   :  { %3592 = vmatpush1.msra.mxu0 %v2994_v57  ;;  %v2941_v32 = vpop.permute.xlu1 %2940 }
 0x8c8   :  { %v2939_v59 = vpop.permute.xlu0 %2938 }
 0x8c9   :  { %v2945_v22 = vsel %vm1429_vm0, %v2939_v59, %v2941_v32  ;;  %v2946_v3 = vsel %vm1429_vm0, %v8396_v48, %v2939_v59 }
 0x8ca   :  { %3593 = vmatprep.subr.mxu0 %v2945_v22 }
 0x8cb   :  { %3594 = vmatpush1.msra.mxu0 %v2946_v3  ;;  %v2891_v25 = vpop.permute.xlu1 %2890 }
 0x8cc   :  { %v2991_v4 = vpop.permute.xlu0 %2990 }
 0x8cd   :  { %v3007_v35 = vsel %vm1478_vm15, %v2991_v4, %v7636_v50  ;;  %v2992_v2 = vsel %vm1478_vm15, %v2989_v5, %v2991_v4  ;;  %v2898_v50 = vsel %vm1380_vm3, %v8416_v17, %v2891_v25  ;;  %vm10109_vm15 = vmmov %vm10106_vm10 }
 0x8ce   :  { %3662 = vmatprep.subr.mxu1 %v3007_v35 }
 0x8cf   :  { %3663 = vmatpush1.msra.mxu1 %v2992_v2  ;;  %v2943_v49 = vpop.permute.xlu1 %2942 }
 0x8d0   :  { %v2944_v43 = vsel %vm1429_vm0, %v2941_v32, %v2943_v49  ;;  %v2893_v26 = vpop.permute.xlu0 %2892  ;;  %v2959_v48 = vsel %vm1429_vm0, %v2943_v49, %v7674_v20  ;;  %vm10110_vm0 = vmmov %vm10100_vm2 }
 0x8d1   :  { %v2897_v8 = vsel %vm1380_vm3, %v2891_v25, %v2893_v26  ;;  %3664 = vmatprep.subr.mxu1 %v2959_v48  ;;  %vm10116_vm2 = vmmov %vm10103_vm1 }
 0x8d2   :  { %3595 = vmatprep.subr.mxu0 %v2897_v8  ;;  %3665 = vmatpush1.msra.mxu1 %v2944_v43 }
 0x8d3   :  { %3596 = vmatpush1.msra.mxu0 %v2898_v50  ;;  %v2845_v7 = vpop.permute.xlu1 %2844 }
 0x8d4   :  { %v2843_v33 = vpop.permute.xlu0 %2842 }
 0x8d5   :  { %v2850_v45 = vsel %vm1331_vm4, %v8436_v42, %v2843_v33  ;;  %v2849_v20 = vsel %vm1331_vm4, %v2843_v33, %v2845_v7 }
 0x8d6   :  { %3597 = vmatprep.subr.mxu0 %v2849_v20 }
 0x8d7   :  { %3598 = vmatpush1.msra.mxu0 %v2850_v45  ;;  %v2795_v13 = vpop.permute.xlu1 %2794 }
 0x8d8   :  { %v2895_v11 = vpop.permute.xlu0 %2894  ;;  %v2802_v63 = vsel %vm1282_vm5, %v8456_v54, %v2795_v13 }
 0x8d9   :  { %v2896_v60 = vsel %vm1380_vm3, %v2893_v26, %v2895_v11  ;;  %v2911_v17 = vsel %vm1380_vm3, %v2895_v11, %v7698_v41  ;;  %vm10111_vm3 = vmmov %vm10110_vm0 }
 0x8da   :  { %3666 = vmatprep.subr.mxu1 %v2911_v17 }
 0x8db   :  { %3667 = vmatpush1.msra.mxu1 %v2896_v60  ;;  %v2847_v39 = vpop.permute.xlu1 %2846 }
 0x8dc   :  { %v2848_v42 = vsel %vm1331_vm4, %v2845_v7, %v2847_v39  ;;  %v2797_v38 = vpop.permute.xlu0 %2796  ;;  %v2863_v31 = vsel %vm1331_vm4, %v2847_v39, %v7726_v52  ;;  %vm10112_vm4 = vmmov %vm10103_vm1 }
 0x8dd   :  { %v2801_v47 = vsel %vm1282_vm5, %v2795_v13, %v2797_v38  ;;  %3668 = vmatprep.subr.mxu1 %v2863_v31 }
 0x8de   :  { %3599 = vmatprep.subr.mxu0 %v2801_v47  ;;  %3669 = vmatpush1.msra.mxu1 %v2848_v42 }
 0x8df   :  { %3600 = vmatpush1.msra.mxu0 %v2802_v63  ;;  %v2749_v41 = vpop.permute.xlu1 %2748 }
 0x8e0   :  { %v2747_v23 = vpop.permute.xlu0 %2746 }
 0x8e1   :  { %v2754_v18 = vsel %vm1233_vm6, %v8476_v1, %v2747_v23  ;;  %v2753_v52 = vsel %vm1233_vm6, %v2747_v23, %v2749_v41 }
 0x8e2   :  { %3601 = vmatprep.subr.mxu0 %v2753_v52  ;;  %v3296_v52 = vpop.f32.mrf.mxu1 }
 0x8e3   :  { %3602 = vmatpush1.msra.mxu0 %v2754_v18  ;;  %v2699_v5 = vpop.permute.xlu1 %2698 }
 0x8e4   :  { %v2799_v30 = vpop.permute.xlu0 %2798  ;;  %v2706_v22 = vsel %vm1184_vm7, %v8496_v36, %v2699_v5 }
 0x8e5   :  { %v2800_v16 = vsel %vm1282_vm5, %v2797_v38, %v2799_v30  ;;  %v2815_v54 = vsel %vm1282_vm5, %v2799_v30, %v7746_v29  ;;  %vm10113_vm5 = vmmov %vm10103_vm1  ;;  %v3298_v30 = vpop.f32.mrf.mxu1  ;;  %vm3734_vm1 = vcmp.lt.s32.totalorder %v10073_v55, 455 }
 0x8e6   :  { %3670 = vmatprep.subr.mxu1 %v2815_v54 }
 0x8e7   :  { %3671 = vmatpush1.msra.mxu1 %v2800_v16  ;;  %v2751_v61 = vpop.permute.xlu1 %2750 }
 0x8e8   :  { %v2752_v1 = vsel %vm1233_vm6, %v2749_v41, %v2751_v61  ;;  %v2701_v57 = vpop.permute.xlu0 %2700  ;;  %v2767_v32 = vsel %vm1233_vm6, %v2751_v61, %v7774_v15  ;;  %vm10114_vm6 = vmmov %vm10110_vm0 }
 0x8e9   :  { %v2705_v59 = vsel %vm1184_vm7, %v2699_v5, %v2701_v57  ;;  %3672 = vmatprep.subr.mxu1 %v2767_v32 }
 0x8ea   :  { %3603 = vmatprep.subr.mxu0 %v2705_v59  ;;  %3673 = vmatpush1.msra.mxu1 %v2752_v1 }
 0x8eb   :  { %3604 = vmatpush1.msra.mxu0 %v2706_v22  ;;  %v2653_v29 = vpop.permute.xlu1 %2652 }
 0x8ec   :  { %v2651_v3 = vpop.permute.xlu0 %2650 }
 0x8ed   :  { %v2658_v25 = vsel %vm10106_vm10, %v8516_v27, %v2651_v3  ;;  %v2657_v15 = vsel %vm10107_vm12, %v2651_v3, %v2653_v29  ;;  %vm3738_vm10 = vcmp.lt.s32.totalorder %v10074_v21, 455  ;;  %vm3742_vm12 = vcmp.lt.s32.totalorder %v10075_v56, 455  ;;  %v4357_v56 = vld [vmem:[%s10038_s7 + $0xf8] sm:$0xff] }
 0x8ee   :  { %3605 = vmatprep.subr.mxu0 %v2657_v15 }
 0x8ef   :  { %3606 = vmatpush1.msra.mxu0 %v2658_v25  ;;  %v2603_v4 = vpop.permute.xlu1 %2602 }
 0x8f0   :  { %v2703_v35 = vpop.permute.xlu0 %2702  ;;  %v2610_v8 = vsel %vm1086_vm9, %v8535_v12, %v2603_v4 }
 0x8f1   :  { %v2704_v2 = vsel %vm1184_vm7, %v2701_v57, %v2703_v35  ;;  %v2719_v36 = vsel %vm1184_vm7, %v2703_v35, %v7794_v40  ;;  %vm10115_vm7 = vmmov %vm10110_vm0 }
 0x8f2   :  { %3674 = vmatprep.subr.mxu1 %v2719_v36 }
 0x8f3   :  { %3675 = vmatpush1.msra.mxu1 %v2704_v2  ;;  %v2655_v49 = vpop.permute.xlu1 %2654 }
 0x8f4   :  { %v2656_v27 = vsel %vm10108_vm14, %v2653_v29, %v2655_v49  ;;  %v2605_v43 = vpop.permute.xlu0 %2604  ;;  %v2671_v26 = vsel %vm10109_vm15, %v2655_v49, %v7822_v44 }
 0x8f5   :  { %v2609_v48 = vsel %vm1086_vm9, %v2603_v4, %v2605_v43  ;;  %3676 = vmatprep.subr.mxu1 %v2671_v26 }
 0x8f6   :  { %3607 = vmatprep.subr.mxu0 %v2609_v48  ;;  %3677 = vmatpush1.msra.mxu1 %v2656_v27 }
 0x8f7   :  { %3608 = vmatpush1.msra.mxu0 %v2610_v8  ;;  %v2557_v40 = vpop.permute.xlu1 %2556 }
 0x8f8   :  { %v2555_v50 = vpop.permute.xlu0 %2554 }
 0x8f9   :  { %v2562_v7 = vsel %vm1037_vm11, %v8547_v24, %v2555_v50  ;;  %v2561_v44 = vsel %vm1037_vm11, %v2555_v50, %v2557_v40 }
 0x8fa   :  { %3609 = vmatprep.subr.mxu0 %v2561_v44 }
 0x8fb   :  { %3610 = vmatpush1.msra.mxu0 %v2562_v7  ;;  %v2507_v33 = vpop.permute.xlu1 %2506 }
 0x8fc   :  { %v2607_v45 = vpop.permute.xlu0 %2606  ;;  %v2514_v39 = vsel %vm10111_vm3, %v8560_v6, %v2507_v33 }
 0x8fd   :  { %v2608_v20 = vsel %vm1086_vm9, %v2605_v43, %v2607_v45  ;;  %v2623_v12 = vsel %vm1086_vm9, %v2607_v45, %v7842_v53 }
 0x8fe   :  { %3678 = vmatprep.subr.mxu1 %v2623_v12 }
 0x8ff   :  { %3679 = vmatpush1.msra.mxu1 %v2608_v20  ;;  %v2559_v13 = vpop.permute.xlu1 %2558  ;;  %v3438_v57 = vpop.f32.mrf.mxu1 }
 0x900   :  { %v2560_v24 = vsel %vm1037_vm11, %v2557_v40, %v2559_v13  ;;  %v2509_v11 = vpop.permute.xlu0 %2508  ;;  %v2575_v60 = vsel %vm1037_vm11, %v2559_v13, %v7870_v51 }
 0x901   :  { %v2513_v17 = vsel %vm10110_vm0, %v2507_v33, %v2509_v11  ;;  %3680 = vmatprep.subr.mxu1 %v2575_v60  ;;  %v3440_v22 = vpop.f32.mrf.mxu1 }
 0x902   :  { %3611 = vmatprep.subr.mxu0 %v2513_v17  ;;  %3681 = vmatpush1.msra.mxu1 %v2560_v24 }
 0x903   :  { %3612 = vmatpush1.msra.mxu0 %v2514_v39  ;;  %v2461_v53 = vpop.permute.xlu1 %2460 }
 0x904   :  { %v2459_v42 = vpop.permute.xlu0 %2458 }
 0x905   :  { %v2466_v38 = vsel %vm10112_vm4, %v8575_v14, %v2459_v42  ;;  %v2465_v51 = vsel %vm10113_vm5, %v2459_v42, %v2461_v53 }
 0x906   :  { %3613 = vmatprep.subr.mxu0 %v2465_v51 }
 0x907   :  { %3614 = vmatpush1.msra.mxu0 %v2466_v38  ;;  %v2463_v31 = vpop.permute.xlu1 %2462 }
 0x908   :  { %3615 = vmatprep.subr.mxu0 %v8287_v0  ;;  %v2511_v47 = vpop.permute.xlu0 %2510  ;;  %v2479_v14 = vsel %vm10116_vm2, %v2463_v31, %v7918_v34  ;;  %v2464_v0 = vsel %vm10117_vm13, %v2461_v53, %v2463_v31 }
 0x909   :  { %v2512_v6 = vsel %vm10114_vm6, %v2509_v11, %v2511_v47  ;;  %3616 = vmatpush1.msra.mxu0 %v8007_v10  ;;  %v2527_v63 = vsel %vm10115_vm7, %v2511_v47, %v7890_v9  ;;  %v3225_v9 = vpop.f32.mrf.mxu0 }
 0x90a   :  { %3650 = vmatmul.mubr.f32.vlgmr.msra.gmra.mxu0 %v8569_v62  ;;  %3682 = vmatprep.subr.mxu1 %v2527_v63 }
 0x90b   :  { %3683 = vmatpush1.msra.mxu1 %v2512_v6  ;;  %v3227_v41 = vpop.f32.mrf.mxu0  ;;  %5047 = vmatprep.subr.mxu0 %v4357_v56  ;;  %v4348_v56 = vld [vmem:[%s10038_s7 + $0xb0] sm:$0xff] }
 0x90c   :  { %3684 = vmatprep.subr.mxu1 %v2479_v14 }
 0x90d   :  { %3685 = vmatpush1.msra.mxu1 %v2464_v0  ;;  %v3367_v61 = vpop.f32.mrf.mxu0 }
 0x90e   :  { %3686 = vmatprep.subr.mxu1 %v8316_v58 }
 0x90f   :  { %3687 = vmatpush1.msra.mxu1 %v8305_v19 }
 0x910   :  { %3721 = vmatmul.mubr.f32.vlgmr.msra.gmra.mxu1 %v8569_v62  ;;  %v3369_v62 = vpop.f32.mrf.mxu0 }
 0x915   :  { %v3157_v10 = vpop.permute.xlu0 %3156 }
 0x916   :  { %v3226_v23 = vadd.f32 %v3225_v9, %v3157_v10  ;;  %v3228_v18 = vadd.f32 %v3227_v41, %v3157_v10  ;;  %v3297_v34 = vadd.f32 %v3296_v52, %v3157_v10  ;;  %v3299_v16 = vadd.f32 %v3298_v30, %v3157_v10 }
 0x917   :  { %v3368_v1 = vadd.f32 %v3367_v61, %v3157_v10  ;;  %v3370_v59 = vadd.f32 %v3369_v62, %v3157_v10  ;;  %v3439_v3 = vadd.f32 %v3438_v57, %v3157_v10  ;;  %v3441_v25 = vadd.f32 %v3440_v22, %v3157_v10 }
 0x918   :  { %v3791_v5 = vadd.f32 %v3228_v18, %v3226_v23  ;;  %v3778_v58 = vsel %vm3730_vm8, %v3299_v16, 0.0 }
 0x919   :  { %v3782_v36 = vsel %vm3734_vm1, %v3441_v25, 0.0 }
 0x91a   :  { %v3792_v54 = vadd.f32 %v3791_v5, %v3297_v34 }
 0x91c   :  { %v3793_v19 = vadd.f32 %v3792_v54, %v3778_v58 }
 0x91e   :  { %v3794_v32 = vadd.f32 %v3793_v19, %v3368_v1 }
 0x920   :  { %v3795_v29 = vadd.f32 %v3794_v32, %v3370_v59 }
 0x922   :  { %v3796_v4 = vadd.f32 %v3795_v29, %v3439_v3 }
 0x924   :  { %v3797_v27 = vadd.f32 %v3796_v4, %v3782_v36 }
 0x96e   :  { %v3509_v15 = vpop.f32.mrf.mxu0 }
 0x96f   :  { %v3510_v35 = vadd.f32 %v3509_v15, %v3157_v10 }
 0x970   :  { %v3511_v49 = vpop.f32.mrf.mxu0 }
 0x971   :  { %v3798_v43 = vadd.f32 %v3797_v27, %v3510_v35  ;;  %v3512_v26 = vadd.f32 %v3511_v49, %v3157_v10 }
 0x973   :  { %v3799_v50 = vadd.f32 %v3798_v43, %v3512_v26 }
 0x976   :  { %v3580_v2 = vpop.f32.mrf.mxu1 }
 0x977   :  { %v3581_v8 = vadd.f32 %v3580_v2, %v3157_v10 }
 0x978   :  { %v3582_v48 = vpop.f32.mrf.mxu1 }
 0x979   :  { %v3583_v40 = vadd.f32 %v3582_v48, %v3157_v10  ;;  %v3800_v7 = vadd.f32 %v3799_v50, %v3581_v8 }
 0x97b   :  { %v3786_v44 = vsel %vm3738_vm10, %v3583_v40, 0.0 }
 0x97c   :  { %v3801_v45 = vadd.f32 %v3800_v7, %v3786_v44 }
 0x9ca   :  { %v3651_v33 = vpop.f32.mrf.mxu0 }
 0x9cb   :  { %v3652_v20 = vadd.f32 %v3651_v33, %v3157_v10 }
 0x9cc   :  { %v3653_v12 = vpop.f32.mrf.mxu0 }
 0x9cd   :  { %v3802_v13 = vadd.f32 %v3801_v45, %v3652_v20  ;;  %v3654_v24 = vadd.f32 %v3653_v12, %v3157_v10 }
 0x9cf   :  { %v3803_v60 = vadd.f32 %v3802_v13, %v3654_v24 }
 0x9d0   :  { %v3722_v11 = vpop.f32.mrf.mxu1 }
 0x9d1   :  { %v3723_v17 = vadd.f32 %v3722_v11, %v3157_v10 }
 0x9d2   :  { %v3724_v39 = vpop.f32.mrf.mxu1 }
 0x9d3   :  { %v3804_v53 = vadd.f32 %v3803_v60, %v3723_v17  ;;  %v3725_v42 = vadd.f32 %v3724_v39, %v3157_v10 }
 0x9d5   :  { %v3790_v38 = vsel %vm3742_vm12, %v3725_v42, 0.0 }
 0x9d6   :  { %v3805_v51 = vadd.f32 %v3804_v53, %v3790_v38 }
 0x9d8   :  { %3806 = vadd.xlane.f32.xlu1 %v3805_v51 }
 0xa61   :  { %v3807_v31 = vpop.xlane.xlu1 %3806 }
 0xa62   :  { %v3809_v47 = vmul.f32 0.0005494506, %v3807_v31 }
 0xa64   :  { %v8754_v6 = vsub.f32 %v3226_v23, %v3809_v47  ;;  %v3811_v63 = vsub.f32 %v3228_v18, %v3809_v47  ;;  %v3813_v14 = vsub.f32 %v3299_v16, %v3809_v47  ;;  %v3812_v0 = vsub.f32 %v3297_v34, %v3809_v47 }
 0xa65   :  { %v3814_v10 = vsub.f32 %v3368_v1, %v3809_v47  ;;  %v8760_v54 = vsub.f32 %v3370_v59, %v3809_v47  ;;  %v3817_v19 = vsub.f32 %v3441_v25, %v3809_v47  ;;  %v8762_v23 = vsub.f32 %v3439_v3, %v3809_v47 }
 0xa66   :  { %v3842_v9 = vmul.f32 %v8754_v6, %v8754_v6  ;;  %v3843_v41 = vmul.f32 %v3811_v63, %v3811_v63  ;;  %v3829_v52 = vsel %vm3730_vm8, %v3813_v14, 0.0  ;;  %v3844_v5 = vmul.f32 %v3812_v0, %v3812_v0 }
 0xa67   :  { %v3845_v61 = vmul.f32 %v3829_v52, %v3829_v52  ;;  %v3846_v18 = vmul.f32 %v3814_v10, %v3814_v10  ;;  %v3847_v34 = vmul.f32 %v8760_v54, %v8760_v54  ;;  %v8768_v28 = vsel %vm3734_vm1, %v3817_v19, 0.0 }
 0xa68   :  { %v3858_v30 = vadd.f32 %v3843_v41, %v3842_v9  ;;  %v8770_v1 = vsub.f32 %v3510_v35, %v3809_v47  ;;  %v3848_v57 = vmul.f32 %v8762_v23, %v8762_v23  ;;  %v8774_v59 = vsub.f32 %v3512_v26, %v3809_v47 }
 0xa69   :  { %v3849_v22 = vmul.f32 %v8768_v28, %v8768_v28  ;;  %v3821_v3 = vsub.f32 %v3583_v40, %v3809_v47  ;;  %v8778_v25 = vsub.f32 %v3581_v8, %v3809_v47  ;;  %v8788_v36 = vsub.f32 %v3652_v20, %v3809_v47 }
 0xa6a   :  { %v3859_v58 = vadd.f32 %v3858_v30, %v3844_v5  ;;  %v3850_v55 = vmul.f32 %v8770_v1, %v8770_v1  ;;  %v3851_v4 = vmul.f32 %v8774_v59, %v8774_v59  ;;  %v8792_v43 = vsub.f32 %v3654_v24, %v3809_v47 }
 0xa6b   :  { %v8786_v2 = vsel %vm3738_vm10, %v3821_v3, 0.0  ;;  %v3852_v49 = vmul.f32 %v8778_v25, %v8778_v25  ;;  %v3825_v8 = vsub.f32 %v3725_v42, %v3809_v47  ;;  %v8796_v40 = vsub.f32 %v3723_v17, %v3809_v47  ;;  %v4338_v3 = vld [vmem:[%s10038_s7 + $0x60] sm:$0xff] }
 0xa6c   :  { %v3860_v16 = vadd.f32 %v3859_v58, %v3845_v61  ;;  %v3853_v26 = vmul.f32 %v8786_v2, %v8786_v2  ;;  %v3854_v21 = vmul.f32 %v8788_v36, %v8788_v36  ;;  %v3855_v7 = vmul.f32 %v8792_v43, %v8792_v43  ;;  %v4388_v61 = vld [vmem:[%s10038_s7 + $0x1f0] sm:$0xff]  ;;  %v4355_v58 = vld [vmem:[%s10038_s7 + $0xe8] sm:$0xff] }
 0xa6d   :  { %v8804_v33 = vsel %vm3742_vm12, %v3825_v8, 0.0  ;;  %v3856_v45 = vmul.f32 %v8796_v40, %v8796_v40  ;;  %v4384_v8 = vld [vmem:[%s10038_s7 + $0x1d0] sm:$0xff] }
 0xa6e   :  { %v3861_v62 = vadd.f32 %v3860_v16, %v3846_v18  ;;  %v3857_v12 = vmul.f32 %v8804_v33, %v8804_v33 }
 0xa70   :  { %v3862_v32 = vadd.f32 %v3861_v62, %v3847_v34  ;;  %v4372_v34 = vld [vmem:[%s10038_s7 + $0x170] sm:$0xff]  ;;  %v4339_v62 = vld [vmem:[%s10038_s7 + $0x68] sm:$0xff] }
 0xa72   :  { %v3863_v29 = vadd.f32 %v3862_v32, %v3848_v57  ;;  %v4387_v57 = vld [vmem:[%s10038_s7 + $0x1e8] sm:$0xff]  ;;  %v4354_v32 = vld [vmem:[%s10038_s7 + $0xe0] sm:$0xff] }
 0xa74   :  { %v3864_v15 = vadd.f32 %v3863_v29, %v3849_v22  ;;  %v4371_v22 = vld [vmem:[%s10038_s7 + $0x168] sm:$0xff] }
 0xa76   :  { %v3865_v35 = vadd.f32 %v3864_v15, %v3850_v55  ;;  %v4386_v55 = vld [vmem:[%s10038_s7 + $0x1e0] sm:$0xff]  ;;  %v4353_v15 = vld [vmem:[%s10038_s7 + $0xd8] sm:$0xff] }
 0xa78   :  { %v3866_v27 = vadd.f32 %v3865_v35, %v3851_v4  ;;  %v4370_v4 = vld [vmem:[%s10038_s7 + $0x160] sm:$0xff]  ;;  %v4337_v35 = vld [vmem:[%s10038_s7 + $0x58] sm:$0xff] }
 0xa7a   :  { %v3867_v48 = vadd.f32 %v3866_v27, %v3852_v49  ;;  %v4385_v49 = vld [vmem:[%s10038_s7 + $0x1d8] sm:$0xff]  ;;  %v4352_v27 = vld [vmem:[%s10038_s7 + $0xd0] sm:$0xff] }
 0xa7c   :  { %v3868_v50 = vadd.f32 %v3867_v48, %v3853_v26  ;;  %v4369_v26 = vld [vmem:[%s10038_s7 + $0x158] sm:$0xff]  ;;  %v4336_v48 = vld [vmem:[%s10038_s7 + $0x50] sm:$0xff] }
 0xa7e   :  { %v3869_v44 = vadd.f32 %v3868_v50, %v3854_v21  ;;  %v4351_v21 = vld [vmem:[%s10038_s7 + $0xc8] sm:$0xff]  ;;  %v4368_v50 = vld [vmem:[%s10038_s7 + $0x150] sm:$0xff] }
 0xa80   :  { %v3870_v20 = vadd.f32 %v3869_v44, %v3855_v7  ;;  %v4335_v7 = vld [vmem:[%s10038_s7 + $0x48] sm:$0xff] }
 0xa81   :  { %v4383_v44 = vld [vmem:[%s10038_s7 + $0x1c8] sm:$0xff] }
 0xa82   :  { %v3871_v13 = vadd.f32 %v3870_v20, %v3856_v45  ;;  %v4350_v45 = vld [vmem:[%s10038_s7 + $0xc0] sm:$0xff]  ;;  %v4367_v20 = vld [vmem:[%s10038_s7 + $0x148] sm:$0xff] }
 0xa84   :  { %v3872_v24 = vadd.f32 %v3871_v13, %v3857_v12  ;;  %v4334_v12 = vld [vmem:[%s10038_s7 + $0x40] sm:$0xff] }
 0xa85   :  { %v4382_v13 = vld [vmem:[%s10038_s7 + $0x1c0] sm:$0xff] }
 0xa86   :  { %3873 = vadd.xlane.f32.xlu0 %v3872_v24  ;;  %v4349_v24 = vld [vmem:[%s10038_s7 + $0xb8] sm:$0xff] }
 0xb0f   :  { %v3874_v11 = vpop.xlane.xlu0 %3873 }
 0xb10   :  { %v3875_v60 = vmul.f32 0.0005494506, %v3874_v11  ;;  %v4366_v11 = vld [vmem:[%s10038_s7 + $0x140] sm:$0xff] }
 0xb12   :  { %v3876_v17 = vadd.f32 1e-05, %v3875_v60  ;;  %v4333_v60 = vld [vmem:[%s10038_s7 + $0x38] sm:$0xff] }
 0xb14   :  { %5327 = vrsqrt.f32 %v3876_v17  ;;  %v4381_v17 = vld [vmem:[%s10038_s7 + $0x1b8] sm:$0xff] }
 0xb21   :  { %v8813_v39 = vpop.eup %5327 }
 0xb22   :  { %v3880_v53 = vmul.f32 %v8813_v39, %v3812_v0  ;;  %v3879_v42 = vmul.f32 %v8813_v39, %v3811_v63  ;;  %v3881_v38 = vmul.f32 %v8813_v39, %v3829_v52  ;;  %v3882_v51 = vmul.f32 %v8813_v39, %v3814_v10  ;;  %v4341_v63 = vld [vmem:[%s10038_s7 + $0x78] sm:$0xff]  ;;  %v4356_v52 = vld [vmem:[%s10038_s7 + $0xf0] sm:$0xff] }
 0xb23   :  { %v3878_v30 = vmul.f32 %v8813_v39, %v8754_v6  ;;  %v4389_v0 = vld [vmem:[%s10038_s7 + $0x1f8] sm:$0xff]  ;;  %v4340_v10 = vld [vmem:[%s10038_s7 + $0x70] sm:$0xff]  ;;  %5048 = vmatpush3.msra.mxu0 %v4341_v63  ;;  %v4330_v63 = vld [vmem:[%s10038_s7 + $0x20] sm:$0xff] }
 0xb24   :  { %vm3896_vm14 = vcmp.ge.f32.partialorder %v3880_v53, 0.0  ;;  %v3912_v31 = vmul.f32 0.2, %v3880_v53  ;;  %vm3895_vm15 = vcmp.ge.f32.partialorder %v3879_v42, 0.0  ;;  %v3911_v47 = vmul.f32 0.2, %v3879_v42  ;;  %5091 = vmatprep.subr.mxu1 %v4389_v0  ;;  %5049 = vmatprep.subr.mxu0 %v4356_v52 }
 0xb25   :  { %v3913_v14 = vmul.f32 0.2, %v3881_v38  ;;  %v3914_v5 = vmul.f32 0.2, %v3882_v51  ;;  %vm3897_vm0 = vcmp.ge.f32.partialorder %v3881_v38, 0.0  ;;  %vm3898_vm3 = vcmp.ge.f32.partialorder %v3882_v51, 0.0  ;;  %5050 = vmatpush3.msra.mxu0 %v4340_v10 }
 0xb26   :  { %v8819_v9 = vsel %vm3896_vm14, %v3880_v53, %v3912_v31  ;;  %v8821_v41 = vsel %vm3895_vm15, %v3879_v42, %v3911_v47  ;;  %v4373_v6 = vld [vmem:[%s10038_s7 + $0x178] sm:$0xff]  ;;  %v3910_v16 = vmul.f32 0.2, %v3878_v30  ;;  %vm3894_vm4 = vcmp.ge.f32.partialorder %v3878_v30, 0.0  ;;  %5051 = vmatprep.subr.mxu0 %v4355_v58  ;;  %v4332_v42 = vld [vmem:[%s10038_s7 + $0x30] sm:$0xff]  ;;  %v4331_v47 = vld [vmem:[%s10038_s7 + $0x28] sm:$0xff] }
 0xb27   :  { %3946 = vrot.lane.b32.xlu1 %v8819_v9, %s5393_s24  ;;  %3944 = vrot.lane.b32.xlu0 %v8821_v41, %s5393_s24  ;;  %v8850_v19 = vsel %vm3897_vm0, %v3881_v38, %v3913_v14  ;;  %v8852_v18 = vsel %vm3898_vm3, %v3882_v51, %v3914_v5  ;;  %v4365_v53 = vld [vmem:[%s10038_s7 + $0x138] sm:$0xff]  ;;  %v4380_v38 = vld [vmem:[%s10038_s7 + $0x1b0] sm:$0xff]  ;;  %v3884_v10 = vmul.f32 %v8813_v39, %v8762_v23  ;;  %vm10118_vm0 = vcmp.lt.s32.totalorder %v5604_v37, 127 }
 0xb28   :  { %5092 = vmatpush3.msra.mxu1 %v4373_v6  ;;  %5052 = vmatpush3.msra.mxu0 %v4339_v62  ;;  %v8873_v29 = vsel %vm3894_vm4, %v3878_v30, %v3910_v16  ;;  %v4347_v51 = vld [vmem:[%s10038_s7 + $0xa8] sm:$0xff]  ;;  %v4364_v31 = vld [vmem:[%s10038_s7 + $0x130] sm:$0xff]  ;;  %v4346_v5 = vld [vmem:[%s10038_s7 + $0xa0] sm:$0xff] }
 0xb29   :  { %5093 = vmatprep.subr.mxu1 %v4388_v61  ;;  %5053 = vmatprep.subr.mxu0 %v4354_v32  ;;  %v4379_v14 = vld [vmem:[%s10038_s7 + $0x1a8] sm:$0xff]  ;;  %v4378_v0 = vld [vmem:[%s10038_s7 + $0x1a0] sm:$0xff]  ;;  %v4345_v52 = vld [vmem:[%s10038_s7 + $0x98] sm:$0xff]  ;;  %v3883_v61 = vmul.f32 %v8813_v39, %v8760_v54  ;;  %vm3900_vm5 = vcmp.ge.f32.partialorder %v3884_v10, 0.0 }
 0xb2a   :  { %5094 = vmatpush3.msra.mxu1 %v4372_v34  ;;  %5054 = vmatpush3.msra.mxu0 %v4338_v3  ;;  %v4363_v30 = vld [vmem:[%s10038_s7 + $0x128] sm:$0xff]  ;;  %v4362_v6 = vld [vmem:[%s10038_s7 + $0x120] sm:$0xff]  ;;  %v4329_v58 = vld [vmem:[%s10038_s7 + $0x18] sm:$0xff]  ;;  %v3885_v3 = vmul.f32 %v8813_v39, %v8768_v28 }
 0xb2b   :  { %3948 = vrot.lane.b32.xlu1 %v8850_v19, %s5393_s24  ;;  %3950 = vrot.lane.b32.xlu0 %v8852_v18, %s5393_s24  ;;  %v4377_v16 = vld [vmem:[%s10038_s7 + $0x198] sm:$0xff]  ;;  %v4344_v54 = vld [vmem:[%s10038_s7 + $0x90] sm:$0xff]  ;;  %v3915_v32 = vmul.f32 0.2, %v3883_v61  ;;  %vm3899_vm6 = vcmp.ge.f32.partialorder %v3883_v61, 0.0  ;;  %vm10119_vm3 = vmmov %vm10118_vm0 }
 0xb2c   :  { %5095 = vmatprep.subr.mxu1 %v4387_v57  ;;  %5055 = vmatprep.subr.mxu0 %v4353_v15  ;;  %v4361_v23 = vld [vmem:[%s10038_s7 + $0x118] sm:$0xff]  ;;  %v4328_v34 = vld [vmem:[%s10038_s7 + $0x10] sm:$0xff]  ;;  %v3916_v57 = vmul.f32 0.2, %v3884_v10  ;;  %v4327_v28 = vld [vmem:[%s10038_s7 + $0x8] sm:$0xff]  ;;  %vm3901_vm2 = vcmp.ge.f32.partialorder %v3885_v3, 0.0 }
 0xb2d   :  { %5096 = vmatpush3.msra.mxu1 %v4371_v22  ;;  %5056 = vmatpush3.msra.mxu0 %v4337_v35  ;;  %v4376_v62 = vld [vmem:[%s10038_s7 + $0x190] sm:$0xff]  ;;  %v3886_v22 = vmul.f32 %v8813_v39, %v8770_v1  ;;  %v4375_v1 = vld [vmem:[%s10038_s7 + $0x188] sm:$0xff] }
 0xb2e   :  { %5097 = vmatprep.subr.mxu1 %v4386_v55  ;;  %5057 = vmatprep.subr.mxu0 %v4352_v27  ;;  %v4343_v55 = vld [vmem:[%s10038_s7 + $0x88] sm:$0xff]  ;;  %v4360_v15 = vld [vmem:[%s10038_s7 + $0x110] sm:$0xff]  ;;  %v9061_v27 = vsel %vm3899_vm6, %v3883_v61, %v3915_v32  ;;  %vm10120_vm6 = vmmov %vm10118_vm0 }
 0xb2f   :  { %4040 = vrot.lane.b32.xlu0 %v8821_v41, %s5392_s23  ;;  %3942 = vrot.lane.b32.xlu1 %v8873_v29, %s5393_s24  ;;  %v4359_v35 = vld [vmem:[%s10038_s7 + $0x108] sm:$0xff]  ;;  %vm3902_vm7 = vcmp.ge.f32.partialorder %v3886_v22, 0.0 }
 0xb30   :  { %5098 = vmatpush3.msra.mxu1 %v4370_v4  ;;  %5058 = vmatpush3.msra.mxu0 %v4336_v48  ;;  %v4342_v4 = vld [vmem:[%s10038_s7 + $0x80] sm:$0xff]  ;;  %v3917_v48 = vmul.f32 0.2, %v3885_v3 }
 0xb31   :  { %5099 = vmatprep.subr.mxu1 %v4385_v49  ;;  %5059 = vmatprep.subr.mxu0 %v4351_v21  ;;  %v9059_v49 = vsel %vm3900_vm5, %v3884_v10, %v3916_v57  ;;  %v4374_v21 = vld [vmem:[%s10038_s7 + $0x180] sm:$0xff] }
 0xb32   :  { %5100 = vmatpush3.msra.mxu1 %v4369_v26  ;;  %5060 = vmatpush3.msra.mxu0 %v4335_v7  ;;  %v3918_v26 = vmul.f32 0.2, %v3886_v22 }
 0xb33   :  { %4044 = vrot.lane.b32.xlu0 %v8850_v19, %s5392_s23  ;;  %4042 = vrot.lane.b32.xlu1 %v8819_v9, %s5392_s23 }
 0xb34   :  { %5101 = vmatprep.subr.mxu1 %v4384_v8  ;;  %5061 = vmatprep.subr.mxu0 %v4350_v45  ;;  %v4326_v8 = vld [vmem:[%s10038_s7] sm:$0xff]  ;;  %v9076_v7 = vsel %vm3902_vm7, %v3886_v22, %v3918_v26  ;;  %v3888_v45 = vmul.f32 %v8813_v39, %v8778_v25  ;;  %vm10121_vm7 = vmmov %vm10118_vm0 }
 0xb35   :  { %5102 = vmatpush3.msra.mxu1 %v4368_v50  ;;  %5062 = vmatpush3.msra.mxu0 %v4334_v12  ;;  %v4358_v50 = vld [vmem:[%s10038_s7 + $0x100] sm:$0xff] }
 0xb36   :  { %5103 = vmatprep.subr.mxu1 %v4383_v44  ;;  %5063 = vmatprep.subr.mxu0 %v4349_v24  ;;  %v9078_v44 = vsel %vm3901_vm2, %v3885_v3, %v3917_v48  ;;  %v3920_v12 = vmul.f32 0.2, %v3888_v45  ;;  %v3890_v24 = vmul.f32 %v8813_v39, %v8788_v36  ;;  %vm3904_vm13 = vcmp.ge.f32.partialorder %v3888_v45, 0.0 }
 0xb37   :  { %4038 = vrot.lane.b32.xlu0 %v8873_v29, %s5392_s23  ;;  %4046 = vrot.lane.b32.xlu1 %v8852_v18, %s5392_s23  ;;  %vm10122_vm2 = vcmp.lt.s32.totalorder %v5604_v37, 126 }
 0xb38   :  { %5104 = vmatpush3.msra.mxu1 %v4367_v20  ;;  %5064 = vmatpush3.msra.mxu0 %v4333_v60  ;;  %v3887_v20 = vmul.f32 %v8813_v39, %v8774_v59  ;;  %v9100_v59 = vsel %vm3904_vm13, %v3888_v45, %v3920_v12  ;;  %v3922_v60 = vmul.f32 0.2, %v3890_v24  ;;  %vm3906_vm1 = vcmp.ge.f32.partialorder %v3890_v24, 0.0  ;;  %vm10123_vm13 = vmmov %vm10122_vm2 }
 0xb39   :  { %5105 = vmatprep.subr.mxu1 %v4382_v13  ;;  %5065 = vmatprep.subr.mxu0 %v4348_v56  ;;  %v3892_v56 = vmul.f32 %v8813_v39, %v8796_v40 }
 0xb3a   :  { %5106 = vmatpush3.msra.mxu1 %v4366_v11  ;;  %5066 = vmatpush3.msra.mxu0 %v4332_v42  ;;  %v3919_v13 = vmul.f32 0.2, %v3887_v20  ;;  %v3889_v11 = vmul.f32 %v8813_v39, %v8786_v2  ;;  %vm3903_vm8 = vcmp.ge.f32.partialorder %v3887_v20, 0.0  ;;  %v9108_v2 = vsel %vm3906_vm1, %v3890_v24, %v3922_v60 }
 0xb3b   :  { %4138 = vrot.lane.b32.xlu0 %v8819_v9, %s5391_s22  ;;  %4136 = vrot.lane.b32.xlu1 %v8821_v41, %s5391_s22  ;;  %v3924_v42 = vmul.f32 0.2, %v3892_v56  ;;  %vm3908_vm12 = vcmp.ge.f32.partialorder %v3892_v56, 0.0 }
 0xb3c   :  { %5107 = vmatprep.subr.mxu1 %v4381_v17  ;;  %5067 = vmatprep.subr.mxu0 %v4347_v51  ;;  %v9102_v25 = vsel %vm3903_vm8, %v3887_v20, %v3919_v13  ;;  %v3921_v17 = vmul.f32 0.2, %v3889_v11  ;;  %vm3905_vm10 = vcmp.ge.f32.partialorder %v3889_v11, 0.0  ;;  %v3893_v51 = vmul.f32 %v8813_v39, %v8804_v33  ;;  %v4604_v33 = vld [vmem:[%s10039_s8 + $0xf8] sm:$0xff] }
 0xb3d   :  { %5108 = vmatpush3.msra.mxu1 %v4365_v53  ;;  %5068 = vmatpush3.msra.mxu0 %v4331_v47  ;;  %v3891_v53 = vmul.f32 %v8813_v39, %v8792_v43  ;;  %v9146_v43 = vsel %vm3908_vm12, %v3892_v56, %v3924_v42  ;;  %v4636_v39 = vld [vmem:[%s10039_s8 + $0x1f8] sm:$0xff] }
 0xb3e   :  { %5109 = vmatprep.subr.mxu1 %v4380_v38  ;;  %5069 = vmatprep.subr.mxu0 %v4346_v5  ;;  %v9110_v36 = vsel %vm3905_vm10, %v3889_v11, %v3921_v17  ;;  %vm3909_vm15 = vcmp.ge.f32.partialorder %v3893_v51, 0.0 }
 0xb3f   :  { %4142 = vrot.lane.b32.xlu0 %v8852_v18, %s5391_s22  ;;  %4140 = vrot.lane.b32.xlu1 %v8850_v19, %s5391_s22  ;;  %v3923_v38 = vmul.f32 0.2, %v3891_v53  ;;  %vm3907_vm14 = vcmp.ge.f32.partialorder %v3891_v53, 0.0 }
 0xb40   :  { %5110 = vmatpush3.msra.mxu1 %v4364_v31  ;;  %5070 = vmatpush3.msra.mxu0 %v4330_v63  ;;  %v3925_v31 = vmul.f32 0.2, %v3893_v51 }
 0xb41   :  { %5111 = vmatprep.subr.mxu1 %v4379_v14  ;;  %5071 = vmatprep.subr.mxu0 %v4345_v52  ;;  %v9148_v40 = vsel %vm3907_vm14, %v3891_v53, %v3923_v38  ;;  %vm10124_vm14 = vmmov %vm10122_vm2 }
 0xb42   :  { %5112 = vmatpush3.msra.mxu1 %v4363_v30  ;;  %5072 = vmatpush3.msra.mxu0 %v4329_v58  ;;  %v9160_v47 = vsel %vm3909_vm15, %v3893_v51, %v3925_v31  ;;  %vm10125_vm15 = vmmov %vm10122_vm2 }
 0xb43   :  { %4232 = vrot.lane.b32.xlu0 %v8821_v41, %s5390_s21  ;;  %4134 = vrot.lane.b32.xlu1 %v8873_v29, %s5391_s22 }
 0xb44   :  { %5113 = vmatprep.subr.mxu1 %v4378_v0  ;;  %5073 = vmatprep.subr.mxu0 %v4344_v54 }
 0xb45   :  { %5114 = vmatpush3.msra.mxu1 %v4362_v6  ;;  %5074 = vmatpush3.msra.mxu0 %v4328_v34 }
 0xb46   :  { %5115 = vmatprep.subr.mxu1 %v4377_v16  ;;  %5075 = vmatprep.subr.mxu0 %v4343_v55 }
 0xb47   :  { %4236 = vrot.lane.b32.xlu0 %v8850_v19, %s5390_s21  ;;  %4234 = vrot.lane.b32.xlu1 %v8819_v9, %s5390_s21 }
 0xb48   :  { %5116 = vmatpush3.msra.mxu1 %v4361_v23  ;;  %5076 = vmatpush3.msra.mxu0 %v4327_v28 }
 0xb49   :  { %5117 = vmatprep.subr.mxu1 %v4376_v62  ;;  %5077 = vmatprep.subr.mxu0 %v4342_v4 }
 0xb4a   :  { %5118 = vmatpush3.msra.mxu1 %v4360_v15  ;;  %5078 = vmatpush3.msra.mxu0 %v4326_v8 }
 0xb4b   :  { %4230 = vrot.lane.b32.xlu0 %v8873_v29, %s5390_s21  ;;  %4238 = vrot.lane.b32.xlu1 %v8852_v18, %s5390_s21 }
 0xb4c   :  { %5119 = vmatprep.subr.mxu1 %v4375_v1  ;;  %5135 = vmatprep.subr.mxu0 %v4604_v33 }
 0xb4d   :  { %5120 = vmatpush3.msra.mxu1 %v4359_v35 }
 0xb4e   :  { %5121 = vmatprep.subr.mxu1 %v4374_v21 }
 0xb4f   :  { %3954 = vrot.lane.b32.xlu0 %v9059_v49, %s5393_s24  ;;  %3952 = vrot.lane.b32.xlu1 %v9061_v27, %s5393_s24 }
 0xb50   :  { %5122 = vmatpush3.msra.mxu1 %v4358_v50 }
 0xb51   :  { %5179 = vmatprep.subr.mxu1 %v4636_v39 }
 0xb53   :  { %3958 = vrot.lane.b32.xlu0 %v9076_v7, %s5393_s24  ;;  %3956 = vrot.lane.b32.xlu1 %v9078_v44, %s5393_s24 }
 0xb57   :  { %4050 = vrot.lane.b32.xlu0 %v9059_v49, %s5392_s23  ;;  %4048 = vrot.lane.b32.xlu1 %v9061_v27, %s5392_s23 }
 0xb5b   :  { %4054 = vrot.lane.b32.xlu0 %v9076_v7, %s5392_s23  ;;  %4052 = vrot.lane.b32.xlu1 %v9078_v44, %s5392_s23 }
 0xb5f   :  { %3962 = vrot.lane.b32.xlu0 %v9100_v59, %s5393_s24  ;;  %3960 = vrot.lane.b32.xlu1 %v9102_v25, %s5393_s24 }
 0xb63   :  { %3966 = vrot.lane.b32.xlu0 %v9108_v2, %s5393_s24  ;;  %3964 = vrot.lane.b32.xlu1 %v9110_v36, %s5393_s24 }
 0xb67   :  { %4146 = vrot.lane.b32.xlu0 %v9059_v49, %s5391_s22  ;;  %4144 = vrot.lane.b32.xlu1 %v9061_v27, %s5391_s22 }
 0xb6b   :  { %4150 = vrot.lane.b32.xlu0 %v9076_v7, %s5391_s22  ;;  %4148 = vrot.lane.b32.xlu1 %v9078_v44, %s5391_s22 }
 0xb6f   :  { %4058 = vrot.lane.b32.xlu0 %v9100_v59, %s5392_s23  ;;  %4056 = vrot.lane.b32.xlu1 %v9102_v25, %s5392_s23 }
 0xb73   :  { %4062 = vrot.lane.b32.xlu0 %v9108_v2, %s5392_s23  ;;  %4060 = vrot.lane.b32.xlu1 %v9110_v36, %s5392_s23 }
 0xb77   :  { %4242 = vrot.lane.b32.xlu0 %v9059_v49, %s5390_s21  ;;  %4240 = vrot.lane.b32.xlu1 %v9061_v27, %s5390_s21 }
 0xb7b   :  { %4246 = vrot.lane.b32.xlu0 %v9076_v7, %s5390_s21  ;;  %4244 = vrot.lane.b32.xlu1 %v9078_v44, %s5390_s21 }
 0xb7f   :  { %3970 = vrot.lane.b32.xlu0 %v9146_v43, %s5393_s24  ;;  %3968 = vrot.lane.b32.xlu1 %v9148_v40, %s5393_s24 }
 0xb83   :  { %4152 = vrot.lane.b32.xlu0 %v9102_v25, %s5391_s22  ;;  %3972 = vrot.lane.b32.xlu1 %v9160_v47, %s5393_s24 }
 0xb87   :  { %4156 = vrot.lane.b32.xlu0 %v9110_v36, %s5391_s22  ;;  %4154 = vrot.lane.b32.xlu1 %v9100_v59, %s5391_s22 }
 0xb8b   :  { %4064 = vrot.lane.b32.xlu0 %v9148_v40, %s5392_s23  ;;  %4158 = vrot.lane.b32.xlu1 %v9108_v2, %s5391_s22 }
 0xb8f   :  { %4068 = vrot.lane.b32.xlu0 %v9160_v47, %s5392_s23  ;;  %4066 = vrot.lane.b32.xlu1 %v9146_v43, %s5392_s23 }
 0xb93   :  { %4250 = vrot.lane.b32.xlu0 %v9100_v59, %s5390_s21  ;;  %4248 = vrot.lane.b32.xlu1 %v9102_v25, %s5390_s21 }
 0xb97   :  { %4254 = vrot.lane.b32.xlu0 %v9108_v2, %s5390_s21  ;;  %4252 = vrot.lane.b32.xlu1 %v9110_v36, %s5390_s21 }
 0xb99   :  { %v3947_v14 = vpop.permute.xlu1 %3946  ;;  %v3945_v5 = vpop.permute.xlu0 %3944 }
 0xb9a   :  { %v3987_v16 = vsel %vm10118_vm0, %v3945_v5, %v3947_v14 }
 0xb9b   :  { %4162 = vrot.lane.b32.xlu0 %v9146_v43, %s5391_s22  ;;  %4160 = vrot.lane.b32.xlu1 %v9148_v40, %s5391_s22  ;;  %vm3991_vm4 = vcmp.gt.f32.partialorder %v3987_v16, %v8821_v41 }
 0xb9c   :  { %v4007_v3 = vsel %vm3991_vm4, %v3987_v16, %v8821_v41  ;;  %v4023_v12 = vsel %vm3991_vm4, 1.0, %v10066_v46 }
 0xb9d   :  { %v3949_v30 = vpop.permute.xlu1 %3948  ;;  %v9190_v63 = vpop.permute.xlu0 %3950 }
 0xb9e   :  { %v3986_v54 = vsel %vm10119_vm3, %v3947_v14, %v3949_v30  ;;  %v3985_v62 = vsel %vm10120_vm6, %v3949_v30, %v9190_v63 }
 0xb9f   :  { %4256 = vrot.lane.b32.xlu0 %v9148_v40, %s5390_s21  ;;  %4164 = vrot.lane.b32.xlu1 %v9160_v47, %s5391_s22  ;;  %vm3992_vm5 = vcmp.gt.f32.partialorder %v3986_v54, %v8819_v9  ;;  %vm3993_vm8 = vcmp.gt.f32.partialorder %v3985_v62, %v8850_v19 }
 0xba0   :  { %v4008_v28 = vsel %vm3992_vm5, %v3986_v54, %v8819_v9  ;;  %v4009_v8 = vsel %vm3993_vm8, %v3985_v62, %v8850_v19  ;;  %v4024_v13 = vsel %vm3992_vm5, 1.0, %v10066_v46  ;;  %v4025_v24 = vsel %vm3993_vm8, 1.0, %v10066_v46 }
 0xba1   :  { %v4041_v0 = vpop.permute.xlu0 %4040  ;;  %v9196_v52 = vpop.permute.xlu1 %3942 }
 0xba2   :  { %v3988_v57 = vsel %vm10121_vm7, %v9196_v52, %v3945_v5 }
 0xba3   :  { %4260 = vrot.lane.b32.xlu0 %v9160_v47, %s5390_s21  ;;  %4258 = vrot.lane.b32.xlu1 %v9146_v43, %s5390_s21  ;;  %vm3990_vm1 = vcmp.gt.f32.partialorder %v3988_v57, %v8873_v29 }
 0xba4   :  { %v4006_v48 = vsel %vm3990_vm1, %v3988_v57, %v8873_v29  ;;  %v4022_v11 = vsel %vm3990_vm1, 1.0, %v10066_v46 }
 0xba5   :  { %v4045_v6 = vpop.permute.xlu0 %4044  ;;  %v4043_v10 = vpop.permute.xlu1 %4042 }
 0xba6   :  { %v4083_v32 = vsel %vm10122_vm2, %v4041_v0, %v4043_v10  ;;  %v4082_v22 = vsel %vm10123_vm13, %v4043_v10, %v4045_v6 }
 0xba7   :  { %vm4087_vm10 = vcmp.gt.f32.partialorder %v4083_v32, %v4007_v3  ;;  %vm4088_vm12 = vcmp.gt.f32.partialorder %v4082_v22, %v4008_v28 }
 0xba8   :  { %v4103_v21 = vsel %vm4087_vm10, %v4083_v32, %v4007_v3  ;;  %v4104_v20 = vsel %vm4088_vm12, %v4082_v22, %v4008_v28  ;;  %v4119_v19 = vsel %vm4087_vm10, 2.0, %v4023_v12  ;;  %v4120_v33 = vsel %vm4088_vm12, 2.0, %v4024_v13  ;;  %v4588_v22 = vld [vmem:[%s10039_s8 + $0x78] sm:$0xff]  ;;  %v4602_v12 = vld [vmem:[%s10039_s8 + $0xe8] sm:$0xff] }
 0xba9   :  { %v9202_v61 = vpop.permute.xlu0 %4038  ;;  %v9204_v58 = vpop.permute.xlu1 %4046  ;;  %v4634_v13 = vld [vmem:[%s10039_s8 + $0x1e8] sm:$0xff]  ;;  %vm10126_vm10 = vcmp.lt.s32.totalorder %v5604_v37, 127 }
 0xbaa   :  { %v4084_v1 = vsel %vm10124_vm14, %v9202_v61, %v4041_v0  ;;  %v4081_v4 = vsel %vm10125_vm15, %v4045_v6, %v9204_v58  ;;  %vm10127_vm12 = vmmov %vm10126_vm10 }
 0xbab   :  { %vm4086_vm0 = vcmp.gt.f32.partialorder %v4084_v1, %v4006_v48  ;;  %vm4089_vm3 = vcmp.gt.f32.partialorder %v4081_v4, %v4009_v8 }
 0xbac   :  { %v4105_v9 = vsel %vm4089_vm3, %v4081_v4, %v4009_v8  ;;  %v4102_v17 = vsel %vm4086_vm0, %v4084_v1, %v4006_v48  ;;  %v4118_v30 = vsel %vm4086_vm0, 2.0, %v4022_v11  ;;  %v4121_v16 = vsel %vm4089_vm3, 2.0, %v4025_v24  ;;  %v4620_v1 = vld [vmem:[%s10039_s8 + $0x178] sm:$0xff]  ;;  %v4603_v4 = vld [vmem:[%s10039_s8 + $0xf0] sm:$0xff]  ;;  %v4586_v24 = vld [vmem:[%s10039_s8 + $0x68] sm:$0xff] }
 0xbad   :  { %v4139_v23 = vpop.permute.xlu0 %4138  ;;  %v4137_v34 = vpop.permute.xlu1 %4136  ;;  %v4618_v11 = vld [vmem:[%s10039_s8 + $0x168] sm:$0xff]  ;;  %vm10128_vm0 = vmmov %vm10126_vm10 }
 0xbae   :  { %v4179_v35 = vsel %vm1037_vm11, %v4137_v34, %v4139_v23  ;;  %vm10129_vm3 = vmmov %vm10128_vm0 }
 0xbaf   :  { %vm4183_vm6 = vcmp.gt.f32.partialorder %v4179_v35, %v4103_v21 }
 0xbb0   :  { %v4199_v42 = vsel %vm4183_vm6, %v4179_v35, %v4103_v21  ;;  %v4215_v31 = vsel %vm4183_vm6, 3.0, %v4119_v19  ;;  %v4635_v21 = vld [vmem:[%s10039_s8 + $0x1f0] sm:$0xff]  ;;  %v4600_v19 = vld [vmem:[%s10039_s8 + $0xd8] sm:$0xff]  ;;  %vm10130_vm6 = vcmp.lt.s32.totalorder %v5604_v37, 126 }
 0xbb1   :  { %v9225_v55 = vpop.permute.xlu0 %4142  ;;  %v4141_v15 = vpop.permute.xlu1 %4140 }
 0xbb2   :  { %v4178_v26 = vsel %vm1037_vm11, %v4139_v23, %v4141_v15  ;;  %v4177_v60 = vsel %vm1037_vm11, %v4141_v15, %v9225_v55 }
 0xbb3   :  { %vm4184_vm7 = vcmp.gt.f32.partialorder %v4178_v26, %v4104_v20  ;;  %vm4185_vm4 = vcmp.gt.f32.partialorder %v4177_v60, %v4105_v9 }
 0xbb4   :  { %v4200_v29 = vsel %vm4184_vm7, %v4178_v26, %v4104_v20  ;;  %v4216_v0 = vsel %vm4184_vm7, 3.0, %v4120_v33  ;;  %v4201_v62 = vsel %vm4185_vm4, %v4177_v60, %v4105_v9  ;;  %v4217_v32 = vsel %vm4185_vm4, 3.0, %v4121_v16  ;;  %v4619_v20 = vld [vmem:[%s10039_s8 + $0x170] sm:$0xff]  ;;  %v4601_v60 = vld [vmem:[%s10039_s8 + $0xe0] sm:$0xff]  ;;  %v4598_v16 = vld [vmem:[%s10039_s8 + $0xc8] sm:$0xff] }
 0xbb5   :  { %v4233_v50 = vpop.permute.xlu0 %4232  ;;  %v9249_v45 = vpop.permute.xlu1 %4134  ;;  %vm10131_vm7 = vmmov %vm10130_vm6 }
 0xbb6   :  { %v4180_v41 = vsel %vm1037_vm11, %v9249_v45, %v4137_v34 }
 0xbb7   :  { %vm4182_vm5 = vcmp.gt.f32.partialorder %v4180_v41, %v4102_v17 }
 0xbb8   :  { %v4198_v54 = vsel %vm4182_vm5, %v4180_v41, %v4102_v17  ;;  %v4214_v57 = vsel %vm4182_vm5, 3.0, %v4118_v30  ;;  %v4633_v17 = vld [vmem:[%s10039_s8 + $0x1e0] sm:$0xff]  ;;  %v4583_v30 = vld [vmem:[%s10039_s8 + $0x50] sm:$0xff] }
 0xbb9   :  { %v4237_v56 = vpop.permute.xlu0 %4236  ;;  %v4235_v53 = vpop.permute.xlu1 %4234 }
 0xbba   :  { %v4274_v38 = vsel %vm1086_vm9, %v4235_v53, %v4237_v56  ;;  %v4275_v51 = vsel %vm1086_vm9, %v4233_v50, %v4235_v53  ;;  %v4617_v53 = vld [vmem:[%s10039_s8 + $0x160] sm:$0xff] }
 0xbbb   :  { %vm4280_vm2 = vcmp.gt.f32.partialorder %v4274_v38, %v4200_v29  ;;  %vm4279_vm13 = vcmp.gt.f32.partialorder %v4275_v51, %v4199_v42 }
 0xbbc   :  { %v9282_v39 = vsel %vm4280_vm2, %v4274_v38, %v4200_v29  ;;  %v4311_v14 = vsel %vm4279_vm13, 4.0, %v4215_v31  ;;  %v9284_v5 = vsel %vm4279_vm13, %v4275_v51, %v4199_v42  ;;  %v4312_v8 = vsel %vm4280_vm2, 4.0, %v4216_v0  ;;  %v4632_v42 = vld [vmem:[%s10039_s8 + $0x1d8] sm:$0xff]  ;;  %v4599_v51 = vld [vmem:[%s10039_s8 + $0xd0] sm:$0xff] }
 0xbbd   :  { %v9288_v6 = vpop.permute.xlu0 %4230  ;;  %4454 = vmatprep.mubr.f32.mxu0 %v4311_v14  ;;  %v9290_v10 = vpop.permute.xlu1 %4238  ;;  %v4584_v29 = vld [vmem:[%s10039_s8 + $0x58] sm:$0xff]  ;;  %v4631_v14 = vld [vmem:[%s10039_s8 + $0x1d0] sm:$0xff] }
 0xbbe   :  { %v4276_v23 = vsel %vm1086_vm9, %v9288_v6, %v4233_v50  ;;  %v4273_v34 = vsel %vm1086_vm9, %v4237_v56, %v9290_v10  ;;  %v4587_v50 = vld [vmem:[%s10039_s8 + $0x70] sm:$0xff]  ;;  %v4585_v56 = vld [vmem:[%s10039_s8 + $0x60] sm:$0xff]  ;;  %v4616_v38 = vld [vmem:[%s10039_s8 + $0x158] sm:$0xff] }
 0xbbf   :  { %vm4278_vm8 = vcmp.gt.f32.partialorder %v4276_v23, %v4198_v54  ;;  %vm4281_vm1 = vcmp.gt.f32.partialorder %v4273_v34, %v4201_v62  ;;  %v4615_v0 = vld [vmem:[%s10039_s8 + $0x150] sm:$0xff] }
 0xbc0   :  { %v9306_v3 = vsel %vm4278_vm8, %v4276_v23, %v4198_v54  ;;  %v4310_v15 = vsel %vm4278_vm8, 4.0, %v4214_v57  ;;  %v4313_v28 = vsel %vm4281_vm1, 4.0, %v4217_v32  ;;  %v9314_v35 = vsel %vm4281_vm1, %v4273_v34, %v4201_v62  ;;  %v4630_v54 = vld [vmem:[%s10039_s8 + $0x1c8] sm:$0xff]  ;;  %v4597_v62 = vld [vmem:[%s10039_s8 + $0xc0] sm:$0xff]  ;;  %vm10132_vm8 = vmmov %vm10130_vm6 }
 0xbc1   :  { %v9316_v26 = vpop.permute.xlu0 %3954  ;;  %4455 = vmatmul.mubr.f32.vlgmr.msra.gmra.mxu0 %v4310_v15  ;;  %4539 = vmatprep.mubr.f32.mxu1 %v4313_v28  ;;  %v9318_v48 = vpop.permute.xlu1 %3952  ;;  %v4582_v23 = vld [vmem:[%s10039_s8 + $0x48] sm:$0xff]  ;;  %v4581_v15 = vld [vmem:[%s10039_s8 + $0x40] sm:$0xff]  ;;  %vm10133_vm1 = vmmov %vm10130_vm6 }
 0xbc2   :  { %4540 = vmatmul.mubr.f32.vlgmr.msra.gmra.mxu1 %v4312_v8  ;;  %5136 = vmatpush3.msra.mxu0 %v4588_v22  ;;  %v4614_v34 = vld [vmem:[%s10039_s8 + $0x148] sm:$0xff]  ;;  %v4629_v22 = vld [vmem:[%s10039_s8 + $0x1c0] sm:$0xff]  ;;  %v4580_v8 = vld [vmem:[%s10039_s8 + $0x38] sm:$0xff] }
 0xbc3   :  { %5180 = vmatpush3.msra.mxu1 %v4620_v1  ;;  %5137 = vmatprep.subr.mxu0 %v4603_v4  ;;  %v4613_v28 = vld [vmem:[%s10039_s8 + $0x140] sm:$0xff]  ;;  %v4596_v1 = vld [vmem:[%s10039_s8 + $0xb8] sm:$0xff] }
 0xbc4   :  { %5181 = vmatprep.subr.mxu1 %v4635_v21  ;;  %5138 = vmatpush3.msra.mxu0 %v4587_v50  ;;  %v4628_v4 = vld [vmem:[%s10039_s8 + $0x1b8] sm:$0xff]  ;;  %v4595_v50 = vld [vmem:[%s10039_s8 + $0xb0] sm:$0xff] }
 0xbc5   :  { %v9345_v41 = vpop.permute.xlu0 %3958  ;;  %v9347_v9 = vpop.permute.xlu1 %3956  ;;  %5182 = vmatpush3.msra.mxu1 %v4619_v20  ;;  %5139 = vmatprep.subr.mxu0 %v4602_v12  ;;  %v4612_v21 = vld [vmem:[%s10039_s8 + $0x138] sm:$0xff] }
 0xbc6   :  { %5183 = vmatprep.subr.mxu1 %v4634_v13  ;;  %5140 = vmatpush3.msra.mxu0 %v4586_v24  ;;  %v4627_v13 = vld [vmem:[%s10039_s8 + $0x1b0] sm:$0xff] }
 0xbc7   :  { %5184 = vmatpush3.msra.mxu1 %v4618_v11  ;;  %5141 = vmatprep.subr.mxu0 %v4601_v60  ;;  %v4579_v24 = vld [vmem:[%s10039_s8 + $0x30] sm:$0xff]  ;;  %v4594_v60 = vld [vmem:[%s10039_s8 + $0xa8] sm:$0xff] }
 0xbc8   :  { %5185 = vmatprep.subr.mxu1 %v4633_v17  ;;  %5142 = vmatpush3.msra.mxu0 %v4585_v56  ;;  %v4611_v11 = vld [vmem:[%s10039_s8 + $0x130] sm:$0xff]  ;;  %v4626_v17 = vld [vmem:[%s10039_s8 + $0x1a8] sm:$0xff] }
 0xbc9   :  { %v9373_v31 = vpop.permute.xlu0 %4050  ;;  %v9375_v33 = vpop.permute.xlu1 %4048  ;;  %5186 = vmatpush3.msra.mxu1 %v4617_v53  ;;  %5143 = vmatprep.subr.mxu0 %v4600_v19  ;;  %v4578_v56 = vld [vmem:[%s10039_s8 + $0x28] sm:$0xff]  ;;  %v4593_v19 = vld [vmem:[%s10039_s8 + $0xa0] sm:$0xff] }
 0xbca   :  { %5187 = vmatprep.subr.mxu1 %v4632_v42  ;;  %5144 = vmatpush3.msra.mxu0 %v4584_v29  ;;  %v4610_v53 = vld [vmem:[%s10039_s8 + $0x128] sm:$0xff] }
 0xbcb   :  { %5188 = vmatpush3.msra.mxu1 %v4616_v38  ;;  %5145 = vmatprep.subr.mxu0 %v4599_v51  ;;  %v4625_v38 = vld [vmem:[%s10039_s8 + $0x1a0] sm:$0xff] }
 0xbcc   :  { %5189 = vmatprep.subr.mxu1 %v4631_v14  ;;  %5146 = vmatpush3.msra.mxu0 %v4583_v30  ;;  %v4577_v51 = vld [vmem:[%s10039_s8 + $0x20] sm:$0xff]  ;;  %v4592_v30 = vld [vmem:[%s10039_s8 + $0x98] sm:$0xff] }
 0xbcd   :  { %v9401_v57 = vpop.permute.xlu0 %4054  ;;  %v9403_v32 = vpop.permute.xlu1 %4052  ;;  %5190 = vmatpush3.msra.mxu1 %v4615_v0  ;;  %5147 = vmatprep.subr.mxu0 %v4598_v16  ;;  %v4609_v14 = vld [vmem:[%s10039_s8 + $0x120] sm:$0xff]  ;;  %v4624_v0 = vld [vmem:[%s10039_s8 + $0x198] sm:$0xff] }
 0xbce   :  { %5191 = vmatprep.subr.mxu1 %v4630_v54  ;;  %5148 = vmatpush3.msra.mxu0 %v4582_v23  ;;  %v4576_v16 = vld [vmem:[%s10039_s8 + $0x18] sm:$0xff]  ;;  %v4591_v23 = vld [vmem:[%s10039_s8 + $0x90] sm:$0xff] }
 0xbcf   :  { %5192 = vmatpush3.msra.mxu1 %v4614_v34  ;;  %5149 = vmatprep.subr.mxu0 %v4597_v62  ;;  %v4608_v54 = vld [vmem:[%s10039_s8 + $0x118] sm:$0xff] }
 0xbd0   :  { %5193 = vmatprep.subr.mxu1 %v4629_v22  ;;  %5150 = vmatpush3.msra.mxu0 %v4581_v15  ;;  %v4623_v22 = vld [vmem:[%s10039_s8 + $0x190] sm:$0xff] }
 0xbd1   :  { %v9429_v20 = vpop.permute.xlu0 %3962  ;;  %v9431_v12 = vpop.permute.xlu1 %3960  ;;  %5194 = vmatpush3.msra.mxu1 %v4613_v28  ;;  %5151 = vmatprep.subr.mxu0 %v4596_v1  ;;  %v4575_v15 = vld [vmem:[%s10039_s8 + $0x10] sm:$0xff]  ;;  %v4590_v1 = vld [vmem:[%s10039_s8 + $0x88] sm:$0xff] }
 0xbd2   :  { %5195 = vmatprep.subr.mxu1 %v4628_v4  ;;  %5152 = vmatpush3.msra.mxu0 %v4580_v8  ;;  %v4607_v28 = vld [vmem:[%s10039_s8 + $0x110] sm:$0xff]  ;;  %v3983_v4 = vsel %vm10126_vm10, %v9318_v48, %v9316_v26  ;;  %v3984_v8 = vsel %vm10127_vm12, %v9190_v63, %v9318_v48  ;;  %v4589_v63 = vld [vmem:[%s10039_s8 + $0x80] sm:$0xff] }
 0xbd3   :  { %5196 = vmatpush3.msra.mxu1 %v4612_v21  ;;  %5153 = vmatprep.subr.mxu0 %v4595_v50  ;;  %v4622_v21 = vld [vmem:[%s10039_s8 + $0x188] sm:$0xff]  ;;  %vm3994_vm14 = vcmp.gt.f32.partialorder %v3984_v8, %v8852_v18  ;;  %vm3995_vm15 = vcmp.gt.f32.partialorder %v3983_v4, %v9061_v27 }
 0xbd4   :  { %5197 = vmatprep.subr.mxu1 %v4627_v13  ;;  %5154 = vmatpush3.msra.mxu0 %v4579_v24  ;;  %v4574_v50 = vld [vmem:[%s10039_s8 + $0x8] sm:$0xff] }
 0xbd5   :  { %v9457_v42 = vpop.permute.xlu0 %3966  ;;  %v9459_v29 = vpop.permute.xlu1 %3964  ;;  %5198 = vmatpush3.msra.mxu1 %v4611_v11  ;;  %5155 = vmatprep.subr.mxu0 %v4594_v60  ;;  %v4606_v13 = vld [vmem:[%s10039_s8 + $0x108] sm:$0xff]  ;;  %v4621_v11 = vld [vmem:[%s10039_s8 + $0x180] sm:$0xff] }
 0xbd6   :  { %5199 = vmatprep.subr.mxu1 %v4626_v17  ;;  %5156 = vmatpush3.msra.mxu0 %v4578_v56  ;;  %v4573_v60 = vld [vmem:[%s10039_s8] sm:$0xff]  ;;  %v3981_v56 = vsel %vm10128_vm0, %v9347_v9, %v9345_v41 }
 0xbd7   :  { %5200 = vmatpush3.msra.mxu1 %v4610_v53  ;;  %5157 = vmatprep.subr.mxu0 %v4593_v19  ;;  %v4605_v17 = vld [vmem:[%s10039_s8 + $0x100] sm:$0xff]  ;;  %v3982_v53 = vsel %vm10129_vm3, %v9316_v26, %v9347_v9  ;;  %v4079_v19 = vsel %vm10130_vm6, %v9375_v33, %v9373_v31  ;;  %vm3997_vm5 = vcmp.gt.f32.partialorder %v3981_v56, %v9078_v44 }
 0xbd8   :  { %5201 = vmatprep.subr.mxu1 %v4625_v38  ;;  %5158 = vmatpush3.msra.mxu0 %v4577_v51  ;;  %v4080_v38 = vsel %vm10131_vm7, %v9204_v58, %v9375_v33  ;;  %v4011_v51 = vsel %vm3995_vm15, %v3983_v4, %v9061_v27  ;;  %vm3996_vm4 = vcmp.gt.f32.partialorder %v3982_v53, %v9059_v49 }
 0xbd9   :  { %v9485_v34 = vpop.permute.xlu0 %4146  ;;  %v4145_v62 = vpop.permute.xlu1 %4144  ;;  %5202 = vmatpush3.msra.mxu1 %v4609_v14  ;;  %5159 = vmatprep.subr.mxu0 %v4592_v30  ;;  %v4010_v58 = vsel %vm3994_vm14, %v3984_v8, %v8852_v18  ;;  %vm4091_vm2 = vcmp.gt.f32.partialorder %v4079_v19, %v4011_v51  ;;  %v4077_v9 = vsel %vm10132_vm8, %v9403_v32, %v9401_v57 }
 0xbda   :  { %5203 = vmatprep.subr.mxu1 %v4624_v0  ;;  %5160 = vmatpush3.msra.mxu0 %v4576_v16  ;;  %vm4090_vm13 = vcmp.gt.f32.partialorder %v4080_v38, %v4010_v58  ;;  %v4078_v33 = vsel %vm10133_vm1, %v9373_v31, %v9403_v32  ;;  %v4175_v30 = vsel %vm1037_vm11, %v4145_v62, %v9485_v34 }
 0xbdb   :  { %5204 = vmatpush3.msra.mxu1 %v4608_v54  ;;  %5161 = vmatprep.subr.mxu0 %v4591_v23  ;;  %v4176_v0 = vsel %vm1037_vm11, %v9225_v55, %v4145_v62  ;;  %v4012_v16 = vsel %vm3996_vm4, %v3982_v53, %v9059_v49  ;;  %v4013_v54 = vsel %vm3997_vm5, %v3981_v56, %v9078_v44  ;;  %v4026_v55 = vsel %vm3994_vm14, 1.0, %v10066_v46 }
 0xbdc   :  { %5205 = vmatprep.subr.mxu1 %v4623_v22  ;;  %5162 = vmatpush3.msra.mxu0 %v4575_v15  ;;  %v4107_v23 = vsel %vm4091_vm2, %v4079_v19, %v4011_v51  ;;  %vm4092_vm10 = vcmp.gt.f32.partialorder %v4078_v33, %v4012_v16  ;;  %vm4093_vm12 = vcmp.gt.f32.partialorder %v4077_v9, %v4013_v54  ;;  %v4027_v62 = vsel %vm3995_vm15, 1.0, %v10066_v46 }
 0xbdd   :  { %v9519_v48 = vpop.permute.xlu0 %4150  ;;  %v4149_v24 = vpop.permute.xlu1 %4148  ;;  %5206 = vmatpush3.msra.mxu1 %v4607_v28  ;;  %5163 = vmatprep.subr.mxu0 %v4590_v1  ;;  %v4106_v32 = vsel %vm4090_vm13, %v4080_v38, %v4010_v58  ;;  %vm4187_vm0 = vcmp.gt.f32.partialorder %v4175_v30, %v4107_v23  ;;  %v4123_v1 = vsel %vm4091_vm2, 2.0, %v4027_v62  ;;  %v4108_v18 = vsel %vm4092_vm10, %v4078_v33, %v4012_v16 }
 0xbde   :  { %5207 = vmatprep.subr.mxu1 %v4622_v21  ;;  %5164 = vmatpush3.msra.mxu0 %v4574_v50  ;;  %vm4186_vm3 = vcmp.gt.f32.partialorder %v4176_v0, %v4106_v32  ;;  %v4173_v15 = vsel %vm1037_vm11, %v4149_v24, %v9519_v48  ;;  %v4174_v28 = vsel %vm1037_vm11, %v9485_v34, %v4149_v24  ;;  %v4122_v21 = vsel %vm4090_vm13, 2.0, %v4026_v55 }
 0xbdf   :  { %5208 = vmatpush3.msra.mxu1 %v4606_v13  ;;  %5165 = vmatprep.subr.mxu0 %v4589_v63  ;;  %v4109_v8 = vsel %vm4093_vm12, %v4077_v9, %v4013_v54  ;;  %v9604_v4 = vsel %vm4187_vm0, %v4175_v30, %v4107_v23  ;;  %v4219_v13 = vsel %vm4187_vm0, 3.0, %v4123_v1  ;;  %v9615_v24 = vsel %vm4186_vm3, %v4176_v0, %v4106_v32 }
 0xbe0   :  { %5209 = vmatprep.subr.mxu1 %v4621_v11  ;;  %5166 = vmatpush3.msra.mxu0 %v4573_v60  ;;  %v4218_v11 = vsel %vm4186_vm3, 3.0, %v4122_v21  ;;  %vm4188_vm14 = vcmp.gt.f32.partialorder %v4174_v28, %v4108_v18  ;;  %vm4189_vm15 = vcmp.gt.f32.partialorder %v4173_v15, %v4109_v8  ;;  %v4028_v60 = vsel %vm3996_vm4, 1.0, %v10066_v46 }
 0xbe1   :  { %v9551_v14 = vpop.permute.xlu0 %4058  ;;  %v9553_v26 = vpop.permute.xlu1 %4056  ;;  %5210 = vmatpush3.msra.mxu1 %v4605_v17  ;;  %5245 = vmatprep.subr.mxu0 %v10066_v46  ;;  %v4124_v49 = vsel %vm4092_vm10, 2.0, %v4028_v60  ;;  %v9647_v53 = vsel %vm4189_vm15, %v4173_v15, %v4109_v8  ;;  %v9650_v30 = vsel %vm4188_vm14, %v4174_v28, %v4108_v18  ;;  %vm10134_vm2 = vcmp.lt.s32.totalorder %v5604_v37, 127 }
 0xbe2   :  { %5256 = vmatprep.subr.mxu1 %v10066_v46  ;;  %v4220_v33 = vsel %vm4188_vm14, 3.0, %v4124_v49  ;;  %v3979_v62 = vsel %vm10134_vm2, %v9431_v12, %v9429_v20  ;;  %vm10135_vm13 = vmmov %vm10134_vm2  ;;  %vm10138_vm3 = vcmp.lt.s32.totalorder %v5604_v37, 126 }
 0xbe3   :  { %v3980_v15 = vsel %vm10135_vm13, %v9345_v41, %v9431_v12  ;;  %vm10136_vm8 = vmmov %vm10134_vm2  ;;  %v4075_v41 = vsel %vm10138_vm3, %v9553_v26, %v9551_v14 }
 0xbe4   :  { %v3978_v28 = vsel %vm10136_vm8, %v9429_v20, %v9459_v29  ;;  %vm10137_vm1 = vmmov %vm10134_vm2  ;;  %vm3998_vm10 = vcmp.gt.f32.partialorder %v3980_v15, %v9076_v7 }
 0xbe5   :  { %v9583_v22 = vpop.permute.xlu0 %4062  ;;  %v9585_v31 = vpop.permute.xlu1 %4060  ;;  %v3977_v1 = vsel %vm10137_vm1, %v9459_v29, %v9457_v42  ;;  %vm4000_vm0 = vcmp.gt.f32.partialorder %v3978_v28, %v9100_v59  ;;  %vm10139_vm14 = vmmov %vm10138_vm3  ;;  %v4014_v29 = vsel %vm3998_vm10, %v3980_v15, %v9076_v7 }
 0xbe6   :  { %v4076_v20 = vsel %vm10139_vm14, %v9401_v57, %v9553_v26  ;;  %vm10140_vm2 = vmmov %vm10138_vm3  ;;  %v4030_v57 = vsel %vm3998_vm10, 1.0, %v10066_v46 }
 0xbe7   :  { %v4074_v12 = vsel %vm10140_vm2, %v9551_v14, %v9585_v31  ;;  %vm10141_vm13 = vmmov %vm10140_vm2  ;;  %vm4094_vm8 = vcmp.gt.f32.partialorder %v4076_v20, %v4014_v29  ;;  %v4016_v14 = vsel %vm4000_vm0, %v3978_v28, %v9100_v59 }
 0xbe8   :  { %vm4096_vm3 = vcmp.gt.f32.partialorder %v4074_v12, %v4016_v14  ;;  %v4110_v59 = vsel %vm4094_vm8, %v4076_v20, %v4014_v29  ;;  %v4126_v49 = vsel %vm4094_vm8, 2.0, %v4030_v57 }
 0xbe9   :  { %v4243_v50 = vpop.permute.xlu0 %4242  ;;  %v4241_v27 = vpop.permute.xlu1 %4240 }
 0xbea   :  { %v9608_v63 = vsel %vm1086_vm9, %v4241_v27, %v4243_v50  ;;  %v9613_v34 = vsel %vm1086_vm9, %v9290_v10, %v4241_v27  ;;  %v4029_v10 = vsel %vm3997_vm5, 1.0, %v10066_v46 }
 0xbeb   :  { %vm4283_vm6 = vcmp.gt.f32.partialorder %v9608_v63, %v9604_v4  ;;  %vm4282_vm7 = vcmp.gt.f32.partialorder %v9613_v34, %v9615_v24  ;;  %v4125_v58 = vsel %vm4093_vm12, 2.0, %v4029_v10  ;;  %vm3999_vm12 = vcmp.gt.f32.partialorder %v3979_v62, %v9102_v25 }
 0xbec   :  { %v4315_v17 = vsel %vm4283_vm6, 4.0, %v4219_v13  ;;  %v4314_v19 = vsel %vm4282_vm7, 4.0, %v4218_v11  ;;  %v4221_v9 = vsel %vm4189_vm15, 3.0, %v4125_v58  ;;  %vm4001_vm15 = vcmp.gt.f32.partialorder %v3977_v1, %v9110_v36 }
 0xbed   :  { %v9633_v38 = vpop.permute.xlu0 %4246  ;;  %4459 = vmatprep.mubr.f32.mxu0 %v4315_v17  ;;  %v4245_v51 = vpop.permute.xlu1 %4244  ;;  %v4015_v8 = vsel %vm3999_vm12, %v3979_v62, %v9102_v25  ;;  %v4031_v7 = vsel %vm3999_vm12, 1.0, %v10066_v46  ;;  %v4017_v25 = vsel %vm4001_vm15, %v3977_v1, %v9110_v36  ;;  %v4033_v11 = vsel %vm4001_vm15, 1.0, %v10066_v46 }
 0xbee   :  { %v9640_v44 = vsel %vm1086_vm9, %v4245_v51, %v9633_v38  ;;  %v9644_v56 = vsel %vm1086_vm9, %v4243_v50, %v4245_v51  ;;  %4460 = vmatmul.mubr.f32.gmra.mxu0 %v4314_v19  ;;  %v4073_v50 = vsel %vm10141_vm13, %v9585_v31, %v9583_v22  ;;  %vm4095_vm1 = vcmp.gt.f32.partialorder %v4075_v41, %v4015_v8 }
 0xbef   :  { %vm4285_vm4 = vcmp.gt.f32.partialorder %v9640_v44, %v9647_v53  ;;  %vm4284_vm5 = vcmp.gt.f32.partialorder %v9644_v56, %v9650_v30  ;;  %v4032_v31 = vsel %vm4000_vm0, 1.0, %v10066_v46  ;;  %vm4097_vm10 = vcmp.gt.f32.partialorder %v4073_v50, %v4017_v25 }
 0xbf0   :  { %v4317_v0 = vsel %vm4285_vm4, 4.0, %v4221_v9  ;;  %v4316_v16 = vsel %vm4284_vm5, 4.0, %v4220_v33  ;;  %vm10142_vm12 = vcmp.lt.s32.totalorder %v5604_v37, 127  ;;  %v4111_v17 = vsel %vm4095_vm1, %v4075_v41, %v4015_v8 }
 0xbf1   :  { %v3971_v54 = vpop.permute.xlu0 %3970  ;;  %4544 = vmatprep.mubr.f32.mxu1 %v4317_v0  ;;  %v3969_v23 = vpop.permute.xlu1 %3968  ;;  %vm10143_vm14 = vmmov %vm10142_vm12  ;;  %v4112_v51 = vsel %vm4096_vm3, %v4074_v12, %v4016_v14  ;;  %v4127_v58 = vsel %vm4095_vm1, 2.0, %v4031_v7  ;;  %v4113_v33 = vsel %vm4097_vm10, %v4073_v50, %v4017_v25 }
 0xbf2   :  { %4545 = vmatmul.mubr.f32.gmra.mxu1 %v4316_v16  ;;  %v9725_v10 = vsel %vm10142_vm12, %v3969_v23, %v3971_v54  ;;  %v4128_v16 = vsel %vm4096_vm3, 2.0, %v4032_v31  ;;  %vm10144_vm8 = vmmov %vm10142_vm12 }
 0xbf3   :  { %vm4003_vm13 = vcmp.gt.f32.partialorder %v9725_v10, %v9148_v40  ;;  %vm10145_vm1 = vmmov %vm10144_vm8 }
 0xbf4   :  { %v4019_v31 = vsel %vm4003_vm13, %v9725_v10, %v9148_v40 }
 0xbf5   :  { %v4153_v32 = vpop.permute.xlu0 %4152  ;;  %v3973_v55 = vpop.permute.xlu1 %3972 }
 0xbf6   :  { %v4172_v26 = vsel %vm1037_vm11, %v9519_v48, %v4153_v32  ;;  %v9730_v48 = vsel %vm10143_vm14, %v9457_v42, %v3969_v23  ;;  %v4129_v42 = vsel %vm4097_vm10, 2.0, %v4033_v11  ;;  %v3974_v23 = vsel %vm10144_vm8, %v3971_v54, %v3973_v55 }
 0xbf7   :  { %vm4190_vm0 = vcmp.gt.f32.partialorder %v4172_v26, %v4110_v59  ;;  %vm4002_vm2 = vcmp.gt.f32.partialorder %v9730_v48, %v9108_v2  ;;  %vm10146_vm8 = vcmp.lt.s32.totalorder %v5604_v37, 126 }
 0xbf8   :  { %v9753_v28 = vsel %vm4190_vm0, %v4172_v26, %v4110_v59  ;;  %v4222_v1 = vsel %vm4190_vm0, 3.0, %v4126_v49  ;;  %vm4004_vm0 = vcmp.gt.f32.partialorder %v3974_v23, %v9146_v43  ;;  %v4035_v49 = vsel %vm4003_vm13, 1.0, %v10066_v46 }
 0xbf9   :  { %v4157_v21 = vpop.permute.xlu0 %4156  ;;  %v4155_v18 = vpop.permute.xlu1 %4154  ;;  %v4020_v59 = vsel %vm4004_vm0, %v3974_v23, %v9146_v43 }
 0xbfa   :  { %v4171_v60 = vsel %vm1037_vm11, %v4153_v32, %v4155_v18  ;;  %v4170_v9 = vsel %vm1037_vm11, %v4155_v18, %v4157_v21  ;;  %v3989_v32 = vsel %vm10145_vm1, %v3973_v55, %v9196_v52  ;;  %vm10147_vm1 = vmmov %vm10146_vm8 }
 0xbfb   :  { %vm4191_vm15 = vcmp.gt.f32.partialorder %v4171_v60, %v4111_v17  ;;  %vm4192_vm10 = vcmp.gt.f32.partialorder %v4170_v9, %v4112_v51 }
 0xbfc   :  { %v9766_v18 = vsel %vm4191_vm15, %v4171_v60, %v4111_v17  ;;  %v4223_v52 = vsel %vm4191_vm15, 3.0, %v4127_v58  ;;  %vm4005_vm15 = vcmp.gt.f32.partialorder %v3989_v32, %v9160_v47  ;;  %v9790_v8 = vsel %vm4192_vm10, %v4170_v9, %v4112_v51 }
 0xbfd   :  { %v4065_v27 = vpop.permute.xlu0 %4064  ;;  %v9702_v13 = vpop.permute.xlu1 %4158  ;;  %v4224_v50 = vsel %vm4192_vm10, 3.0, %v4128_v16  ;;  %v4034_v58 = vsel %vm4002_vm2, 1.0, %v10066_v46  ;;  %v4036_v9 = vsel %vm4004_vm0, 1.0, %v10066_v46 }
 0xbfe   :  { %v4169_v0 = vsel %vm1037_vm11, %v4157_v21, %v9702_v13  ;;  %v4072_v20 = vsel %vm10146_vm8, %v9583_v22, %v4065_v27  ;;  %vm10148_vm8 = vmmov %vm10147_vm1 }
 0xbff   :  { %vm4193_vm3 = vcmp.gt.f32.partialorder %v4169_v0, %v4113_v33 }
 0xc00   :  { %v9804_v22 = vsel %vm4193_vm3, %v4169_v0, %v4113_v33  ;;  %v4225_v26 = vsel %vm4193_vm3, 3.0, %v4129_v42  ;;  %v4037_v42 = vsel %vm4005_vm15, 1.0, %v10066_v46 }
 0xc01   :  { %v4069_v19 = vpop.permute.xlu0 %4068  ;;  %v4067_v36 = vpop.permute.xlu1 %4066 }
 0xc02   :  { %v4071_v57 = vsel %vm10147_vm1, %v4065_v27, %v4067_v36  ;;  %v4070_v25 = vsel %vm10148_vm8, %v4067_v36, %v4069_v19 }
 0xc05   :  { %v4251_v62 = vpop.permute.xlu0 %4250  ;;  %v4249_v15 = vpop.permute.xlu1 %4248 }
 0xc06   :  { %v9758_v21 = vsel %vm1086_vm9, %v4249_v15, %v4251_v62  ;;  %v9763_v54 = vsel %vm1086_vm9, %v9633_v38, %v4249_v15  ;;  %v4018_v38 = vsel %vm4002_vm2, %v9730_v48, %v9108_v2 }
 0xc07   :  { %vm4287_vm12 = vcmp.gt.f32.partialorder %v9758_v21, %v9766_v18  ;;  %vm10059_vm14 = vcmp.gt.f32.partialorder %v9763_v54, %v9753_v28  ;;  %vm4098_vm3 = vcmp.gt.f32.partialorder %v4072_v20, %v4018_v38 }
 0xc08   :  { %v4319_v55 = vsel %vm4287_vm12, 4.0, %v4223_v52  ;;  %v4318_v41 = vsel %vm10059_vm14, 4.0, %v4222_v1  ;;  %vm10149_vm14 = vmmov %vm10148_vm8  ;;  %vm4100_vm8 = vcmp.gt.f32.partialorder %v4070_v25, %v4020_v59  ;;  %v4114_v33 = vsel %vm4098_vm3, %v4072_v20, %v4018_v38 }
 0xc09   :  { %v4255_v12 = vpop.permute.xlu0 %4254  ;;  %4464 = vmatprep.mubr.f32.mxu0 %v4319_v55  ;;  %v4253_v29 = vpop.permute.xlu1 %4252  ;;  %v4085_v27 = vsel %vm10149_vm14, %v4069_v19, %v9202_v61  ;;  %vm4099_vm14 = vcmp.gt.f32.partialorder %v4071_v57, %v4019_v31  ;;  %v4021_v19 = vsel %vm4005_vm15, %v3989_v32, %v9160_v47  ;;  %v4116_v48 = vsel %vm4100_vm8, %v4070_v25, %v4020_v59 }
 0xc0a   :  { %v9797_v14 = vsel %vm1086_vm9, %v4253_v29, %v4255_v12  ;;  %v9801_v7 = vsel %vm1086_vm9, %v4251_v62, %v4253_v29  ;;  %4465 = vmatmul.mubr.f32.gmra.mxu0 %v4318_v41  ;;  %v4131_v47 = vsel %vm4099_vm14, 2.0, %v4035_v49  ;;  %v4130_v23 = vsel %vm4098_vm3, 2.0, %v4034_v58 }
 0xc0b   :  { %vm10061_vm10 = vcmp.gt.f32.partialorder %v9797_v14, %v9804_v22  ;;  %vm10060_vm1 = vcmp.gt.f32.partialorder %v9801_v7, %v9790_v8  ;;  %v4132_v1 = vsel %vm4100_vm8, 2.0, %v4036_v9  ;;  %v9969_v58 = vmul.u32 5, %v5604_v37  ;;  %v4896_v9 = vld [vmem:[%s10042_s11 + $0x30] sm:$0xff]  ;;  %v4894_v37 = vld [vmem:[%s10042_s11 + $0x20] sm:$0xff] }
 0xc0c   :  { %v4321_v11 = vsel %vm10061_vm10, 4.0, %v4225_v26  ;;  %v4320_v60 = vsel %vm10060_vm1, 4.0, %v4224_v50  ;;  %vm4101_vm1 = vcmp.gt.f32.partialorder %v4085_v27, %v4021_v19 }
 0xc0d   :  { %v4163_v61 = vpop.permute.xlu0 %4162  ;;  %4549 = vmatprep.mubr.f32.mxu1 %v4321_v11  ;;  %v4161_v17 = vpop.permute.xlu1 %4160  ;;  %v4117_v43 = vsel %vm4101_vm1, %v4085_v27, %v4021_v19  ;;  %v4133_v62 = vsel %vm4101_vm1, 2.0, %v4037_v42  ;;  %v4299_v11 = vsel %vm4283_vm6, %v9608_v63, %v9604_v4  ;;  %vm10151_vm6 = vcmp.gt.f32.partialorder %v9763_v54, %v9753_v28  ;;  %v4898_v19 = vld [vmem:[%s10042_s11 + $0x40] sm:$0xff] }
 0xc0e   :  { %v4167_v36 = vsel %vm1037_vm11, %v4161_v17, %v4163_v61  ;;  %v4168_v51 = vsel %vm1037_vm11, %v9702_v13, %v4161_v17  ;;  %4550 = vmatmul.mubr.f32.gmra.mxu1 %v4320_v60  ;;  %v4115_v13 = vsel %vm4099_vm14, %v4071_v57, %v4019_v31  ;;  %v4301_v60 = vsel %vm4285_vm4, %v9640_v44, %v9647_v53  ;;  %v4905_v53 = vld [vmem:[%s10042_s11 + $0x78] sm:$0xff] }
 0xc0f   :  { %vm4194_vm10 = vcmp.gt.f32.partialorder %v4168_v51, %v4114_v33  ;;  %vm4195_vm2 = vcmp.gt.f32.partialorder %v4167_v36, %v4115_v13  ;;  %v4302_v4 = vsel %vm10151_vm6, %v9763_v54, %v9753_v28  ;;  %vm5394_vm4 = vmmov 0   ;;  %v4903_v28 = vld [vmem:[%s10042_s11 + $0x68] sm:$0xff]  ;;  %v4901_v54 = vld [vmem:[%s10042_s11 + $0x58] sm:$0xff] }
 0xc10   :  { %v4211_v32 = vsel %vm4195_vm2, %v4167_v36, %v4115_v13  ;;  %v4210_v15 = vsel %vm4194_vm10, %v4168_v51, %v4114_v33  ;;  %v4227_v41 = vsel %vm4195_vm2, 3.0, %v4131_v47  ;;  %v4226_v27 = vsel %vm4194_vm10, 3.0, %v4130_v23  ;;  %v4897_v51 = vld [vmem:[%s10042_s11 + $0x38] sm:$0xff]  ;;  %v4895_v13 = vld [vmem:[%s10042_s11 + $0x28] sm:$0xff] }
 0xc11   :  { %v4257_v2 = vpop.permute.xlu0 %4256  ;;  %v4165_v0 = vpop.permute.xlu1 %4164 }
 0xc12   :  { %v4264_v40 = vsel %vm1086_vm9, %v4255_v12, %v4257_v2  ;;  %v4166_v10 = vsel %vm1037_vm11, %v4163_v61, %v4165_v0  ;;  %v4181_v16 = vsel %vm1037_vm11, %v4165_v0, %v9249_v45  ;;  %v4899_v61 = vld [vmem:[%s10042_s11 + $0x48] sm:$0xff] }
 0xc13   :  { %vm4196_vm13 = vcmp.gt.f32.partialorder %v4166_v10, %v4116_v48  ;;  %vm4197_vm0 = vcmp.gt.f32.partialorder %v4181_v16, %v4117_v43  ;;  %vm4290_vm11 = vcmp.gt.f32.partialorder %v4264_v40, %v4210_v15  ;;  %v4891_v0 = vld [vmem:[%s10042_s11 + $0x8] sm:$0xff] }
 0xc14   :  { %v4213_v12 = vsel %vm4197_vm0, %v4181_v16, %v4117_v43  ;;  %v4229_v45 = vsel %vm4197_vm0, 3.0, %v4133_v62  ;;  %v4212_v50 = vsel %vm4196_vm13, %v4166_v10, %v4116_v48  ;;  %v4228_v57 = vsel %vm4196_vm13, 3.0, %v4132_v1  ;;  %v4892_v48 = vld [vmem:[%s10042_s11 + $0x10] sm:$0xff] }
 0xc15   :  { %v4261_v52 = vpop.permute.xlu0 %4260  ;;  %v4259_v55 = vpop.permute.xlu1 %4258  ;;  %v4322_v31 = vsel %vm4290_vm11, 4.0, %v4226_v27  ;;  %v4306_v44 = vsel %vm4290_vm11, %v4264_v40, %v4210_v15 }
 0xc16   :  { %v4277_v38 = vsel %vm1086_vm9, %v4261_v52, %v9288_v6  ;;  %v4262_v20 = vsel %vm1086_vm9, %v4259_v55, %v4261_v52  ;;  %v4263_v29 = vsel %vm1086_vm9, %v4257_v2, %v4259_v55  ;;  %vm10150_vm9 = vcmp.gt.f32.partialorder %v9797_v14, %v9804_v22  ;;  %v4893_v2 = vld [vmem:[%s10042_s11 + $0x18] sm:$0xff] }
 0xc17   :  { %vm4291_vm15 = vcmp.gt.f32.partialorder %v4263_v29, %v4211_v32  ;;  %vm4293_vm1 = vcmp.gt.f32.partialorder %v4277_v38, %v4213_v12  ;;  %vm4292_vm3 = vcmp.gt.f32.partialorder %v4262_v20, %v4212_v50 }
 0xc18   :  { %v4323_v25 = vsel %vm4291_vm15, 4.0, %v4227_v41  ;;  %v4325_v26 = vsel %vm4293_vm1, 4.0, %v4229_v45  ;;  %v4324_v6 = vsel %vm4292_vm3, 4.0, %v4228_v57 }
 0xc19   :  { %4469 = vmatprep.mubr.f32.mxu0 %v4323_v25  ;;  %4554 = vmatprep.mubr.f32.mxu1 %v4325_v26 }
 0xc1a   :  { %4470 = vmatmul.mubr.f32.gmra.mxu0 %v4322_v31  ;;  %4555 = vmatmul.mubr.f32.gmra.mxu1 %v4324_v6 }
 0xc1b   :  { %4701 = vmatprep.mubr.f32.mxu0 %v9284_v5  ;;  %4786 = vmatprep.mubr.f32.mxu1 %v9314_v35  ;;  %v4300_v5 = vsel %vm4284_vm5, %v9644_v56, %v9650_v30  ;;  %v4305_v35 = vsel %vm10150_vm9, %v9797_v14, %v9804_v22  ;;  %v4308_v56 = vsel %vm4292_vm3, %v4262_v20, %v4212_v50  ;;  %v4904_v30 = vld [vmem:[%s10042_s11 + $0x70] sm:$0xff]  ;;  %vm4816_vm5 = vcmask 261120  }
 0xc1c   :  { %v4900_v14 = vld [vmem:[%s10042_s11 + $0x50] sm:$0xff] }
 0xc1e   :  { %4702 = vmatmul.mubr.f32.vlgmr.msra.gmra.mxu0 %v9306_v3  ;;  %4787 = vmatmul.mubr.f32.vlgmr.msra.gmra.mxu1 %v9282_v39  ;;  %v4298_v39 = vsel %vm4282_vm7, %v9613_v34, %v9615_v24  ;;  %v4303_v3 = vsel %vm4287_vm12, %v9758_v21, %v9766_v18  ;;  %vm10152_vm7 = vcmp.gt.f32.partialorder %v9801_v7, %v9790_v8  ;;  %v4902_v21 = vld [vmem:[%s10042_s11 + $0x60] sm:$0xff] }
 0xc1f   :  { %4706 = vmatprep.mubr.f32.mxu0 %v4299_v11  ;;  %4791 = vmatprep.mubr.f32.mxu1 %v4301_v60  ;;  %v4304_v63 = vsel %vm10152_vm7, %v9801_v7, %v9790_v8  ;;  %v4307_v34 = vsel %vm4291_vm15, %v4263_v29, %v4211_v32  ;;  %v4309_v24 = vsel %vm4293_vm1, %v4277_v38, %v4213_v12 }
 0xc20   :  { %5257 = vmatpush3.msra.mxu1 %v4905_v53 }
 0xc21   :  { %5258 = vmatprep.subr.mxu1 %v10066_v46 }
 0xc22   :  { %4707 = vmatmul.mubr.f32.gmra.mxu0 %v4298_v39  ;;  %4792 = vmatmul.mubr.f32.gmra.mxu1 %v4300_v5 }
 0xc23   :  { %4711 = vmatprep.mubr.f32.mxu0 %v4303_v3  ;;  %4796 = vmatprep.mubr.f32.mxu1 %v4305_v35 }
 0xc24   :  { %5259 = vmatpush3.msra.mxu1 %v4904_v30 }
 0xc25   :  { %5260 = vmatprep.subr.mxu1 %v10066_v46 }
 0xc26   :  { %4712 = vmatmul.mubr.f32.gmra.mxu0 %v4302_v4  ;;  %4797 = vmatmul.mubr.f32.gmra.mxu1 %v4304_v63 }
 0xc27   :  { %4716 = vmatprep.mubr.f32.mxu0 %v4307_v34  ;;  %4801 = vmatprep.mubr.f32.mxu1 %v4309_v24 }
 0xc28   :  { %5261 = vmatpush3.msra.mxu1 %v4903_v28 }
 0xc29   :  { %5262 = vmatprep.subr.mxu1 %v10066_v46 }
 0xc2a   :  { %4717 = vmatmul.mubr.f32.gmra.mxu0 %v4306_v44  ;;  %4802 = vmatmul.mubr.f32.gmra.mxu1 %v4308_v56 }
 0xc2b   :  { %5253 = vmatprep.mubr.msk.f32.mxu0 %vm5394_vm4, %v10066_v46  ;;  %5288 = vmatprep.mubr.msk.f32.mxu1 %vm5394_vm4, %v10066_v46 }
 0xc2c   :  { %5263 = vmatpush3.msra.mxu1 %v4902_v21 }
 0xc2d   :  { %5264 = vmatprep.subr.mxu1 %v10066_v46 }
 0xc2e   :  { %5265 = vmatpush3.msra.mxu1 %v4901_v54 }
 0xc2f   :  { %5266 = vmatprep.subr.mxu1 %v10066_v46 }
 0xc30   :  { %5267 = vmatpush3.msra.mxu1 %v4900_v14 }
 0xc31   :  { %5268 = vmatprep.subr.mxu1 %v10066_v46 }
 0xc32   :  { %5269 = vmatpush3.msra.mxu1 %v4899_v61 }
 0xc33   :  { %5270 = vmatprep.subr.mxu1 %v10066_v46 }
 0xc34   :  { %5271 = vmatpush3.msra.mxu1 %v4898_v19 }
 0xc35   :  { %5272 = vmatprep.subr.mxu1 %v10066_v46 }
 0xc36   :  { %5273 = vmatpush3.msra.mxu1 %v4897_v51  ;;  %v4810_v51 = vld [vmem:[%s10040_s9 + $0x18] sm:$0xff] }
 0xc37   :  { %5274 = vmatprep.subr.mxu1 %v10066_v46 }
 0xc38   :  { %5275 = vmatpush3.msra.mxu1 %v4896_v9 }
 0xc39   :  { %5276 = vmatprep.subr.mxu1 %v10066_v46 }
 0xc3a   :  { %5277 = vmatpush3.msra.mxu1 %v4895_v13  ;;  %v4809_v13 = vld [vmem:[%s10040_s9 + $0x10] sm:$0xff] }
 0xc3b   :  { %5278 = vmatprep.subr.mxu1 %v10066_v46 }
 0xc3c   :  { %5279 = vmatpush3.msra.mxu1 %v4894_v37 }
 0xc3d   :  { %5280 = vmatprep.subr.mxu1 %v10066_v46 }
 0xc3e   :  { %5281 = vmatpush3.msra.mxu1 %v4893_v2  ;;  %v4808_v2 = vld [vmem:[%s10040_s9 + $0x8] sm:$0xff] }
 0xc3f   :  { %5282 = vmatprep.subr.mxu1 %v10066_v46 }
 0xc40   :  { %5283 = vmatpush3.msra.mxu1 %v4892_v48 }
 0xc41   :  { %5284 = vmatprep.subr.mxu1 %v10066_v46 }
 0xc42   :  { %5285 = vmatpush3.msra.mxu1 %v4891_v0 }
 0xc43   :  { %5286 = vmatprep.subr.mxu1 %v10066_v46 }
 0xc81   :  { %v5079_v18 = vpop.f32.mrf.mxu0 }
 0xc82   :  { %v5123_v8 = vpop.f32.mrf.mxu1 }
 0xc83   :  { %v5080_v7 = vpop.f32.mrf.mxu0 }
 0xc84   :  { %v5081_v22 = vadd.f32 %v5080_v7, %v5079_v18  ;;  %v5124_v59 = vpop.f32.mrf.mxu1 }
 0xc85   :  { %v5125_v17 = vadd.f32 %v5124_v59, %v5123_v8 }
 0xc87   :  { %v4542_v36 = vadd.f32 %v5125_v17, %v5081_v22 }
 0xc89   :  { %v5291_v49 = vtrunc.f32 %v4542_v36 }
 0xc8b   :  { %v5292_v33 = vcvt.f32.s32 %v5291_v49 }
 0xc8d   :  { %v4565_v42 = vadd.s32 %v5292_v33, %v9969_v58 }
 0xc8f   :  { %4569 = vst [vmem:[#allocation4] sm:$0xff] %v4565_v42 }
 0xcae   :  { %v5082_v40 = vpop.f32.mrf.mxu0 }
 0xcb0   :  { %v5083_v43 = vpop.f32.mrf.mxu0 }
 0xcb1   :  { %v5084_v47 = vadd.f32 %v5083_v43, %v5082_v40  ;;  %v4807_v40 = vld [vmem:[%s10040_s9] sm:$0xff]  ;;  %s5395_s9 = smov [#allocation4]  }
 0xcb2   :  { %v5126_v10 = vpop.f32.mrf.mxu1  ;;  %s5022_s7 = sshll.u32 %s5395_s9, 4  ;;  %s5023_s7 = int_to_ptr.vmem [resolvable:$true] %s5022_s7 }
 0xcb3   :  { %s5333_s26 = scalar_lea.vmem %s5023_s7, 512  ;;  %p5338_p1 = scmp.lt.s32.totalorder %s5023_s7, %s5023_s7 }
 0xcb4   :  { %v5127_v16 = vpop.f32.mrf.mxu1  ;;  %p5334_p0 = scmp.ne.s32.totalorder %s5023_s7, %s5333_s26  ;;  %p5339_p2 = scmp.lt.s32.totalorder %s5333_s26, %s5333_s26 }
 0xcb5   :  { %v5128_v23 = vadd.f32 %v5127_v16, %v5126_v10  ;;  %v4815_v16 = vld [vmem:[%s10041_s10] sm:$0xf] }
 0xcb6   :  { %p5340_p3 = por %p5339_p2, %p5338_p1 }
 0xcb7   :  { %v4547_v32 = vadd.f32 %v5128_v23, %v5084_v47  ;;  %v4890_v47 = vld [vmem:[%s10042_s11] sm:$0xff] }
 0xcb8   :  { %5287 = vmatpush3.msra.mxu1 %v4890_v47  ;;  %p5341_p4 = pnand %p5340_p3, %p5334_p0 }
 0xcb9   :  { %v5293_v62 = vtrunc.f32 %v4547_v32 }
 0xcbb   :  { %v5294_v15 = vcvt.f32.s32 %v5293_v62 }
 0xcbd   :  { %v4566_v1 = vadd.s32 %v5294_v15, %v9969_v58 }
 0xcbf   :  { %4570 = vst [vmem:[#allocation4 + $0x8] sm:$0xff] %v4566_v1 }
 0xcca   :  { %v5085_v52 = vpop.f32.mrf.mxu0 }
 0xccc   :  { %v5086_v55 = vpop.f32.mrf.mxu0 }
 0xccd   :  { %v5087_v45 = vadd.f32 %v5086_v55, %v5085_v52 }
 0xcce   :  { %v5129_v41 = vpop.f32.mrf.mxu1 }
 0xcd0   :  { %v5130_v12 = vpop.f32.mrf.mxu1 }
 0xcd1   :  { %v5131_v38 = vadd.f32 %v5130_v12, %v5129_v41 }
 0xcd3   :  { %v4552_v20 = vadd.f32 %v5131_v38, %v5087_v45 }
 0xcd5   :  { %v5295_v29 = vtrunc.f32 %v4552_v20 }
 0xcd7   :  { %v5296_v50 = vcvt.f32.s32 %v5295_v29 }
 0xcd9   :  { %v4567_v57 = vadd.s32 %v5296_v50, %v9969_v58 }
 0xcda   :  { %v5088_v25 = vpop.f32.mrf.mxu0  ;;  %v5132_v26 = vpop.f32.mrf.mxu1 }
 0xcdb   :  { %4571 = vst [vmem:[#allocation4 + $0x10] sm:$0xff] %v4567_v57 }
 0xcdc   :  { %v5089_v27 = vpop.f32.mrf.mxu0  ;;  %v5133_v6 = vpop.f32.mrf.mxu1 }
 0xcdd   :  { %v5090_v31 = vadd.f32 %v5089_v27, %v5088_v25  ;;  %v5134_v11 = vadd.f32 %v5133_v6, %v5132_v26 }
 0xcde   :  { %v5167_v60 = vpop.f32.mrf.mxu0  ;;  %v5211_v39 = vpop.f32.mrf.mxu1 }
 0xcdf   :  { %v4557_v5 = vadd.f32 %v5134_v11, %v5090_v31 }
 0xce0   :  { %v5168_v3 = vpop.f32.mrf.mxu0  ;;  %v5212_v35 = vpop.f32.mrf.mxu1 }
 0xce1   :  { %v5297_v4 = vtrunc.f32 %v4557_v5  ;;  %v5213_v49 = vadd.f32 %v5212_v35, %v5211_v39 }
 0xce2   :  { %v5170_v63 = vpop.f32.mrf.mxu0  ;;  %v5214_v34 = vpop.f32.mrf.mxu1 }
 0xce3   :  { %v5298_v24 = vcvt.f32.s32 %v5297_v4 }
 0xce4   :  { %v5171_v44 = vpop.f32.mrf.mxu0  ;;  %v5215_v56 = vpop.f32.mrf.mxu1 }
 0xce5   :  { %v4568_v53 = vadd.s32 %v5298_v24, %v9969_v58  ;;  %v5172_v61 = vadd.f32 %v5171_v44, %v5170_v63  ;;  %v5216_v17 = vadd.f32 %v5215_v56, %v5214_v34  ;;  %v5169_v58 = vadd.f32 %v5168_v3, %v5167_v60 }
 0xce6   :  { %v5173_v30 = vpop.f32.mrf.mxu0  ;;  %v5217_v28 = vpop.f32.mrf.mxu1 }
 0xce7   :  { %4572 = vst [vmem:[#allocation4 + $0x18] sm:$0xff] %v4568_v53  ;;  %v4794_v42 = vadd.f32 %v5216_v17, %v5172_v61  ;;  %v4789_v48 = vadd.f32 %v5213_v49, %v5169_v58 }
 0xce8   :  { %v5174_v21 = vpop.f32.mrf.mxu0  ;;  %v5218_v54 = vpop.f32.mrf.mxu1 }
 0xce9   :  { %v5175_v14 = vadd.f32 %v5174_v21, %v5173_v30  ;;  %v5219_v7 = vadd.f32 %v5218_v54, %v5217_v28  ;;  %v4812_v43 = vmul.f32 %v4808_v2, %v4794_v42  ;;  %v4811_v10 = vmul.f32 %v4807_v40, %v4789_v48 }
 0xcea   :  { %v5176_v18 = vpop.f32.mrf.mxu0  ;;  %v5220_v8 = vpop.f32.mrf.mxu1 }
 0xceb   :  { %v4799_v9 = vadd.f32 %v5219_v7, %v5175_v14 }
 0xcec   :  { %v5177_v22 = vpop.f32.mrf.mxu0  ;;  %v5221_v59 = vpop.f32.mrf.mxu1 }
 0xced   :  { %v5178_v19 = vadd.f32 %v5177_v22, %v5176_v18  ;;  %v5222_v36 = vadd.f32 %v5221_v59, %v5220_v8  ;;  %v4813_v0 = vmul.f32 %v4809_v13, %v4799_v9 }
 0xcef   :  { %v4804_v33 = vadd.f32 %v5222_v36, %v5178_v19 }
 0xcf1   :  { %v4814_v37 = vmul.f32 %v4810_v51, %v4804_v33 }
 0xcf3   :  { %5246 = vmatpush3.msra.mxu0 %v4814_v37 }
 0xcf4   :  { %5247 = vmatprep.subr.mxu0 %v10066_v46 }
 0xcf5   :  { %5248 = vmatpush3.msra.mxu0 %v4813_v0 }
 0xcf6   :  { %5249 = vmatprep.subr.mxu0 %v10066_v46 }
 0xcf7   :  { %5250 = vmatpush3.msra.mxu0 %v4812_v43 }
 0xcf8   :  { %5251 = vmatprep.subr.mxu0 %v10066_v46 }
 0xcf9   :  { %5252 = vmatpush3.msra.mxu0 %v4811_v10 }
 0xcfa   :  { %5254 = vmatmul.mubr.msk.f32.vlgmr.msra.gmra.mxu0 %vm4816_vm5, %v4815_v16 }
 0xdba   :  { %v4886_v23 = vpop.f32.mrf.mxu0 }
 0xdbb   :  { %5289 = vmatmul.mubr.f32.vlgmr.msra.gmra.mxu1 %v4886_v23 }
 0xdbc   :  { %v5255_v32 = vpop.f32.mrf.mxu0 }
 0xdbd   :  { %5344 = shalt.err (!%p5341_p4)
}
 0xdbe   :  { %s5396_s10 = smov 128   ;;  %s5397_s0 = smov 8   ;;  %v5046_v46 = vld [vmem:[%s10043_s12] ss:$0 sm:$0xff]  ;;  %vm4983_vm12 = vcmask 1043456  }
 0xdbf   :  { %5028 = dma.vmem_to_hbm [thread:$0]  %s5023_s7, 512, %s10045_s14, [#allocation5], %s5396_s10, %s5396_s10, %s5397_s0  }
 0xdc0   :  { %s5398_s12 = smov [#allocation2]  }
 0xdc1   :  { %s5013_s14 = sshll.u32 %s5398_s12, 4  ;;  %s5014_s14 = int_to_ptr.vmem [resolvable:$true] %s5013_s14 }
 0xdc2   :  { %s5353_s23 = scalar_lea.vmem %s5014_s14, 64  ;;  %p5358_p6 = scmp.lt.s32.totalorder %s5014_s14, %s5014_s14 }
 0xdc3   :  { %p5354_p5 = scmp.ne.s32.totalorder %s5014_s14, %s5353_s23  ;;  %p5359_p7 = scmp.lt.s32.totalorder %s5353_s23, %s5353_s23 }
 0xdc5   :  { %p5360_p8 = por %p5359_p7, %p5358_p6 }
 0xdc7   :  { %p5361_p9 = pnand %p5360_p8, %p5354_p5 }
 0xe7b   :  { %v4979_v62 = vpop.f32.mrf.mxu1 }
 0xe7c   :  { %v4980_v15 = vadd.f32 %v5046_v46, %v4979_v62 }
 0xe7d   :  { %v5290_v1 = vpop.f32.mrf.mxu1 }
 0xe7e   :  { %v4984_v52 = vsel %vm4983_vm12, %v4980_v15, 0.0 }
 0xe7f   :  { %v4985_v55 = vrot.slane %v4984_v52, 4 }
 0xe81   :  { %v4986_v41 = vadd.f32 %v4985_v55, %v4984_v52 }
 0xe83   :  { %v4987_v12 = vrot.slane %v4986_v41, 2 }
 0xe85   :  { %v4988_v45 = vadd.f32 %v4987_v12, %v4986_v41 }
 0xe87   :  { %v4989_v38 = vrot.slane %v4988_v45, 1 }
 0xe89   :  { %v4990_v20 = vadd.f32 %v4989_v38, %v4988_v45 }
 0xe8b   :  { %v4992_v29 = vmul.f32 0.25, %v4990_v20 }
 0xe8d   :  { %v4993_v50 = vsub.f32 %v4980_v15, %v4992_v29 }
 0xe8f   :  { %v4994_v57 = vmul.f32 %v4993_v50, %v4993_v50 }
 0xe91   :  { %v4995_v25 = vsel %vm4983_vm12, %v4994_v57, 0.0 }
 0xe92   :  { %v4996_v26 = vrot.slane %v4995_v25, 4 }
 0xe94   :  { %v4997_v27 = vadd.f32 %v4996_v26, %v4995_v25 }
 0xe96   :  { %v4998_v6 = vrot.slane %v4997_v27, 2 }
 0xe98   :  { %v4999_v31 = vadd.f32 %v4998_v6, %v4997_v27 }
 0xe9a   :  { %v5000_v11 = vrot.slane %v4999_v31, 1 }
 0xe9c   :  { %v5001_v60 = vadd.f32 %v5000_v11, %v4999_v31 }
 0xe9e   :  { %v5002_v39 = vmul.f32 0.25, %v5001_v60 }
 0xea0   :  { %v5003_v5 = vadd.f32 1e-05, %v5002_v39 }
 0xea2   :  { %5329 = vrsqrt.f32 %v5003_v5 }
 0xeaf   :  { %v5330_v3 = vpop.eup %5329 }
 0xeb0   :  { %v5005_v35 = vmul.f32 %v5330_v3, %v4993_v50 }
 0xeb2   :  { %5006 = vst [vmem:[#allocation2] sm:$0xf] %v5005_v35 }
 0xeb3   :  { %5364 = shalt.err (!%p5361_p9)
}
 0xeb4   :  { %5016 = dma.vmem_to_hbm [thread:$0]  %s5014_s14, 64, %s10044_s13, [#allocation3]  }
 0xeb5   :  { %5373 = dma.done.wait [#allocation3], 64  }
 0xeb6   :  { %5374 = vsyncadd [#allocation3], 4294967232 }
 0xeb7   :  { %5375 = dma.done.wait [#allocation5], 512  }
 0xeb8   :  { %5376 = vsyncadd [#allocation5], 4294966784 }
 0xeb9   :  { %5035 = vsyncpa [#allocation3], 1 }
 0xeba   :  { %5036 = vsyncpa [#allocation5], 1 }

</bundles_post_ra>
